<compile_context>
chip_gen: v6e
topology: v6e:2x2x1
jax: 0.10.0
libtpu: 0.0.40
codegen_flags: <defaults>
</compile_context>

<pallas_src>
import jax
import jax.numpy as jnp
from jax.experimental import pallas as pl
from jax.experimental.pallas import tpu as pltpu


# ------------------------------ fused kernel --------------------------------

def _make_fused_kernel(num_layers, t_seq, t_day, mp, hidden):
    """Fused forward kernel for fixed layer count / sequence lengths / padded rows."""

    def kernel(*refs):
        f32, bf16 = jnp.float32, jnp.bfloat16

        # ---- unpack refs (order must match the wrapper's `inputs` list) ----
        day_msg_ref, c0_ref, c1_ref, c2_ref = refs[0:4]
        idx = 4
        cheby = []
        for _ in range(num_layers):
            cheby.append((refs[idx], refs[idx + 1]))
            idx += 2
        x_ref = refs[idx]
        idx += 1
        gru = []
        for _ in range(num_layers):
            gru.append(refs[idx:idx + 7])
            idx += 7
        wc_ref, cb_ref = refs[idx], refs[idx + 1]
        idx += 2
        o_ref = refs[idx]

        # ---- day encoder: stacked ChebyNet cells, one lane-dense matmul each ----
        c0 = c0_ref[...]          # (T_day*Mp, 1) per-node Chebyshev coefficients
        c1 = c1_ref[...]
        c2 = c2_ref[...]
        msg = day_msg_ref[...]    # (T_day*Mp, 4*Din) = [c0*x | c1*x | c2*x | x]
        feat = None
        for li, (w_ref, b_ref) in enumerate(cheby):
            y = jnp.dot(msg.astype(bf16), w_ref[...],
                        preferred_element_type=f32) + b_ref[...]
            feat = jnp.maximum(y, 0.0)
            # TODO(synk): F.dropout(p=0.1, training=True) is stochastic; identity here (eval).
            if li + 1 < num_layers:
                msg = jnp.concatenate([c0 * feat, c1 * feat, c2 * feat, feat], axis=1)
        # feat: (T_day*Mp, H), per-t_day blocks contiguous and sublane-aligned.

        # ---- GRU encoder (gate order r, z, n; h0 = 0) ----
        # Input projections batched over time (off the recurrence); the short serial
        # recurrence (T=8) is fully unrolled, with only the small h @ whh dots on it.
        xs_flat = x_ref[...]      # (T_seq*Mp, Din)
        outs = None
        for (wih_rz, wih_n, whh_rz, whh_n, b_rz, bih_n, bhh_n) in gru:
            gi_rz = jnp.dot(xs_flat.astype(bf16), wih_rz[...],
                            preferred_element_type=f32) + b_rz[...]     # bhh_rz folded in
            gi_n = jnp.dot(xs_flat.astype(bf16), wih_n[...],
                           preferred_element_type=f32) + bih_n[...]
            whh_rz_v, whh_n_v, bhh_n_v = whh_rz[...], whh_n[...], bhh_n[...]
            outs = []
            h = None
            for t in range(t_seq):
                grz = gi_rz[t * mp:(t + 1) * mp, :]     # aligned row-block slices
                gn = gi_n[t * mp:(t + 1) * mp, :]
                if t == 0:
                    # h0 == 0 -> gh == bhh; skip both h @ whh dots.
                    rz = jax.nn.sigmoid(grz)
                    r, z = rz[:, :hidden], rz[:, hidden:]
                    n = jnp.tanh(gn + r * bhh_n_v)
                    h = (1.0 - z) * n
                else:
                    hb = h.astype(bf16)
                    gh_rz = jnp.dot(hb, whh_rz_v, preferred_element_type=f32)
                    gh_n = jnp.dot(hb, whh_n_v, preferred_element_type=f32) + bhh_n_v
                    rz = jax.nn.sigmoid(grz + gh_rz)
                    r, z = rz[:, :hidden], rz[:, hidden:]
                    n = jnp.tanh(gn + r * gh_n)
                    h = (1.0 - z) * n + z * h
                outs.append(h)
            xs_flat = jnp.concatenate(outs, axis=0)     # (T_seq*Mp, H) next layer input

        # ---- end_conv (Conv2d kernel (1, H)) + ReLU as ONE lane-dense matmul ----
        # Channel order matches torch.cat((gru_out, day_out), dim=1): T_seq GRU states
        # first, then T_day day-encoder states.
        chunks = outs + [feat[t * mp:(t + 1) * mp, :] for t in range(t_day)]
        big = jnp.concatenate(chunks, axis=1)           # (Mp, (T_seq + T_day) * H)
        acc = jnp.dot(big.astype(bf16), wc_ref[...],
                      preferred_element_type=f32) + cb_ref[...]
        o_ref[...] = jnp.maximum(acc, 0.0)

    return kernel


# ----------------------------- parameters & glue ----------------------------

def init_params(key, settings):
    Din = settings['var_len'] - 2
    H = settings['hidden_dims']
    horizon = settings['output_len']
    T_seq = settings['input_len']
    T_day = settings['day_seq_len']
    C = T_seq + T_day
    L = settings['num_layers']
    dims = [Din] + [H] * L
    scale = 0.1
    params = {'cheby': [], 'gru': []}

    for l in range(L):
        key, k1, k2 = jax.random.split(key, 3)
        din, dout = dims[l], dims[l + 1]
        # Torch filter weight acts on msg = [d*x, d*x, (2d^2-1)x, (4d^3-3d)x, x] (5*din).
        # Repack VERTICALLY to (4*din, dout) = [W0+W1; W2; W3; W4] so the kernel input
        # is the lane-concat [c0*x | c1*x | c2*x | x] and the matmul output is dense.
        w5 = scale * jax.random.normal(k1, (5 * din, dout), jnp.float32)
        blk = [w5[i * din:(i + 1) * din] for i in range(5)]
        wcat = jnp.concatenate([blk[0] + blk[1], blk[2], blk[3], blk[4]], axis=0)
        params['cheby'].append({
            'w': wcat,                                                    # (4*din, dout)
            'b': scale * jax.random.normal(k2, (1, dout), jnp.float32),
        })

    for l in range(L):
        in_l = Din if l == 0 else H
        key, k1, k2, k3, k4 = jax.random.split(key, 5)
        # Standard GRU params (gate order r, z, n), stored column-split into rz / n
        # blocks so the recurrence never lane-extracts at offsets 2H / 3H.
        wih = scale * jax.random.normal(k1, (in_l, 3 * H), jnp.float32)
        whh = scale * jax.random.normal(k2, (H, 3 * H), jnp.float32)
        bih = scale * jax.random.normal(k3, (1, 3 * H), jnp.float32)
        bhh = scale * jax.random.normal(k4, (1, 3 * H), jnp.float32)
        params['gru'].append({
            'wih_rz': wih[:, :2 * H], 'wih_n': wih[:, 2 * H:],
            'whh_rz': whh[:, :2 * H], 'whh_n': whh[:, 2 * H:],
            # bhh_rz folds into the hoisted input-projection bias; bhh_n must stay
            # separate (it sits inside r * (h @ whh_n + bhh_n)).
            'b_rz': bih[:, :2 * H] + bhh[:, :2 * H],
            'bih_n': bih[:, 2 * H:],
            'bhh_n': bhh[:, 2 * H:],
        })

    key, k1, k2 = jax.random.split(key, 3)
    # torch Conv2d weight (horizon, C, 1, H): channel-major flatten to (C*H, horizon)
    # so end_conv is a single matmul; channel order = [T_seq GRU, then T_day day].
    conv_w = scale * jax.random.normal(k1, (horizon, C, 1, H), jnp.float32)
    params['conv_w'] = jnp.transpose(conv_w[:, :, 0, :], (1, 2, 0)).reshape(C * H, horizon)
    params['conv_b'] = scale * jax.random.normal(k2, (1, horizon), jnp.float32)
    return params


def chebynet_forward(params, settings, x_input, time_id, day_seq, adj):
    """x_input: (B, N, T_seq, var_len), day_seq: (B, N, T_day, Din), adj: (N, N).
    Returns (B, N, horizon). time_id is unused (as in the PyTorch forward)."""
    del time_id
    N = settings['capacity']
    Din = settings['var_len'] - 2
    H = settings['hidden_dims']
    T_seq = settings['input_len']
    T_day = settings['day_seq_len']
    horizon = settings['output_len']
    L = settings['num_layers']
    B = x_input.shape[0]
    M = B * N
    Mp = ((M + 7) // 8) * 8          # pad rows to a sublane multiple (12 -> 16)
    bf16 = jnp.bfloat16

    # diag(adj)-only operator (faithful to einsum('nn,bnd->bnd')); per-node Cheb coefs.
    d = jnp.diagonal(adj).astype(jnp.float32)
    c0n, c1n, c2n = d, 2.0 * d * d - 1.0, 4.0 * d ** 3 - 3.0 * d

    def coef_rows(v):                                  # (N,) -> (T_day*Mp, 1)
        vb = jnp.pad(jnp.tile(v, (B,)), (0, Mp - M))   # (Mp,) in (b, n) order
        return jnp.tile(vb, (T_day,)).reshape(T_day * Mp, 1)

    c0, c1, c2 = coef_rows(c0n), coef_rows(c1n), coef_rows(c2n)

    # Day rows in (t_day, b, n) order, padded per-t block so in-kernel row slices are
    # sublane aligned; the layer-0 Chebyshev msg (lane-concat) is the kernel input.
    day = jnp.transpose(day_seq.astype(jnp.float32), (2, 0, 1, 3)).reshape(T_day, M, Din)
    day = jnp.pad(day, ((0, 0), (0, Mp - M), (0, 0))).reshape(T_day * Mp, Din)
    day_msg = jnp.concatenate([c0 * day, c1 * day, c2 * day, day], axis=1)

    # GRU input, (t_seq, b, n)-major rows, padded.
    x_in = x_input[..., :Din].astype(jnp.float32).reshape(M, T_seq, Din)
    x_t = jnp.transpose(x_in, (1, 0, 2))               # (T_seq, M, Din)
    x_t = jnp.pad(x_t, ((0, 0), (0, Mp - M), (0, 0))).reshape(T_seq * Mp, Din)

    inputs = [day_msg, c0, c1, c2]
    for l in range(L):
        inputs += [params['cheby'][l]['w'].astype(bf16), params['cheby'][l]['b']]
    inputs.append(x_t)
    for l in range(L):
        p = params['gru'][l]
        inputs += [p['wih_rz'].astype(bf16), p['wih_n'].astype(bf16),
                   p['whh_rz'].astype(bf16), p['whh_n'].astype(bf16),
                   p['b_rz'], p['bih_n'], p['bhh_n']]
    inputs += [params['conv_w'].astype(bf16), params['conv_b']]

    kernel = _make_fused_kernel(L, T_seq, T_day, Mp, H)
    out = pl.pallas_call(
        kernel,
        out_shape=jax.ShapeDtypeStruct((Mp, horizon), jnp.float32),
        in_specs=[pl.BlockSpec(memory_space=pltpu.MemorySpace.VMEM)] * len(inputs),
        out_specs=pl.BlockSpec(memory_space=pltpu.MemorySpace.VMEM),
        # NOTE: gridless + whole-array VMEM residency is right at these sizes (<100 KB
        # total).  If B*N / T ever scale up: (a) add a grid over the Mp row dim with
        # dimension_semantics=("parallel",) so v7x's second TensorCore is used, and
        # (b) set pltpu.CompilerParams(vmem_limit_bytes=...) -- scoped defaults are
        # 16 MiB (v5e) / 32 MiB (v6e, v7x), and v7x physical VMEM is only 64 MiB.
    )(*inputs)
    return out[:M].reshape(B, N, horizon)


# ----------------------------------- main -----------------------------------

if __name__ == "__main__":
    settings = dict(
        capacity=6,        # N
        var_len=5,         # input_dim = var_len - 2 = 3
        hidden_dims=16,    # H
        var_out=1,
        output_len=4,      # horizon
        input_len=8,       # T_seq
        day_seq_len=5,     # T_day
        num_layers=2,
    )
    B = 2
    N = settings['capacity']
    Din = settings['var_len'] - 2

    key = jax.random.PRNGKey(0)
    kp, kx, kd, ka = jax.random.split(key, 4)
    params = init_params(kp, settings)

    x_input = jax.random.normal(
        kx, (B, N, settings['input_len'], settings['var_len']), jnp.float32)
    time_id = jnp.zeros((B, settings['input_len']), jnp.int32)
    day_seq = jax.random.normal(
        kd, (B, N, settings['day_seq_len'], Din), jnp.float32)
    adj = jax.random.normal(ka, (N, N), jnp.float32)

    fwd = jax.jit(
        lambda p, xi, ti, ds, a: chebynet_forward(p, settings, xi, ti, ds, a))
    out = jax.block_until_ready(fwd(params, x_input, time_id, day_seq, adj))

    assert out.shape == (B, N, settings['output_len']), out.shape
    assert bool(jnp.all(jnp.isfinite(out)))
    print("KERNEL_OK")
</pallas_src>

<mosaic_0001>
module attributes {stable_mosaic.version = 11 : i64} {
  func.func @kernel(%arg0: memref<80x12xf32, #tpu.memory_space<vmem>>, %arg1: memref<80x1xf32, #tpu.memory_space<vmem>>, %arg2: memref<80x1xf32, #tpu.memory_space<vmem>>, %arg3: memref<80x1xf32, #tpu.memory_space<vmem>>, %arg4: memref<12x16xbf16, #tpu.memory_space<vmem>>, %arg5: memref<1x16xf32, #tpu.memory_space<vmem>>, %arg6: memref<64x16xbf16, #tpu.memory_space<vmem>>, %arg7: memref<1x16xf32, #tpu.memory_space<vmem>>, %arg8: memref<128x3xf32, #tpu.memory_space<vmem>>, %arg9: memref<3x32xbf16, #tpu.memory_space<vmem>>, %arg10: memref<3x16xbf16, #tpu.memory_space<vmem>>, %arg11: memref<16x32xbf16, #tpu.memory_space<vmem>>, %arg12: memref<16x16xbf16, #tpu.memory_space<vmem>>, %arg13: memref<1x32xf32, #tpu.memory_space<vmem>>, %arg14: memref<1x16xf32, #tpu.memory_space<vmem>>, %arg15: memref<1x16xf32, #tpu.memory_space<vmem>>, %arg16: memref<16x32xbf16, #tpu.memory_space<vmem>>, %arg17: memref<16x16xbf16, #tpu.memory_space<vmem>>, %arg18: memref<16x32xbf16, #tpu.memory_space<vmem>>, %arg19: memref<16x16xbf16, #tpu.memory_space<vmem>>, %arg20: memref<1x32xf32, #tpu.memory_space<vmem>>, %arg21: memref<1x16xf32, #tpu.memory_space<vmem>>, %arg22: memref<1x16xf32, #tpu.memory_space<vmem>>, %arg23: memref<208x4xbf16, #tpu.memory_space<vmem>>, %arg24: memref<1x4xf32, #tpu.memory_space<vmem>>, %arg25: memref<16x4xf32, #tpu.memory_space<vmem>>) attributes {dimension_semantics = [], scalar_prefetch = 0 : i64, scratch_operands = 0 : i64, tpu.core_type = #tpu.core_type<tc>} {
    %c0 = arith.constant 0 : index
    %c0_0 = arith.constant 0 : index
    %0 = vector.load %arg1[%c0, %c0_0] : memref<80x1xf32, #tpu.memory_space<vmem>>, vector<80x1xf32>
    %c0_1 = arith.constant 0 : index
    %c0_2 = arith.constant 0 : index
    %1 = vector.load %arg2[%c0_1, %c0_2] : memref<80x1xf32, #tpu.memory_space<vmem>>, vector<80x1xf32>
    %c0_3 = arith.constant 0 : index
    %c0_4 = arith.constant 0 : index
    %2 = vector.load %arg3[%c0_3, %c0_4] : memref<80x1xf32, #tpu.memory_space<vmem>>, vector<80x1xf32>
    %c0_5 = arith.constant 0 : index
    %c0_6 = arith.constant 0 : index
    %3 = vector.load %arg0[%c0_5, %c0_6] : memref<80x12xf32, #tpu.memory_space<vmem>>, vector<80x12xf32>
    %4 = arith.truncf %3 : vector<80x12xf32> to vector<80x12xbf16>
    %c0_7 = arith.constant 0 : index
    %c0_8 = arith.constant 0 : index
    %5 = vector.load %arg4[%c0_7, %c0_8] : memref<12x16xbf16, #tpu.memory_space<vmem>>, vector<12x16xbf16>
    %cst = arith.constant dense<0.000000e+00> : vector<80x16xf32>
    %6 = tpu.matmul %4, %5, %cst {dimension_numbers = #tpu.dot_dimension_numbers<[1], [0], [0], [1], [0, 0, 1, 1], [], []>} : vector<80x12xbf16>, vector<12x16xbf16>, vector<80x16xf32> -> vector<80x16xf32>
    %c0_9 = arith.constant 0 : index
    %c0_10 = arith.constant 0 : index
    %7 = vector.load %arg5[%c0_9, %c0_10] : memref<1x16xf32, #tpu.memory_space<vmem>>, vector<1x16xf32>
    %8 = vector.broadcast %7 : vector<1x16xf32> to vector<80x16xf32>
    %9 = arith.addf %6, %8 : vector<80x16xf32>
    %cst_11 = arith.constant 0.000000e+00 : f32
    %10 = vector.broadcast %cst_11 : f32 to vector<80x16xf32>
    %11 = arith.maximumf %9, %10 : vector<80x16xf32>
    %12 = vector.broadcast %0 : vector<80x1xf32> to vector<80x16xf32>
    %13 = arith.mulf %12, %11 : vector<80x16xf32>
    %14 = vector.broadcast %1 : vector<80x1xf32> to vector<80x16xf32>
    %15 = arith.mulf %14, %11 : vector<80x16xf32>
    %16 = vector.broadcast %2 : vector<80x1xf32> to vector<80x16xf32>
    %17 = arith.mulf %16, %11 : vector<80x16xf32>
    %18 = tpu.concatenate %13, %15, %17, %11 in 1 : vector<80x16xf32>, vector<80x16xf32>, vector<80x16xf32>, vector<80x16xf32> -> vector<80x64xf32>
    %19 = arith.truncf %18 : vector<80x64xf32> to vector<80x64xbf16>
    %c0_12 = arith.constant 0 : index
    %c0_13 = arith.constant 0 : index
    %20 = vector.load %arg6[%c0_12, %c0_13] : memref<64x16xbf16, #tpu.memory_space<vmem>>, vector<64x16xbf16>
    %cst_14 = arith.constant dense<0.000000e+00> : vector<80x16xf32>
    %21 = tpu.matmul %19, %20, %cst_14 {dimension_numbers = #tpu.dot_dimension_numbers<[1], [0], [0], [1], [0, 0, 1, 1], [], []>} : vector<80x64xbf16>, vector<64x16xbf16>, vector<80x16xf32> -> vector<80x16xf32>
    %c0_15 = arith.constant 0 : index
    %c0_16 = arith.constant 0 : index
    %22 = vector.load %arg7[%c0_15, %c0_16] : memref<1x16xf32, #tpu.memory_space<vmem>>, vector<1x16xf32>
    %23 = vector.broadcast %22 : vector<1x16xf32> to vector<80x16xf32>
    %24 = arith.addf %21, %23 : vector<80x16xf32>
    %cst_17 = arith.constant 0.000000e+00 : f32
    %25 = vector.broadcast %cst_17 : f32 to vector<80x16xf32>
    %26 = arith.maximumf %24, %25 : vector<80x16xf32>
    %c0_18 = arith.constant 0 : index
    %c0_19 = arith.constant 0 : index
    %27 = vector.load %arg8[%c0_18, %c0_19] : memref<128x3xf32, #tpu.memory_space<vmem>>, vector<128x3xf32>
    %28 = arith.truncf %27 : vector<128x3xf32> to vector<128x3xbf16>
    %c0_20 = arith.constant 0 : index
    %c0_21 = arith.constant 0 : index
    %29 = vector.load %arg9[%c0_20, %c0_21] : memref<3x32xbf16, #tpu.memory_space<vmem>>, vector<3x32xbf16>
    %cst_22 = arith.constant dense<0.000000e+00> : vector<128x32xf32>
    %30 = tpu.matmul %28, %29, %cst_22 {dimension_numbers = #tpu.dot_dimension_numbers<[1], [0], [0], [1], [0, 0, 1, 1], [], []>} : vector<128x3xbf16>, vector<3x32xbf16>, vector<128x32xf32> -> vector<128x32xf32>
    %c0_23 = arith.constant 0 : index
    %c0_24 = arith.constant 0 : index
    %31 = vector.load %arg13[%c0_23, %c0_24] : memref<1x32xf32, #tpu.memory_space<vmem>>, vector<1x32xf32>
    %32 = vector.broadcast %31 : vector<1x32xf32> to vector<128x32xf32>
    %33 = arith.addf %30, %32 : vector<128x32xf32>
    %34 = arith.truncf %27 : vector<128x3xf32> to vector<128x3xbf16>
    %c0_25 = arith.constant 0 : index
    %c0_26 = arith.constant 0 : index
    %35 = vector.load %arg10[%c0_25, %c0_26] : memref<3x16xbf16, #tpu.memory_space<vmem>>, vector<3x16xbf16>
    %cst_27 = arith.constant dense<0.000000e+00> : vector<128x16xf32>
    %36 = tpu.matmul %34, %35, %cst_27 {dimension_numbers = #tpu.dot_dimension_numbers<[1], [0], [0], [1], [0, 0, 1, 1], [], []>} : vector<128x3xbf16>, vector<3x16xbf16>, vector<128x16xf32> -> vector<128x16xf32>
    %c0_28 = arith.constant 0 : index
    %c0_29 = arith.constant 0 : index
    %37 = vector.load %arg14[%c0_28, %c0_29] : memref<1x16xf32, #tpu.memory_space<vmem>>, vector<1x16xf32>
    %38 = vector.broadcast %37 : vector<1x16xf32> to vector<128x16xf32>
    %39 = arith.addf %36, %38 : vector<128x16xf32>
    %c0_30 = arith.constant 0 : index
    %c0_31 = arith.constant 0 : index
    %40 = vector.load %arg11[%c0_30, %c0_31] : memref<16x32xbf16, #tpu.memory_space<vmem>>, vector<16x32xbf16>
    %c0_32 = arith.constant 0 : index
    %c0_33 = arith.constant 0 : index
    %41 = vector.load %arg12[%c0_32, %c0_33] : memref<16x16xbf16, #tpu.memory_space<vmem>>, vector<16x16xbf16>
    %c0_34 = arith.constant 0 : index
    %c0_35 = arith.constant 0 : index
    %42 = vector.load %arg15[%c0_34, %c0_35] : memref<1x16xf32, #tpu.memory_space<vmem>>, vector<1x16xf32>
    %43 = vector.extract_strided_slice %33 {offsets = [0, 0], sizes = [16, 32], strides = [1, 1]} : vector<128x32xf32> to vector<16x32xf32>
    %44 = vector.extract_strided_slice %39 {offsets = [0, 0], sizes = [16, 16], strides = [1, 1]} : vector<128x16xf32> to vector<16x16xf32>
    %45 = arith.negf %43 : vector<16x32xf32>
    %46 = math.exp %45 : vector<16x32xf32>
    %cst_36 = arith.constant 1.000000e+00 : f32
    %47 = vector.broadcast %cst_36 : f32 to vector<16x32xf32>
    %48 = arith.addf %47, %46 : vector<16x32xf32>
    %49 = arith.divf %47, %48 : vector<16x32xf32>
    %50 = vector.extract_strided_slice %49 {offsets = [0, 0], sizes = [16, 16], strides = [1, 1]} : vector<16x32xf32> to vector<16x16xf32>
    %51 = vector.extract_strided_slice %49 {offsets = [0, 16], sizes = [16, 16], strides = [1, 1]} : vector<16x32xf32> to vector<16x16xf32>
    %52 = vector.broadcast %42 : vector<1x16xf32> to vector<16x16xf32>
    %53 = arith.mulf %50, %52 : vector<16x16xf32>
    %54 = arith.addf %44, %53 : vector<16x16xf32>
    %55 = math.tanh %54 : vector<16x16xf32>
    %cst_37 = arith.constant 1.000000e+00 : f32
    %56 = vector.broadcast %cst_37 : f32 to vector<16x16xf32>
    %57 = arith.subf %56, %51 : vector<16x16xf32>
    %58 = arith.mulf %57, %55 : vector<16x16xf32>
    %59 = vector.extract_strided_slice %33 {offsets = [16, 0], sizes = [16, 32], strides = [1, 1]} : vector<128x32xf32> to vector<16x32xf32>
    %60 = vector.extract_strided_slice %39 {offsets = [16, 0], sizes = [16, 16], strides = [1, 1]} : vector<128x16xf32> to vector<16x16xf32>
    %61 = arith.truncf %58 : vector<16x16xf32> to vector<16x16xbf16>
    %cst_38 = arith.constant dense<0.000000e+00> : vector<16x32xf32>
    %62 = tpu.matmul %61, %40, %cst_38 {dimension_numbers = #tpu.dot_dimension_numbers<[1], [0], [0], [1], [0, 0, 1, 1], [], []>} : vector<16x16xbf16>, vector<16x32xbf16>, vector<16x32xf32> -> vector<16x32xf32>
    %cst_39 = arith.constant dense<0.000000e+00> : vector<16x16xf32>
    %63 = tpu.matmul %61, %41, %cst_39 {dimension_numbers = #tpu.dot_dimension_numbers<[1], [0], [0], [1], [0, 0, 1, 1], [], []>} : vector<16x16xbf16>, vector<16x16xbf16>, vector<16x16xf32> -> vector<16x16xf32>
    %64 = vector.broadcast %42 : vector<1x16xf32> to vector<16x16xf32>
    %65 = arith.addf %63, %64 : vector<16x16xf32>
    %66 = arith.addf %59, %62 : vector<16x32xf32>
    %67 = arith.negf %66 : vector<16x32xf32>
    %68 = math.exp %67 : vector<16x32xf32>
    %cst_40 = arith.constant 1.000000e+00 : f32
    %69 = vector.broadcast %cst_40 : f32 to vector<16x32xf32>
    %70 = arith.addf %69, %68 : vector<16x32xf32>
    %71 = arith.divf %69, %70 : vector<16x32xf32>
    %72 = vector.extract_strided_slice %71 {offsets = [0, 0], sizes = [16, 16], strides = [1, 1]} : vector<16x32xf32> to vector<16x16xf32>
    %73 = vector.extract_strided_slice %71 {offsets = [0, 16], sizes = [16, 16], strides = [1, 1]} : vector<16x32xf32> to vector<16x16xf32>
    %74 = arith.mulf %72, %65 : vector<16x16xf32>
    %75 = arith.addf %60, %74 : vector<16x16xf32>
    %76 = math.tanh %75 : vector<16x16xf32>
    %cst_41 = arith.constant 1.000000e+00 : f32
    %77 = vector.broadcast %cst_41 : f32 to vector<16x16xf32>
    %78 = arith.subf %77, %73 : vector<16x16xf32>
    %79 = arith.mulf %78, %76 : vector<16x16xf32>
    %80 = arith.mulf %73, %58 : vector<16x16xf32>
    %81 = arith.addf %79, %80 : vector<16x16xf32>
    %82 = vector.extract_strided_slice %33 {offsets = [32, 0], sizes = [16, 32], strides = [1, 1]} : vector<128x32xf32> to vector<16x32xf32>
    %83 = vector.extract_strided_slice %39 {offsets = [32, 0], sizes = [16, 16], strides = [1, 1]} : vector<128x16xf32> to vector<16x16xf32>
    %84 = arith.truncf %81 : vector<16x16xf32> to vector<16x16xbf16>
    %cst_42 = arith.constant dense<0.000000e+00> : vector<16x32xf32>
    %85 = tpu.matmul %84, %40, %cst_42 {dimension_numbers = #tpu.dot_dimension_numbers<[1], [0], [0], [1], [0, 0, 1, 1], [], []>} : vector<16x16xbf16>, vector<16x32xbf16>, vector<16x32xf32> -> vector<16x32xf32>
    %cst_43 = arith.constant dense<0.000000e+00> : vector<16x16xf32>
    %86 = tpu.matmul %84, %41, %cst_43 {dimension_numbers = #tpu.dot_dimension_numbers<[1], [0], [0], [1], [0, 0, 1, 1], [], []>} : vector<16x16xbf16>, vector<16x16xbf16>, vector<16x16xf32> -> vector<16x16xf32>
    %87 = vector.broadcast %42 : vector<1x16xf32> to vector<16x16xf32>
    %88 = arith.addf %86, %87 : vector<16x16xf32>
    %89 = arith.addf %82, %85 : vector<16x32xf32>
    %90 = arith.negf %89 : vector<16x32xf32>
    %91 = math.exp %90 : vector<16x32xf32>
    %cst_44 = arith.constant 1.000000e+00 : f32
    %92 = vector.broadcast %cst_44 : f32 to vector<16x32xf32>
    %93 = arith.addf %92, %91 : vector<16x32xf32>
    %94 = arith.divf %92, %93 : vector<16x32xf32>
    %95 = vector.extract_strided_slice %94 {offsets = [0, 0], sizes = [16, 16], strides = [1, 1]} : vector<16x32xf32> to vector<16x16xf32>
    %96 = vector.extract_strided_slice %94 {offsets = [0, 16], sizes = [16, 16], strides = [1, 1]} : vector<16x32xf32> to vector<16x16xf32>
    %97 = arith.mulf %95, %88 : vector<16x16xf32>
    %98 = arith.addf %83, %97 : vector<16x16xf32>
    %99 = math.tanh %98 : vector<16x16xf32>
    %cst_45 = arith.constant 1.000000e+00 : f32
    %100 = vector.broadcast %cst_45 : f32 to vector<16x16xf32>
    %101 = arith.subf %100, %96 : vector<16x16xf32>
    %102 = arith.mulf %101, %99 : vector<16x16xf32>
    %103 = arith.mulf %96, %81 : vector<16x16xf32>
    %104 = arith.addf %102, %103 : vector<16x16xf32>
    %105 = vector.extract_strided_slice %33 {offsets = [48, 0], sizes = [16, 32], strides = [1, 1]} : vector<128x32xf32> to vector<16x32xf32>
    %106 = vector.extract_strided_slice %39 {offsets = [48, 0], sizes = [16, 16], strides = [1, 1]} : vector<128x16xf32> to vector<16x16xf32>
    %107 = arith.truncf %104 : vector<16x16xf32> to vector<16x16xbf16>
    %cst_46 = arith.constant dense<0.000000e+00> : vector<16x32xf32>
    %108 = tpu.matmul %107, %40, %cst_46 {dimension_numbers = #tpu.dot_dimension_numbers<[1], [0], [0], [1], [0, 0, 1, 1], [], []>} : vector<16x16xbf16>, vector<16x32xbf16>, vector<16x32xf32> -> vector<16x32xf32>
    %cst_47 = arith.constant dense<0.000000e+00> : vector<16x16xf32>
    %109 = tpu.matmul %107, %41, %cst_47 {dimension_numbers = #tpu.dot_dimension_numbers<[1], [0], [0], [1], [0, 0, 1, 1], [], []>} : vector<16x16xbf16>, vector<16x16xbf16>, vector<16x16xf32> -> vector<16x16xf32>
    %110 = vector.broadcast %42 : vector<1x16xf32> to vector<16x16xf32>
    %111 = arith.addf %109, %110 : vector<16x16xf32>
    %112 = arith.addf %105, %108 : vector<16x32xf32>
    %113 = arith.negf %112 : vector<16x32xf32>
    %114 = math.exp %113 : vector<16x32xf32>
    %cst_48 = arith.constant 1.000000e+00 : f32
    %115 = vector.broadcast %cst_48 : f32 to vector<16x32xf32>
    %116 = arith.addf %115, %114 : vector<16x32xf32>
    %117 = arith.divf %115, %116 : vector<16x32xf32>
    %118 = vector.extract_strided_slice %117 {offsets = [0, 0], sizes = [16, 16], strides = [1, 1]} : vector<16x32xf32> to vector<16x16xf32>
    %119 = vector.extract_strided_slice %117 {offsets = [0, 16], sizes = [16, 16], strides = [1, 1]} : vector<16x32xf32> to vector<16x16xf32>
    %120 = arith.mulf %118, %111 : vector<16x16xf32>
    %121 = arith.addf %106, %120 : vector<16x16xf32>
    %122 = math.tanh %121 : vector<16x16xf32>
    %cst_49 = arith.constant 1.000000e+00 : f32
    %123 = vector.broadcast %cst_49 : f32 to vector<16x16xf32>
    %124 = arith.subf %123, %119 : vector<16x16xf32>
    %125 = arith.mulf %124, %122 : vector<16x16xf32>
    %126 = arith.mulf %119, %104 : vector<16x16xf32>
    %127 = arith.addf %125, %126 : vector<16x16xf32>
    %128 = vector.extract_strided_slice %33 {offsets = [64, 0], sizes = [16, 32], strides = [1, 1]} : vector<128x32xf32> to vector<16x32xf32>
    %129 = vector.extract_strided_slice %39 {offsets = [64, 0], sizes = [16, 16], strides = [1, 1]} : vector<128x16xf32> to vector<16x16xf32>
    %130 = arith.truncf %127 : vector<16x16xf32> to vector<16x16xbf16>
    %cst_50 = arith.constant dense<0.000000e+00> : vector<16x32xf32>
    %131 = tpu.matmul %130, %40, %cst_50 {dimension_numbers = #tpu.dot_dimension_numbers<[1], [0], [0], [1], [0, 0, 1, 1], [], []>} : vector<16x16xbf16>, vector<16x32xbf16>, vector<16x32xf32> -> vector<16x32xf32>
    %cst_51 = arith.constant dense<0.000000e+00> : vector<16x16xf32>
    %132 = tpu.matmul %130, %41, %cst_51 {dimension_numbers = #tpu.dot_dimension_numbers<[1], [0], [0], [1], [0, 0, 1, 1], [], []>} : vector<16x16xbf16>, vector<16x16xbf16>, vector<16x16xf32> -> vector<16x16xf32>
    %133 = vector.broadcast %42 : vector<1x16xf32> to vector<16x16xf32>
    %134 = arith.addf %132, %133 : vector<16x16xf32>
    %135 = arith.addf %128, %131 : vector<16x32xf32>
    %136 = arith.negf %135 : vector<16x32xf32>
    %137 = math.exp %136 : vector<16x32xf32>
    %cst_52 = arith.constant 1.000000e+00 : f32
    %138 = vector.broadcast %cst_52 : f32 to vector<16x32xf32>
    %139 = arith.addf %138, %137 : vector<16x32xf32>
    %140 = arith.divf %138, %139 : vector<16x32xf32>
    %141 = vector.extract_strided_slice %140 {offsets = [0, 0], sizes = [16, 16], strides = [1, 1]} : vector<16x32xf32> to vector<16x16xf32>
    %142 = vector.extract_strided_slice %140 {offsets = [0, 16], sizes = [16, 16], strides = [1, 1]} : vector<16x32xf32> to vector<16x16xf32>
    %143 = arith.mulf %141, %134 : vector<16x16xf32>
    %144 = arith.addf %129, %143 : vector<16x16xf32>
    %145 = math.tanh %144 : vector<16x16xf32>
    %cst_53 = arith.constant 1.000000e+00 : f32
    %146 = vector.broadcast %cst_53 : f32 to vector<16x16xf32>
    %147 = arith.subf %146, %142 : vector<16x16xf32>
    %148 = arith.mulf %147, %145 : vector<16x16xf32>
    %149 = arith.mulf %142, %127 : vector<16x16xf32>
    %150 = arith.addf %148, %149 : vector<16x16xf32>
    %151 = vector.extract_strided_slice %33 {offsets = [80, 0], sizes = [16, 32], strides = [1, 1]} : vector<128x32xf32> to vector<16x32xf32>
    %152 = vector.extract_strided_slice %39 {offsets = [80, 0], sizes = [16, 16], strides = [1, 1]} : vector<128x16xf32> to vector<16x16xf32>
    %153 = arith.truncf %150 : vector<16x16xf32> to vector<16x16xbf16>
    %cst_54 = arith.constant dense<0.000000e+00> : vector<16x32xf32>
    %154 = tpu.matmul %153, %40, %cst_54 {dimension_numbers = #tpu.dot_dimension_numbers<[1], [0], [0], [1], [0, 0, 1, 1], [], []>} : vector<16x16xbf16>, vector<16x32xbf16>, vector<16x32xf32> -> vector<16x32xf32>
    %cst_55 = arith.constant dense<0.000000e+00> : vector<16x16xf32>
    %155 = tpu.matmul %153, %41, %cst_55 {dimension_numbers = #tpu.dot_dimension_numbers<[1], [0], [0], [1], [0, 0, 1, 1], [], []>} : vector<16x16xbf16>, vector<16x16xbf16>, vector<16x16xf32> -> vector<16x16xf32>
    %156 = vector.broadcast %42 : vector<1x16xf32> to vector<16x16xf32>
    %157 = arith.addf %155, %156 : vector<16x16xf32>
    %158 = arith.addf %151, %154 : vector<16x32xf32>
    %159 = arith.negf %158 : vector<16x32xf32>
    %160 = math.exp %159 : vector<16x32xf32>
    %cst_56 = arith.constant 1.000000e+00 : f32
    %161 = vector.broadcast %cst_56 : f32 to vector<16x32xf32>
    %162 = arith.addf %161, %160 : vector<16x32xf32>
    %163 = arith.divf %161, %162 : vector<16x32xf32>
    %164 = vector.extract_strided_slice %163 {offsets = [0, 0], sizes = [16, 16], strides = [1, 1]} : vector<16x32xf32> to vector<16x16xf32>
    %165 = vector.extract_strided_slice %163 {offsets = [0, 16], sizes = [16, 16], strides = [1, 1]} : vector<16x32xf32> to vector<16x16xf32>
    %166 = arith.mulf %164, %157 : vector<16x16xf32>
    %167 = arith.addf %152, %166 : vector<16x16xf32>
    %168 = math.tanh %167 : vector<16x16xf32>
    %cst_57 = arith.constant 1.000000e+00 : f32
    %169 = vector.broadcast %cst_57 : f32 to vector<16x16xf32>
    %170 = arith.subf %169, %165 : vector<16x16xf32>
    %171 = arith.mulf %170, %168 : vector<16x16xf32>
    %172 = arith.mulf %165, %150 : vector<16x16xf32>
    %173 = arith.addf %171, %172 : vector<16x16xf32>
    %174 = vector.extract_strided_slice %33 {offsets = [96, 0], sizes = [16, 32], strides = [1, 1]} : vector<128x32xf32> to vector<16x32xf32>
    %175 = vector.extract_strided_slice %39 {offsets = [96, 0], sizes = [16, 16], strides = [1, 1]} : vector<128x16xf32> to vector<16x16xf32>
    %176 = arith.truncf %173 : vector<16x16xf32> to vector<16x16xbf16>
    %cst_58 = arith.constant dense<0.000000e+00> : vector<16x32xf32>
    %177 = tpu.matmul %176, %40, %cst_58 {dimension_numbers = #tpu.dot_dimension_numbers<[1], [0], [0], [1], [0, 0, 1, 1], [], []>} : vector<16x16xbf16>, vector<16x32xbf16>, vector<16x32xf32> -> vector<16x32xf32>
    %cst_59 = arith.constant dense<0.000000e+00> : vector<16x16xf32>
    %178 = tpu.matmul %176, %41, %cst_59 {dimension_numbers = #tpu.dot_dimension_numbers<[1], [0], [0], [1], [0, 0, 1, 1], [], []>} : vector<16x16xbf16>, vector<16x16xbf16>, vector<16x16xf32> -> vector<16x16xf32>
    %179 = vector.broadcast %42 : vector<1x16xf32> to vector<16x16xf32>
    %180 = arith.addf %178, %179 : vector<16x16xf32>
    %181 = arith.addf %174, %177 : vector<16x32xf32>
    %182 = arith.negf %181 : vector<16x32xf32>
    %183 = math.exp %182 : vector<16x32xf32>
    %cst_60 = arith.constant 1.000000e+00 : f32
    %184 = vector.broadcast %cst_60 : f32 to vector<16x32xf32>
    %185 = arith.addf %184, %183 : vector<16x32xf32>
    %186 = arith.divf %184, %185 : vector<16x32xf32>
    %187 = vector.extract_strided_slice %186 {offsets = [0, 0], sizes = [16, 16], strides = [1, 1]} : vector<16x32xf32> to vector<16x16xf32>
    %188 = vector.extract_strided_slice %186 {offsets = [0, 16], sizes = [16, 16], strides = [1, 1]} : vector<16x32xf32> to vector<16x16xf32>
    %189 = arith.mulf %187, %180 : vector<16x16xf32>
    %190 = arith.addf %175, %189 : vector<16x16xf32>
    %191 = math.tanh %190 : vector<16x16xf32>
    %cst_61 = arith.constant 1.000000e+00 : f32
    %192 = vector.broadcast %cst_61 : f32 to vector<16x16xf32>
    %193 = arith.subf %192, %188 : vector<16x16xf32>
    %194 = arith.mulf %193, %191 : vector<16x16xf32>
    %195 = arith.mulf %188, %173 : vector<16x16xf32>
    %196 = arith.addf %194, %195 : vector<16x16xf32>
    %197 = vector.extract_strided_slice %33 {offsets = [112, 0], sizes = [16, 32], strides = [1, 1]} : vector<128x32xf32> to vector<16x32xf32>
    %198 = vector.extract_strided_slice %39 {offsets = [112, 0], sizes = [16, 16], strides = [1, 1]} : vector<128x16xf32> to vector<16x16xf32>
    %199 = arith.truncf %196 : vector<16x16xf32> to vector<16x16xbf16>
    %cst_62 = arith.constant dense<0.000000e+00> : vector<16x32xf32>
    %200 = tpu.matmul %199, %40, %cst_62 {dimension_numbers = #tpu.dot_dimension_numbers<[1], [0], [0], [1], [0, 0, 1, 1], [], []>} : vector<16x16xbf16>, vector<16x32xbf16>, vector<16x32xf32> -> vector<16x32xf32>
    %cst_63 = arith.constant dense<0.000000e+00> : vector<16x16xf32>
    %201 = tpu.matmul %199, %41, %cst_63 {dimension_numbers = #tpu.dot_dimension_numbers<[1], [0], [0], [1], [0, 0, 1, 1], [], []>} : vector<16x16xbf16>, vector<16x16xbf16>, vector<16x16xf32> -> vector<16x16xf32>
    %202 = vector.broadcast %42 : vector<1x16xf32> to vector<16x16xf32>
    %203 = arith.addf %201, %202 : vector<16x16xf32>
    %204 = arith.addf %197, %200 : vector<16x32xf32>
    %205 = arith.negf %204 : vector<16x32xf32>
    %206 = math.exp %205 : vector<16x32xf32>
    %cst_64 = arith.constant 1.000000e+00 : f32
    %207 = vector.broadcast %cst_64 : f32 to vector<16x32xf32>
    %208 = arith.addf %207, %206 : vector<16x32xf32>
    %209 = arith.divf %207, %208 : vector<16x32xf32>
    %210 = vector.extract_strided_slice %209 {offsets = [0, 0], sizes = [16, 16], strides = [1, 1]} : vector<16x32xf32> to vector<16x16xf32>
    %211 = vector.extract_strided_slice %209 {offsets = [0, 16], sizes = [16, 16], strides = [1, 1]} : vector<16x32xf32> to vector<16x16xf32>
    %212 = arith.mulf %210, %203 : vector<16x16xf32>
    %213 = arith.addf %198, %212 : vector<16x16xf32>
    %214 = math.tanh %213 : vector<16x16xf32>
    %cst_65 = arith.constant 1.000000e+00 : f32
    %215 = vector.broadcast %cst_65 : f32 to vector<16x16xf32>
    %216 = arith.subf %215, %211 : vector<16x16xf32>
    %217 = arith.mulf %216, %214 : vector<16x16xf32>
    %218 = arith.mulf %211, %196 : vector<16x16xf32>
    %219 = arith.addf %217, %218 : vector<16x16xf32>
    %220 = tpu.concatenate %58, %81, %104, %127, %150, %173, %196, %219 in 0 : vector<16x16xf32>, vector<16x16xf32>, vector<16x16xf32>, vector<16x16xf32>, vector<16x16xf32>, vector<16x16xf32>, vector<16x16xf32>, vector<16x16xf32> -> vector<128x16xf32>
    %221 = arith.truncf %220 : vector<128x16xf32> to vector<128x16xbf16>
    %c0_66 = arith.constant 0 : index
    %c0_67 = arith.constant 0 : index
    %222 = vector.load %arg16[%c0_66, %c0_67] : memref<16x32xbf16, #tpu.memory_space<vmem>>, vector<16x32xbf16>
    %cst_68 = arith.constant dense<0.000000e+00> : vector<128x32xf32>
    %223 = tpu.matmul %221, %222, %cst_68 {dimension_numbers = #tpu.dot_dimension_numbers<[1], [0], [0], [1], [0, 0, 1, 1], [], []>} : vector<128x16xbf16>, vector<16x32xbf16>, vector<128x32xf32> -> vector<128x32xf32>
    %c0_69 = arith.constant 0 : index
    %c0_70 = arith.constant 0 : index
    %224 = vector.load %arg20[%c0_69, %c0_70] : memref<1x32xf32, #tpu.memory_space<vmem>>, vector<1x32xf32>
    %225 = vector.broadcast %224 : vector<1x32xf32> to vector<128x32xf32>
    %226 = arith.addf %223, %225 : vector<128x32xf32>
    %227 = arith.truncf %220 : vector<128x16xf32> to vector<128x16xbf16>
    %c0_71 = arith.constant 0 : index
    %c0_72 = arith.constant 0 : index
    %228 = vector.load %arg17[%c0_71, %c0_72] : memref<16x16xbf16, #tpu.memory_space<vmem>>, vector<16x16xbf16>
    %cst_73 = arith.constant dense<0.000000e+00> : vector<128x16xf32>
    %229 = tpu.matmul %227, %228, %cst_73 {dimension_numbers = #tpu.dot_dimension_numbers<[1], [0], [0], [1], [0, 0, 1, 1], [], []>} : vector<128x16xbf16>, vector<16x16xbf16>, vector<128x16xf32> -> vector<128x16xf32>
    %c0_74 = arith.constant 0 : index
    %c0_75 = arith.constant 0 : index
    %230 = vector.load %arg21[%c0_74, %c0_75] : memref<1x16xf32, #tpu.memory_space<vmem>>, vector<1x16xf32>
    %231 = vector.broadcast %230 : vector<1x16xf32> to vector<128x16xf32>
    %232 = arith.addf %229, %231 : vector<128x16xf32>
    %c0_76 = arith.constant 0 : index
    %c0_77 = arith.constant 0 : index
    %233 = vector.load %arg18[%c0_76, %c0_77] : memref<16x32xbf16, #tpu.memory_space<vmem>>, vector<16x32xbf16>
    %c0_78 = arith.constant 0 : index
    %c0_79 = arith.constant 0 : index
    %234 = vector.load %arg19[%c0_78, %c0_79] : memref<16x16xbf16, #tpu.memory_space<vmem>>, vector<16x16xbf16>
    %c0_80 = arith.constant 0 : index
    %c0_81 = arith.constant 0 : index
    %235 = vector.load %arg22[%c0_80, %c0_81] : memref<1x16xf32, #tpu.memory_space<vmem>>, vector<1x16xf32>
    %236 = vector.extract_strided_slice %226 {offsets = [0, 0], sizes = [16, 32], strides = [1, 1]} : vector<128x32xf32> to vector<16x32xf32>
    %237 = vector.extract_strided_slice %232 {offsets = [0, 0], sizes = [16, 16], strides = [1, 1]} : vector<128x16xf32> to vector<16x16xf32>
    %238 = arith.negf %236 : vector<16x32xf32>
    %239 = math.exp %238 : vector<16x32xf32>
    %cst_82 = arith.constant 1.000000e+00 : f32
    %240 = vector.broadcast %cst_82 : f32 to vector<16x32xf32>
    %241 = arith.addf %240, %239 : vector<16x32xf32>
    %242 = arith.divf %240, %241 : vector<16x32xf32>
    %243 = vector.extract_strided_slice %242 {offsets = [0, 0], sizes = [16, 16], strides = [1, 1]} : vector<16x32xf32> to vector<16x16xf32>
    %244 = vector.extract_strided_slice %242 {offsets = [0, 16], sizes = [16, 16], strides = [1, 1]} : vector<16x32xf32> to vector<16x16xf32>
    %245 = vector.broadcast %235 : vector<1x16xf32> to vector<16x16xf32>
    %246 = arith.mulf %243, %245 : vector<16x16xf32>
    %247 = arith.addf %237, %246 : vector<16x16xf32>
    %248 = math.tanh %247 : vector<16x16xf32>
    %cst_83 = arith.constant 1.000000e+00 : f32
    %249 = vector.broadcast %cst_83 : f32 to vector<16x16xf32>
    %250 = arith.subf %249, %244 : vector<16x16xf32>
    %251 = arith.mulf %250, %248 : vector<16x16xf32>
    %252 = vector.extract_strided_slice %226 {offsets = [16, 0], sizes = [16, 32], strides = [1, 1]} : vector<128x32xf32> to vector<16x32xf32>
    %253 = vector.extract_strided_slice %232 {offsets = [16, 0], sizes = [16, 16], strides = [1, 1]} : vector<128x16xf32> to vector<16x16xf32>
    %254 = arith.truncf %251 : vector<16x16xf32> to vector<16x16xbf16>
    %cst_84 = arith.constant dense<0.000000e+00> : vector<16x32xf32>
    %255 = tpu.matmul %254, %233, %cst_84 {dimension_numbers = #tpu.dot_dimension_numbers<[1], [0], [0], [1], [0, 0, 1, 1], [], []>} : vector<16x16xbf16>, vector<16x32xbf16>, vector<16x32xf32> -> vector<16x32xf32>
    %cst_85 = arith.constant dense<0.000000e+00> : vector<16x16xf32>
    %256 = tpu.matmul %254, %234, %cst_85 {dimension_numbers = #tpu.dot_dimension_numbers<[1], [0], [0], [1], [0, 0, 1, 1], [], []>} : vector<16x16xbf16>, vector<16x16xbf16>, vector<16x16xf32> -> vector<16x16xf32>
    %257 = vector.broadcast %235 : vector<1x16xf32> to vector<16x16xf32>
    %258 = arith.addf %256, %257 : vector<16x16xf32>
    %259 = arith.addf %252, %255 : vector<16x32xf32>
    %260 = arith.negf %259 : vector<16x32xf32>
    %261 = math.exp %260 : vector<16x32xf32>
    %cst_86 = arith.constant 1.000000e+00 : f32
    %262 = vector.broadcast %cst_86 : f32 to vector<16x32xf32>
    %263 = arith.addf %262, %261 : vector<16x32xf32>
    %264 = arith.divf %262, %263 : vector<16x32xf32>
    %265 = vector.extract_strided_slice %264 {offsets = [0, 0], sizes = [16, 16], strides = [1, 1]} : vector<16x32xf32> to vector<16x16xf32>
    %266 = vector.extract_strided_slice %264 {offsets = [0, 16], sizes = [16, 16], strides = [1, 1]} : vector<16x32xf32> to vector<16x16xf32>
    %267 = arith.mulf %265, %258 : vector<16x16xf32>
    %268 = arith.addf %253, %267 : vector<16x16xf32>
    %269 = math.tanh %268 : vector<16x16xf32>
    %cst_87 = arith.constant 1.000000e+00 : f32
    %270 = vector.broadcast %cst_87 : f32 to vector<16x16xf32>
    %271 = arith.subf %270, %266 : vector<16x16xf32>
    %272 = arith.mulf %271, %269 : vector<16x16xf32>
    %273 = arith.mulf %266, %251 : vector<16x16xf32>
    %274 = arith.addf %272, %273 : vector<16x16xf32>
    %275 = vector.extract_strided_slice %226 {offsets = [32, 0], sizes = [16, 32], strides = [1, 1]} : vector<128x32xf32> to vector<16x32xf32>
    %276 = vector.extract_strided_slice %232 {offsets = [32, 0], sizes = [16, 16], strides = [1, 1]} : vector<128x16xf32> to vector<16x16xf32>
    %277 = arith.truncf %274 : vector<16x16xf32> to vector<16x16xbf16>
    %cst_88 = arith.constant dense<0.000000e+00> : vector<16x32xf32>
    %278 = tpu.matmul %277, %233, %cst_88 {dimension_numbers = #tpu.dot_dimension_numbers<[1], [0], [0], [1], [0, 0, 1, 1], [], []>} : vector<16x16xbf16>, vector<16x32xbf16>, vector<16x32xf32> -> vector<16x32xf32>
    %cst_89 = arith.constant dense<0.000000e+00> : vector<16x16xf32>
    %279 = tpu.matmul %277, %234, %cst_89 {dimension_numbers = #tpu.dot_dimension_numbers<[1], [0], [0], [1], [0, 0, 1, 1], [], []>} : vector<16x16xbf16>, vector<16x16xbf16>, vector<16x16xf32> -> vector<16x16xf32>
    %280 = vector.broadcast %235 : vector<1x16xf32> to vector<16x16xf32>
    %281 = arith.addf %279, %280 : vector<16x16xf32>
    %282 = arith.addf %275, %278 : vector<16x32xf32>
    %283 = arith.negf %282 : vector<16x32xf32>
    %284 = math.exp %283 : vector<16x32xf32>
    %cst_90 = arith.constant 1.000000e+00 : f32
    %285 = vector.broadcast %cst_90 : f32 to vector<16x32xf32>
    %286 = arith.addf %285, %284 : vector<16x32xf32>
    %287 = arith.divf %285, %286 : vector<16x32xf32>
    %288 = vector.extract_strided_slice %287 {offsets = [0, 0], sizes = [16, 16], strides = [1, 1]} : vector<16x32xf32> to vector<16x16xf32>
    %289 = vector.extract_strided_slice %287 {offsets = [0, 16], sizes = [16, 16], strides = [1, 1]} : vector<16x32xf32> to vector<16x16xf32>
    %290 = arith.mulf %288, %281 : vector<16x16xf32>
    %291 = arith.addf %276, %290 : vector<16x16xf32>
    %292 = math.tanh %291 : vector<16x16xf32>
    %cst_91 = arith.constant 1.000000e+00 : f32
    %293 = vector.broadcast %cst_91 : f32 to vector<16x16xf32>
    %294 = arith.subf %293, %289 : vector<16x16xf32>
    %295 = arith.mulf %294, %292 : vector<16x16xf32>
    %296 = arith.mulf %289, %274 : vector<16x16xf32>
    %297 = arith.addf %295, %296 : vector<16x16xf32>
    %298 = vector.extract_strided_slice %226 {offsets = [48, 0], sizes = [16, 32], strides = [1, 1]} : vector<128x32xf32> to vector<16x32xf32>
    %299 = vector.extract_strided_slice %232 {offsets = [48, 0], sizes = [16, 16], strides = [1, 1]} : vector<128x16xf32> to vector<16x16xf32>
    %300 = arith.truncf %297 : vector<16x16xf32> to vector<16x16xbf16>
    %cst_92 = arith.constant dense<0.000000e+00> : vector<16x32xf32>
    %301 = tpu.matmul %300, %233, %cst_92 {dimension_numbers = #tpu.dot_dimension_numbers<[1], [0], [0], [1], [0, 0, 1, 1], [], []>} : vector<16x16xbf16>, vector<16x32xbf16>, vector<16x32xf32> -> vector<16x32xf32>
    %cst_93 = arith.constant dense<0.000000e+00> : vector<16x16xf32>
    %302 = tpu.matmul %300, %234, %cst_93 {dimension_numbers = #tpu.dot_dimension_numbers<[1], [0], [0], [1], [0, 0, 1, 1], [], []>} : vector<16x16xbf16>, vector<16x16xbf16>, vector<16x16xf32> -> vector<16x16xf32>
    %303 = vector.broadcast %235 : vector<1x16xf32> to vector<16x16xf32>
    %304 = arith.addf %302, %303 : vector<16x16xf32>
    %305 = arith.addf %298, %301 : vector<16x32xf32>
    %306 = arith.negf %305 : vector<16x32xf32>
    %307 = math.exp %306 : vector<16x32xf32>
    %cst_94 = arith.constant 1.000000e+00 : f32
    %308 = vector.broadcast %cst_94 : f32 to vector<16x32xf32>
    %309 = arith.addf %308, %307 : vector<16x32xf32>
    %310 = arith.divf %308, %309 : vector<16x32xf32>
    %311 = vector.extract_strided_slice %310 {offsets = [0, 0], sizes = [16, 16], strides = [1, 1]} : vector<16x32xf32> to vector<16x16xf32>
    %312 = vector.extract_strided_slice %310 {offsets = [0, 16], sizes = [16, 16], strides = [1, 1]} : vector<16x32xf32> to vector<16x16xf32>
    %313 = arith.mulf %311, %304 : vector<16x16xf32>
    %314 = arith.addf %299, %313 : vector<16x16xf32>
    %315 = math.tanh %314 : vector<16x16xf32>
    %cst_95 = arith.constant 1.000000e+00 : f32
    %316 = vector.broadcast %cst_95 : f32 to vector<16x16xf32>
    %317 = arith.subf %316, %312 : vector<16x16xf32>
    %318 = arith.mulf %317, %315 : vector<16x16xf32>
    %319 = arith.mulf %312, %297 : vector<16x16xf32>
    %320 = arith.addf %318, %319 : vector<16x16xf32>
    %321 = vector.extract_strided_slice %226 {offsets = [64, 0], sizes = [16, 32], strides = [1, 1]} : vector<128x32xf32> to vector<16x32xf32>
    %322 = vector.extract_strided_slice %232 {offsets = [64, 0], sizes = [16, 16], strides = [1, 1]} : vector<128x16xf32> to vector<16x16xf32>
    %323 = arith.truncf %320 : vector<16x16xf32> to vector<16x16xbf16>
    %cst_96 = arith.constant dense<0.000000e+00> : vector<16x32xf32>
    %324 = tpu.matmul %323, %233, %cst_96 {dimension_numbers = #tpu.dot_dimension_numbers<[1], [0], [0], [1], [0, 0, 1, 1], [], []>} : vector<16x16xbf16>, vector<16x32xbf16>, vector<16x32xf32> -> vector<16x32xf32>
    %cst_97 = arith.constant dense<0.000000e+00> : vector<16x16xf32>
    %325 = tpu.matmul %323, %234, %cst_97 {dimension_numbers = #tpu.dot_dimension_numbers<[1], [0], [0], [1], [0, 0, 1, 1], [], []>} : vector<16x16xbf16>, vector<16x16xbf16>, vector<16x16xf32> -> vector<16x16xf32>
    %326 = vector.broadcast %235 : vector<1x16xf32> to vector<16x16xf32>
    %327 = arith.addf %325, %326 : vector<16x16xf32>
    %328 = arith.addf %321, %324 : vector<16x32xf32>
    %329 = arith.negf %328 : vector<16x32xf32>
    %330 = math.exp %329 : vector<16x32xf32>
    %cst_98 = arith.constant 1.000000e+00 : f32
    %331 = vector.broadcast %cst_98 : f32 to vector<16x32xf32>
    %332 = arith.addf %331, %330 : vector<16x32xf32>
    %333 = arith.divf %331, %332 : vector<16x32xf32>
    %334 = vector.extract_strided_slice %333 {offsets = [0, 0], sizes = [16, 16], strides = [1, 1]} : vector<16x32xf32> to vector<16x16xf32>
    %335 = vector.extract_strided_slice %333 {offsets = [0, 16], sizes = [16, 16], strides = [1, 1]} : vector<16x32xf32> to vector<16x16xf32>
    %336 = arith.mulf %334, %327 : vector<16x16xf32>
    %337 = arith.addf %322, %336 : vector<16x16xf32>
    %338 = math.tanh %337 : vector<16x16xf32>
    %cst_99 = arith.constant 1.000000e+00 : f32
    %339 = vector.broadcast %cst_99 : f32 to vector<16x16xf32>
    %340 = arith.subf %339, %335 : vector<16x16xf32>
    %341 = arith.mulf %340, %338 : vector<16x16xf32>
    %342 = arith.mulf %335, %320 : vector<16x16xf32>
    %343 = arith.addf %341, %342 : vector<16x16xf32>
    %344 = vector.extract_strided_slice %226 {offsets = [80, 0], sizes = [16, 32], strides = [1, 1]} : vector<128x32xf32> to vector<16x32xf32>
    %345 = vector.extract_strided_slice %232 {offsets = [80, 0], sizes = [16, 16], strides = [1, 1]} : vector<128x16xf32> to vector<16x16xf32>
    %346 = arith.truncf %343 : vector<16x16xf32> to vector<16x16xbf16>
    %cst_100 = arith.constant dense<0.000000e+00> : vector<16x32xf32>
    %347 = tpu.matmul %346, %233, %cst_100 {dimension_numbers = #tpu.dot_dimension_numbers<[1], [0], [0], [1], [0, 0, 1, 1], [], []>} : vector<16x16xbf16>, vector<16x32xbf16>, vector<16x32xf32> -> vector<16x32xf32>
    %cst_101 = arith.constant dense<0.000000e+00> : vector<16x16xf32>
    %348 = tpu.matmul %346, %234, %cst_101 {dimension_numbers = #tpu.dot_dimension_numbers<[1], [0], [0], [1], [0, 0, 1, 1], [], []>} : vector<16x16xbf16>, vector<16x16xbf16>, vector<16x16xf32> -> vector<16x16xf32>
    %349 = vector.broadcast %235 : vector<1x16xf32> to vector<16x16xf32>
    %350 = arith.addf %348, %349 : vector<16x16xf32>
    %351 = arith.addf %344, %347 : vector<16x32xf32>
    %352 = arith.negf %351 : vector<16x32xf32>
    %353 = math.exp %352 : vector<16x32xf32>
    %cst_102 = arith.constant 1.000000e+00 : f32
    %354 = vector.broadcast %cst_102 : f32 to vector<16x32xf32>
    %355 = arith.addf %354, %353 : vector<16x32xf32>
    %356 = arith.divf %354, %355 : vector<16x32xf32>
    %357 = vector.extract_strided_slice %356 {offsets = [0, 0], sizes = [16, 16], strides = [1, 1]} : vector<16x32xf32> to vector<16x16xf32>
    %358 = vector.extract_strided_slice %356 {offsets = [0, 16], sizes = [16, 16], strides = [1, 1]} : vector<16x32xf32> to vector<16x16xf32>
    %359 = arith.mulf %357, %350 : vector<16x16xf32>
    %360 = arith.addf %345, %359 : vector<16x16xf32>
    %361 = math.tanh %360 : vector<16x16xf32>
    %cst_103 = arith.constant 1.000000e+00 : f32
    %362 = vector.broadcast %cst_103 : f32 to vector<16x16xf32>
    %363 = arith.subf %362, %358 : vector<16x16xf32>
    %364 = arith.mulf %363, %361 : vector<16x16xf32>
    %365 = arith.mulf %358, %343 : vector<16x16xf32>
    %366 = arith.addf %364, %365 : vector<16x16xf32>
    %367 = vector.extract_strided_slice %226 {offsets = [96, 0], sizes = [16, 32], strides = [1, 1]} : vector<128x32xf32> to vector<16x32xf32>
    %368 = vector.extract_strided_slice %232 {offsets = [96, 0], sizes = [16, 16], strides = [1, 1]} : vector<128x16xf32> to vector<16x16xf32>
    %369 = arith.truncf %366 : vector<16x16xf32> to vector<16x16xbf16>
    %cst_104 = arith.constant dense<0.000000e+00> : vector<16x32xf32>
    %370 = tpu.matmul %369, %233, %cst_104 {dimension_numbers = #tpu.dot_dimension_numbers<[1], [0], [0], [1], [0, 0, 1, 1], [], []>} : vector<16x16xbf16>, vector<16x32xbf16>, vector<16x32xf32> -> vector<16x32xf32>
    %cst_105 = arith.constant dense<0.000000e+00> : vector<16x16xf32>
    %371 = tpu.matmul %369, %234, %cst_105 {dimension_numbers = #tpu.dot_dimension_numbers<[1], [0], [0], [1], [0, 0, 1, 1], [], []>} : vector<16x16xbf16>, vector<16x16xbf16>, vector<16x16xf32> -> vector<16x16xf32>
    %372 = vector.broadcast %235 : vector<1x16xf32> to vector<16x16xf32>
    %373 = arith.addf %371, %372 : vector<16x16xf32>
    %374 = arith.addf %367, %370 : vector<16x32xf32>
    %375 = arith.negf %374 : vector<16x32xf32>
    %376 = math.exp %375 : vector<16x32xf32>
    %cst_106 = arith.constant 1.000000e+00 : f32
    %377 = vector.broadcast %cst_106 : f32 to vector<16x32xf32>
    %378 = arith.addf %377, %376 : vector<16x32xf32>
    %379 = arith.divf %377, %378 : vector<16x32xf32>
    %380 = vector.extract_strided_slice %379 {offsets = [0, 0], sizes = [16, 16], strides = [1, 1]} : vector<16x32xf32> to vector<16x16xf32>
    %381 = vector.extract_strided_slice %379 {offsets = [0, 16], sizes = [16, 16], strides = [1, 1]} : vector<16x32xf32> to vector<16x16xf32>
    %382 = arith.mulf %380, %373 : vector<16x16xf32>
    %383 = arith.addf %368, %382 : vector<16x16xf32>
    %384 = math.tanh %383 : vector<16x16xf32>
    %cst_107 = arith.constant 1.000000e+00 : f32
    %385 = vector.broadcast %cst_107 : f32 to vector<16x16xf32>
    %386 = arith.subf %385, %381 : vector<16x16xf32>
    %387 = arith.mulf %386, %384 : vector<16x16xf32>
    %388 = arith.mulf %381, %366 : vector<16x16xf32>
    %389 = arith.addf %387, %388 : vector<16x16xf32>
    %390 = vector.extract_strided_slice %226 {offsets = [112, 0], sizes = [16, 32], strides = [1, 1]} : vector<128x32xf32> to vector<16x32xf32>
    %391 = vector.extract_strided_slice %232 {offsets = [112, 0], sizes = [16, 16], strides = [1, 1]} : vector<128x16xf32> to vector<16x16xf32>
    %392 = arith.truncf %389 : vector<16x16xf32> to vector<16x16xbf16>
    %cst_108 = arith.constant dense<0.000000e+00> : vector<16x32xf32>
    %393 = tpu.matmul %392, %233, %cst_108 {dimension_numbers = #tpu.dot_dimension_numbers<[1], [0], [0], [1], [0, 0, 1, 1], [], []>} : vector<16x16xbf16>, vector<16x32xbf16>, vector<16x32xf32> -> vector<16x32xf32>
    %cst_109 = arith.constant dense<0.000000e+00> : vector<16x16xf32>
    %394 = tpu.matmul %392, %234, %cst_109 {dimension_numbers = #tpu.dot_dimension_numbers<[1], [0], [0], [1], [0, 0, 1, 1], [], []>} : vector<16x16xbf16>, vector<16x16xbf16>, vector<16x16xf32> -> vector<16x16xf32>
    %395 = vector.broadcast %235 : vector<1x16xf32> to vector<16x16xf32>
    %396 = arith.addf %394, %395 : vector<16x16xf32>
    %397 = arith.addf %390, %393 : vector<16x32xf32>
    %398 = arith.negf %397 : vector<16x32xf32>
    %399 = math.exp %398 : vector<16x32xf32>
    %cst_110 = arith.constant 1.000000e+00 : f32
    %400 = vector.broadcast %cst_110 : f32 to vector<16x32xf32>
    %401 = arith.addf %400, %399 : vector<16x32xf32>
    %402 = arith.divf %400, %401 : vector<16x32xf32>
    %403 = vector.extract_strided_slice %402 {offsets = [0, 0], sizes = [16, 16], strides = [1, 1]} : vector<16x32xf32> to vector<16x16xf32>
    %404 = vector.extract_strided_slice %402 {offsets = [0, 16], sizes = [16, 16], strides = [1, 1]} : vector<16x32xf32> to vector<16x16xf32>
    %405 = arith.mulf %403, %396 : vector<16x16xf32>
    %406 = arith.addf %391, %405 : vector<16x16xf32>
    %407 = math.tanh %406 : vector<16x16xf32>
    %cst_111 = arith.constant 1.000000e+00 : f32
    %408 = vector.broadcast %cst_111 : f32 to vector<16x16xf32>
    %409 = arith.subf %408, %404 : vector<16x16xf32>
    %410 = arith.mulf %409, %407 : vector<16x16xf32>
    %411 = arith.mulf %404, %389 : vector<16x16xf32>
    %412 = arith.addf %410, %411 : vector<16x16xf32>
    %413 = vector.extract_strided_slice %26 {offsets = [0, 0], sizes = [16, 16], strides = [1, 1]} : vector<80x16xf32> to vector<16x16xf32>
    %414 = vector.extract_strided_slice %26 {offsets = [16, 0], sizes = [16, 16], strides = [1, 1]} : vector<80x16xf32> to vector<16x16xf32>
    %415 = vector.extract_strided_slice %26 {offsets = [32, 0], sizes = [16, 16], strides = [1, 1]} : vector<80x16xf32> to vector<16x16xf32>
    %416 = vector.extract_strided_slice %26 {offsets = [48, 0], sizes = [16, 16], strides = [1, 1]} : vector<80x16xf32> to vector<16x16xf32>
    %417 = vector.extract_strided_slice %26 {offsets = [64, 0], sizes = [16, 16], strides = [1, 1]} : vector<80x16xf32> to vector<16x16xf32>
    %418 = tpu.concatenate %251, %274, %297, %320, %343, %366, %389, %412, %413, %414, %415, %416, %417 in 1 : vector<16x16xf32>, vector<16x16xf32>, vector<16x16xf32>, vector<16x16xf32>, vector<16x16xf32>, vector<16x16xf32>, vector<16x16xf32>, vector<16x16xf32>, vector<16x16xf32>, vector<16x16xf32>, vector<16x16xf32>, vector<16x16xf32>, vector<16x16xf32> -> vector<16x208xf32>
    %419 = arith.truncf %418 : vector<16x208xf32> to vector<16x208xbf16>
    %c0_112 = arith.constant 0 : index
    %c0_113 = arith.constant 0 : index
    %420 = vector.load %arg23[%c0_112, %c0_113] : memref<208x4xbf16, #tpu.memory_space<vmem>>, vector<208x4xbf16>
    %cst_114 = arith.constant dense<0.000000e+00> : vector<16x4xf32>
    %421 = tpu.matmul %419, %420, %cst_114 {dimension_numbers = #tpu.dot_dimension_numbers<[1], [0], [0], [1], [0, 0, 1, 1], [], []>} : vector<16x208xbf16>, vector<208x4xbf16>, vector<16x4xf32> -> vector<16x4xf32>
    %c0_115 = arith.constant 0 : index
    %c0_116 = arith.constant 0 : index
    %422 = vector.load %arg24[%c0_115, %c0_116] : memref<1x4xf32, #tpu.memory_space<vmem>>, vector<1x4xf32>
    %423 = vector.broadcast %422 : vector<1x4xf32> to vector<16x4xf32>
    %424 = arith.addf %421, %423 : vector<16x4xf32>
    %cst_117 = arith.constant 0.000000e+00 : f32
    %425 = vector.broadcast %cst_117 : f32 to vector<16x4xf32>
    %426 = arith.maximumf %424, %425 : vector<16x4xf32>
    %c0_118 = arith.constant 0 : index
    %c0_119 = arith.constant 0 : index
    %427 = vector.load %arg25[%c0_118, %c0_119] : memref<16x4xf32, #tpu.memory_space<vmem>>, vector<16x4xf32>
    tpu.vector_store %arg25[%c0_118, %c0_119], %426 {strides = array<i32>} : memref<16x4xf32, #tpu.memory_space<vmem>>, vector<16x4xf32>,
    return
  }
}

</mosaic_0001>

<bundles_post_ra>
// kernel: tile.43
= control target key start
LH: loop header
LB: loop body
LE: loop exit
PB: predicated region body
PF: predicated region fallthrough
CT: control target
= control target key end

     0   :  { %s22_s0 = inlined_call_operand.vmem [shape: f32[6], index: 0, kind: input, shape index: {}]   ;;  %s23_s1 = inlined_call_operand.vmem [shape: f32[2,6], index: 1, kind: output, shape index: {}]  }
   0x1   :  { %v4_v0 = vld [vmem:[%s22_s0] ss:$0 sm:$0xff] }
   0x2   :  { %5 = vst [vmem:[%s23_s1] sm:$0x3] %v4_v0 }

// kernel: tile.44
= control target key start
LH: loop header
LB: loop body
LE: loop exit
PB: predicated region body
PF: predicated region fallthrough
CT: control target
= control target key end

     0   :  { %vm8_vm0 = vcmask 48128   ;;  %vm14_vm1 = vcmask 97328   ;;  %s42_s0 = inlined_call_operand.vmem [shape: f32[2,6], index: 0, kind: input, shape index: {}]   ;;  %s43_s1 = inlined_call_operand.vmem [shape: f32[12], index: 1, kind: output, shape index: {}]  }
   0x1   :  { %v5_v0 = vld [vmem:[%s42_s0] sm:$0x3]  ;;  %s25_s0 = smov 6  }
   0x2   :  { %6 = vst [vmem:[#allocation1] sm:$0x3] %v5_v0 }
   0x9   :  { %v11_v1 = vld [vmem:[#allocation1 + $0x1] sm:$0x1]   ;;  %v7_v2 = vld [vmem:[#allocation1] sm:$0x1]  }
   0xa   :  { %12 = vrot.lane.b32.xlu0 %v11_v1, %s25_s0  ;;  %9 = vst.msk [vmem:[#allocation0] sm:$0x1] %vm8_vm0, %v7_v2  }
  0x7c   :  { %v13_v3 = vpop.permute.xlu0 %12  }
  0x7d   :  { %15 = vst.msk [vmem:[#allocation0] sm:$0x1] %vm14_vm1, %v13_v3  }
  0x84   :  { %v20_v4 = vld [vmem:[#allocation0] sm:$0x1] }
  0x85   :  { %23 = vst [vmem:[%s43_s1] sm:$0x1] %v20_v4 }

// kernel: tile.48
= control target key start
LH: loop header
LB: loop body
LE: loop exit
PB: predicated region body
PF: predicated region fallthrough
CT: control target
= control target key end

     0   :  { %s22_s0 = inlined_call_operand.vmem [shape: f32[16], index: 0, kind: input, shape index: {}]   ;;  %s23_s1 = inlined_call_operand.vmem [shape: f32[5,16], index: 1, kind: output, shape index: {}]  }
   0x1   :  { %v4_v0 = vld [vmem:[%s22_s0] ss:$0 sm:$0xff] }
   0x2   :  { %5 = vst [vmem:[%s23_s1] sm:$0xff] %v4_v0 }

// kernel: mul.25
= control target key start
LH: loop header
LB: loop body
LE: loop exit
PB: predicated region body
PF: predicated region fallthrough
CT: control target
= control target key end

     0   :  { %s45_s10 = smov 64   ;;  %s46_s11 = smov 32   ;;  %vm3_vm0 = vcmask 130048   ;;  %vm9_vm1 = vcmask 654848   ;;  %vm15_vm2 = vcmask 523648   ;;  %vm21_vm3 = vcmask 392448   ;;  %s77_s0 = inlined_call_operand.vmem [shape: f32[5,16], index: 0, kind: input, shape index: {}]   ;;  %s78_s1 = inlined_call_operand.vmem [shape: f32[80], index: 1, kind: output, shape index: {}]  }
   0x1   :  { %v37_v0 = vld [vmem:[%s77_s0 + $0x4] sm:$0x1]   ;;  %v39_v1 = vld [vmem:[%s77_s0 + $0x2] sm:$0x1]   ;;  %v38_v2 = vld [vmem:[%s77_s0 + $0x3] sm:$0x1]  }
   0x2   :  { %7 = vrot.lane.b32.xlu0 %v37_v0, %s45_s10  ;;  %19 = vrot.lane.b32.xlu1 %v39_v1, %s46_s11  ;;  %v40_v3 = vld [vmem:[%s77_s0 + $0x1] sm:$0x1]   ;;  %v2_v4 = vld [vmem:[%s77_s0] sm:$0x1]   ;;  %s47_s0 = smov 48   ;;  %s48_s18 = smov 16  }
   0x3   :  { %4 = vst.msk [vmem:[#allocation0] sm:$0x1] %vm3_vm0, %v2_v4   ;;  %vm27_vm4 = vcmask 261248  }
   0x6   :  { %13 = vrot.lane.b32.xlu0 %v38_v2, %s47_s0  ;;  %25 = vrot.lane.b32.xlu1 %v40_v3, %s48_s18 }
  0x74   :  { %v8_v5 = vpop.permute.xlu0 %7   ;;  %v20_v6 = vpop.permute.xlu1 %19  }
  0x75   :  { %10 = vst.msk [vmem:[#allocation0] sm:$0x1] %vm9_vm1, %v8_v5  }
  0x78   :  { %v14_v7 = vpop.permute.xlu0 %13   ;;  %v26_v8 = vpop.permute.xlu1 %25  }
  0x79   :  { %16 = vst.msk [vmem:[#allocation0] sm:$0x1] %vm15_vm2, %v14_v7  }
  0x7a   :  { %22 = vst.msk [vmem:[#allocation0] sm:$0x1] %vm21_vm3, %v20_v6  }
  0x7b   :  { %28 = vst.msk [vmem:[#allocation0] sm:$0x1] %vm27_vm4, %v26_v8  }
  0x82   :  { %v33_v9 = vld [vmem:[#allocation0] sm:$0x1] }
  0x83   :  { %36 = vst [vmem:[%s78_s1] sm:$0x1] %v33_v9 }

// kernel: tile.1
= control target key start
LH: loop header
LB: loop body
LE: loop exit
PB: predicated region body
PF: predicated region fallthrough
CT: control target
= control target key end

     0   :  { %s219_s10 = smov 127   ;;  %s220_s11 = smov 125   ;;  %vm3_vm0 = vcmask 7168   ;;  %s484_s0 = inlined_call_operand.vmem [shape: f32[5,16], index: 0, kind: input, shape index: {}]   ;;  %s485_s1 = inlined_call_operand.vmem [shape: f32[80,1], index: 1, kind: output, shape index: {}]  }
   0x1   :  { %v8_v0 = vld [vmem:[%s484_s0] sm:$0x1f]   ;;  %s221_s16 = smov 126   ;;  %s222_s17 = smov 124  }
   0x2   :  { %v28_v1 = vld [vmem:[%s484_s0] sm:$0x1f]   ;;  %9 = vrot.lane.b32.xlu0 %v8_v0, %s219_s10  ;;  %s223_s22 = smov 123   ;;  %s224_s23 = smov 122  }
   0x3   :  { %29 = vrot.lane.b32.xlu1 %v28_v1, %s220_s11  ;;  %v18_v2 = vld [vmem:[%s484_s0] sm:$0x1f]   ;;  %s225_s28 = smov 121   ;;  %s226_s29 = smov 120  }
   0x4   :  { %v38_v3 = vld [vmem:[%s484_s0] sm:$0x1f]   ;;  %s227_s13 = smov 119   ;;  %s228_s14 = smov 118  }
   0x5   :  { %v48_v4 = vld [vmem:[%s484_s0] sm:$0x1f]   ;;  %s229_s19 = smov 117   ;;  %s230_s20 = smov 116  }
   0x6   :  { %19 = vrot.lane.b32.xlu0 %v18_v2, %s221_s16  ;;  %v58_v5 = vld [vmem:[%s484_s0] sm:$0x1f]   ;;  %s231_s25 = smov 115   ;;  %s232_s26 = smov 114  }
   0x7   :  { %39 = vrot.lane.b32.xlu1 %v38_v3, %s222_s17  ;;  %v68_v6 = vld [vmem:[%s484_s0] sm:$0x1f]  }
   0x8   :  { %v78_v7 = vld [vmem:[%s484_s0] sm:$0x1f]  }
   0x9   :  { %v88_v8 = vld [vmem:[%s484_s0] sm:$0x1f]  }
   0xa   :  { %49 = vrot.lane.b32.xlu0 %v48_v4, %s223_s22  ;;  %v98_v9 = vld [vmem:[%s484_s0] sm:$0x1f]  }
   0xb   :  { %59 = vrot.lane.b32.xlu1 %v58_v5, %s224_s23  ;;  %v2_v10 = vld [vmem:[%s484_s0] sm:$0x1f]  }
   0xc   :  { %4 = vst.msk [vmem:[%s485_s1] ss:$16 sm:$0x3] %vm3_vm0, %v2_v10   ;;  %5 = vst.msk [vmem:[%s485_s1] ss:$16 sm:$0xc] %vm3_vm0, %v2_v10  }
   0xd   :  { %158 = vst.msk [vmem:[%s485_s1 + $0x3c] sm:$0x10] %vm3_vm0, %v2_v10   ;;  %v108_v11 = vld [vmem:[%s484_s0] sm:$0x1f]  }
   0xe   :  { %69 = vrot.lane.b32.xlu0 %v68_v6, %s225_s28  ;;  %v118_v12 = vld [vmem:[%s484_s0] sm:$0x1f]  }
   0xf   :  { %79 = vrot.lane.b32.xlu1 %v78_v7, %s226_s29  ;;  %v128_v13 = vld [vmem:[%s484_s0] sm:$0x1f]  }
  0x10   :  { %v138_v14 = vld [vmem:[%s484_s0] sm:$0x1f]  }
  0x11   :  { %v148_v15 = vld [vmem:[%s484_s0] sm:$0x1f]   ;;  %s233_s0 = smov 113  }
  0x12   :  { %89 = vrot.lane.b32.xlu0 %v88_v8, %s227_s13 }
  0x13   :  { %99 = vrot.lane.b32.xlu1 %v98_v9, %s228_s14 }
  0x16   :  { %109 = vrot.lane.b32.xlu0 %v108_v11, %s229_s19 }
  0x17   :  { %119 = vrot.lane.b32.xlu1 %v118_v12, %s230_s20 }
  0x1a   :  { %129 = vrot.lane.b32.xlu0 %v128_v13, %s231_s25 }
  0x1b   :  { %139 = vrot.lane.b32.xlu1 %v138_v14, %s232_s26 }
  0x1e   :  { %149 = vrot.lane.b32.xlu0 %v148_v15, %s233_s0 }
  0x74   :  { %v10_v16 = vpop.permute.xlu0 %9  }
  0x75   :  { %v30_v17 = vpop.permute.xlu1 %29   ;;  %159 = vst.msk [vmem:[%s485_s1 + $0x1] ss:$16 sm:$0x3] %vm3_vm0, %v10_v16   ;;  %160 = vst.msk [vmem:[%s485_s1 + $0x1] ss:$16 sm:$0xc] %vm3_vm0, %v10_v16  }
  0x76   :  { %161 = vst.msk [vmem:[%s485_s1 + $0x3d] sm:$0x10] %vm3_vm0, %v10_v16   ;;  %165 = vst.msk [vmem:[%s485_s1 + $0x3] ss:$16 sm:$0x3] %vm3_vm0, %v30_v17  }
  0x77   :  { %166 = vst.msk [vmem:[%s485_s1 + $0x3] ss:$16 sm:$0xc] %vm3_vm0, %v30_v17   ;;  %167 = vst.msk [vmem:[%s485_s1 + $0x3f] sm:$0x10] %vm3_vm0, %v30_v17  }
  0x78   :  { %v20_v18 = vpop.permute.xlu0 %19  }
  0x79   :  { %v40_v19 = vpop.permute.xlu1 %39   ;;  %162 = vst.msk [vmem:[%s485_s1 + $0x2] ss:$16 sm:$0x3] %vm3_vm0, %v20_v18   ;;  %163 = vst.msk [vmem:[%s485_s1 + $0x2] ss:$16 sm:$0xc] %vm3_vm0, %v20_v18  }
  0x7a   :  { %164 = vst.msk [vmem:[%s485_s1 + $0x3e] sm:$0x10] %vm3_vm0, %v20_v18   ;;  %168 = vst.msk [vmem:[%s485_s1 + $0x4] ss:$16 sm:$0x3] %vm3_vm0, %v40_v19  }
  0x7b   :  { %169 = vst.msk [vmem:[%s485_s1 + $0x4] ss:$16 sm:$0xc] %vm3_vm0, %v40_v19   ;;  %170 = vst.msk [vmem:[%s485_s1 + $0x40] sm:$0x10] %vm3_vm0, %v40_v19  }
  0x7c   :  { %v50_v20 = vpop.permute.xlu0 %49  }
  0x7d   :  { %v60_v21 = vpop.permute.xlu1 %59   ;;  %171 = vst.msk [vmem:[%s485_s1 + $0x5] ss:$16 sm:$0x3] %vm3_vm0, %v50_v20   ;;  %172 = vst.msk [vmem:[%s485_s1 + $0x5] ss:$16 sm:$0xc] %vm3_vm0, %v50_v20  }
  0x7e   :  { %173 = vst.msk [vmem:[%s485_s1 + $0x41] sm:$0x10] %vm3_vm0, %v50_v20   ;;  %174 = vst.msk [vmem:[%s485_s1 + $0x6] ss:$16 sm:$0x3] %vm3_vm0, %v60_v21  }
  0x7f   :  { %175 = vst.msk [vmem:[%s485_s1 + $0x6] ss:$16 sm:$0xc] %vm3_vm0, %v60_v21   ;;  %176 = vst.msk [vmem:[%s485_s1 + $0x42] sm:$0x10] %vm3_vm0, %v60_v21  }
  0x80   :  { %v70_v22 = vpop.permute.xlu0 %69  }
  0x81   :  { %v80_v23 = vpop.permute.xlu1 %79   ;;  %177 = vst.msk [vmem:[%s485_s1 + $0x7] ss:$16 sm:$0x3] %vm3_vm0, %v70_v22   ;;  %178 = vst.msk [vmem:[%s485_s1 + $0x7] ss:$16 sm:$0xc] %vm3_vm0, %v70_v22  }
  0x82   :  { %179 = vst.msk [vmem:[%s485_s1 + $0x43] sm:$0x10] %vm3_vm0, %v70_v22   ;;  %180 = vst.msk [vmem:[%s485_s1 + $0x8] ss:$16 sm:$0x3] %vm3_vm0, %v80_v23  }
  0x83   :  { %181 = vst.msk [vmem:[%s485_s1 + $0x8] ss:$16 sm:$0xc] %vm3_vm0, %v80_v23   ;;  %182 = vst.msk [vmem:[%s485_s1 + $0x44] sm:$0x10] %vm3_vm0, %v80_v23  }
  0x84   :  { %v90_v24 = vpop.permute.xlu0 %89  }
  0x85   :  { %v100_v25 = vpop.permute.xlu1 %99   ;;  %183 = vst.msk [vmem:[%s485_s1 + $0x9] ss:$16 sm:$0x3] %vm3_vm0, %v90_v24   ;;  %184 = vst.msk [vmem:[%s485_s1 + $0x9] ss:$16 sm:$0xc] %vm3_vm0, %v90_v24  }
  0x86   :  { %185 = vst.msk [vmem:[%s485_s1 + $0x45] sm:$0x10] %vm3_vm0, %v90_v24   ;;  %186 = vst.msk [vmem:[%s485_s1 + $0xa] ss:$16 sm:$0x3] %vm3_vm0, %v100_v25  }
  0x87   :  { %187 = vst.msk [vmem:[%s485_s1 + $0xa] ss:$16 sm:$0xc] %vm3_vm0, %v100_v25   ;;  %188 = vst.msk [vmem:[%s485_s1 + $0x46] sm:$0x10] %vm3_vm0, %v100_v25  }
  0x88   :  { %v110_v26 = vpop.permute.xlu0 %109  }
  0x89   :  { %v120_v27 = vpop.permute.xlu1 %119   ;;  %189 = vst.msk [vmem:[%s485_s1 + $0xb] ss:$16 sm:$0x3] %vm3_vm0, %v110_v26   ;;  %190 = vst.msk [vmem:[%s485_s1 + $0xb] ss:$16 sm:$0xc] %vm3_vm0, %v110_v26  }
  0x8a   :  { %191 = vst.msk [vmem:[%s485_s1 + $0x47] sm:$0x10] %vm3_vm0, %v110_v26   ;;  %192 = vst.msk [vmem:[%s485_s1 + $0xc] ss:$16 sm:$0x3] %vm3_vm0, %v120_v27  }
  0x8b   :  { %193 = vst.msk [vmem:[%s485_s1 + $0xc] ss:$16 sm:$0xc] %vm3_vm0, %v120_v27   ;;  %194 = vst.msk [vmem:[%s485_s1 + $0x48] sm:$0x10] %vm3_vm0, %v120_v27  }
  0x8c   :  { %v130_v28 = vpop.permute.xlu0 %129  }
  0x8d   :  { %v140_v29 = vpop.permute.xlu1 %139   ;;  %195 = vst.msk [vmem:[%s485_s1 + $0xd] ss:$16 sm:$0x3] %vm3_vm0, %v130_v28   ;;  %196 = vst.msk [vmem:[%s485_s1 + $0xd] ss:$16 sm:$0xc] %vm3_vm0, %v130_v28  }
  0x8e   :  { %197 = vst.msk [vmem:[%s485_s1 + $0x49] sm:$0x10] %vm3_vm0, %v130_v28   ;;  %198 = vst.msk [vmem:[%s485_s1 + $0xe] ss:$16 sm:$0x3] %vm3_vm0, %v140_v29  }
  0x8f   :  { %199 = vst.msk [vmem:[%s485_s1 + $0xe] ss:$16 sm:$0xc] %vm3_vm0, %v140_v29   ;;  %200 = vst.msk [vmem:[%s485_s1 + $0x4a] sm:$0x10] %vm3_vm0, %v140_v29  }
  0x90   :  { %v150_v30 = vpop.permute.xlu0 %149  }
  0x91   :  { %201 = vst.msk [vmem:[%s485_s1 + $0xf] ss:$16 sm:$0x3] %vm3_vm0, %v150_v30   ;;  %202 = vst.msk [vmem:[%s485_s1 + $0xf] ss:$16 sm:$0xc] %vm3_vm0, %v150_v30  }
  0x92   :  { %203 = vst.msk [vmem:[%s485_s1 + $0x4b] sm:$0x10] %vm3_vm0, %v150_v30  }

// kernel: _lambda_.1
= control target key start
LH: loop header
LB: loop body
LE: loop exit
PB: predicated region body
PF: predicated region fallthrough
CT: control target
= control target key end

     0   :  { %vm156_vm0 = vcmask 1045504   ;;  %v4257_v0 = vmov 0.0   ;;  %vm4258_vm1 = vmmov 0   ;;  %v4259_v6 = vmov 0   ;;  %s4261_s27 = smov 16   ;;  %s5544_s4 = inlined_call_operand.vmem [shape: bf16[12,16], index: 4, kind: input, shape index: {}]   ;;  %s5545_s0 = inlined_call_operand.vmem [shape: f32[80,12], index: 0, kind: input, shape index: {}]   ;;  %s5546_s2 = inlined_call_operand.vmem [shape: f32[80,1], index: 2, kind: input, shape index: {}]   ;;  %s5547_s3 = inlined_call_operand.vmem [shape: f32[80,1], index: 3, kind: input, shape index: {}]   ;;  %s5548_s1 = inlined_call_operand.vmem [shape: f32[80,1], index: 1, kind: input, shape index: {}]   ;;  %s5549_s6 = inlined_call_operand.vmem [shape: bf16[64,16], index: 6, kind: input, shape index: {}]   ;;  %s5550_s5 = inlined_call_operand.vmem [shape: f32[1,16], index: 5, kind: input, shape index: {}]   ;;  %s5551_s9 = inlined_call_operand.vmem [shape: bf16[3,32], index: 9, kind: input, shape index: {}]   ;;  %s5552_s10 = inlined_call_operand.vmem [shape: bf16[3,16], index: 10, kind: input, shape index: {}]   ;;  %s5553_s8 = inlined_call_operand.vmem [shape: f32[128,3], index: 8, kind: input, shape index: {}]   ;;  %s5554_s7 = inlined_call_operand.vmem [shape: f32[1,16], index: 7, kind: input, shape index: {}]   ;;  %s5555_s13 = inlined_call_operand.vmem [shape: f32[1,32], index: 13, kind: input, shape index: {}]   ;;  %s5556_s14 = inlined_call_operand.vmem [shape: f32[1,16], index: 14, kind: input, shape index: {}]   ;;  %s5557_s15 = inlined_call_operand.vmem [shape: f32[1,16], index: 15, kind: input, shape index: {}]   ;;  %s5558_s11 = inlined_call_operand.vmem [shape: bf16[16,32], index: 11, kind: input, shape index: {}]   ;;  %s5559_s12 = inlined_call_operand.vmem [shape: bf16[16,16], index: 12, kind: input, shape index: {}]   ;;  %s5560_s16 = inlined_call_operand.vmem [shape: bf16[16,32], index: 16, kind: input, shape index: {}]   ;;  %s5561_s17 = inlined_call_operand.vmem [shape: bf16[16,16], index: 17, kind: input, shape index: {}]   ;;  %s5562_s20 = inlined_call_operand.vmem [shape: f32[1,32], index: 20, kind: input, shape index: {}]   ;;  %s5563_s22 = inlined_call_operand.vmem [shape: f32[1,16], index: 22, kind: input, shape index: {}]   ;;  %s5564_s21 = inlined_call_operand.vmem [shape: f32[1,16], index: 21, kind: input, shape index: {}]   ;;  %s5565_s18 = inlined_call_operand.vmem [shape: bf16[16,32], index: 18, kind: input, shape index: {}]   ;;  %s5566_s19 = inlined_call_operand.vmem [shape: bf16[16,16], index: 19, kind: input, shape index: {}]   ;;  %s5567_s23 = inlined_call_operand.vmem [shape: bf16[208,4], index: 23, kind: input, shape index: {}]   ;;  %s5568_s24 = inlined_call_operand.vmem [shape: f32[1,4], index: 24, kind: input, shape index: {}]   ;;  %s5569_s25 = inlined_call_operand.vmem [shape: f32[16,4], index: 25, kind: output, shape index: {}]  }
   0x1   :  { %5576 = sst [smem:[#allocation2_spill]] %s5544_s4  ;;  %3597 = vmatprep.subr.bf16.mxu0 %v4257_v0  ;;  %3599 = vmatprep.mubr.msk.bf16.mxu0 %vm4258_vm1, %v4257_v0  ;;  %vm140_vm2 = vcmask 97280   ;;  %vm776_vm3 = vcmask 1040384   ;;  %vm777_vm4 = vcmask 1041408   ;;  %vm543_vm5 = vcmask 130048  }
   0x2   :  { %5577 = sst [smem:[#allocation3_spill]] %s5545_s0  ;;  %3887 = vmatprep.subr.bf16.mxu1 %v4257_v0  ;;  %3639 = vmatprep.mubr.msk.bf16.mxu1 %vm4258_vm1, %v4257_v0  ;;  %vm554_vm6 = vcmask 261120   ;;  %vm565_vm7 = vcmask 392192   ;;  %vm620_vm8 = vcmask 523264   ;;  %vm751_vm9 = vcmask 23552  }
   0x3   :  { %5578 = sst [smem:[#allocation4_spill]] %s5546_s2  ;;  %3906 = vset.pattern.permute.xlu0 %v4259_v6  ;;  %3907 = vset.pattern.permute.xlu1 %v4259_v6  ;;  %vm3171_vm10 = vcmask 654336   ;;  %vm3174_vm11 = vcmask 785408   ;;  %vm3177_vm12 = vcmask 916480   ;;  %vm3347_vm13 = vcmask 31744  }
   0x4   :  { %5579 = sst [smem:[#allocation5_spill]] %s5547_s3 }
   0x5   :  { %5580 = sst [smem:[#allocation6_spill]] %s5548_s1 }
   0x6   :  { %5581 = sst [smem:[#allocation7_spill]] %s5549_s6 }
   0x7   :  { %5582 = sst [smem:[#allocation8_spill]] %s5550_s5 }
   0x8   :  { %5583 = sst [smem:[#allocation9_spill]] %s5551_s9 }
   0x9   :  { %5584 = sst [smem:[#allocation10_spill]] %s5552_s10 }
   0xa   :  { %5585 = sst [smem:[#allocation11_spill]] %s5553_s8 }
   0xb   :  { %s5586_s5 = sld [smem:[#allocation2_spill]] }
   0xc   :  { %s5587_s3 = sld [smem:[#allocation3_spill]] }
   0xd   :  { %s5588_s1 = sld [smem:[#allocation4_spill]] }
   0xe   :  { %s5589_s6 = sld [smem:[#allocation5_spill]] }
   0xf   :  { %s5591_s2 = sld [smem:[#allocation7_spill]] }
  0x10   :  { %s5592_s26 = sld [smem:[#allocation8_spill]] }
  0x11   :  { %v4038_v1 = vld [vmem:[%s5586_s5] sm:$0x3f]   ;;  %s5593_s30 = sld [smem:[#allocation9_spill]] }
  0x12   :  { %v111_v2 = vld [vmem:[%s5587_s3] sm:$0xff]  ;;  %v112_v3 = vld [vmem:[%s5587_s3 + $0x8] sm:$0xff]  ;;  %v158_v4 = vsel %vm156_vm0, %v4038_v1, 0  ;;  %v113_v11 = vld [vmem:[%s5587_s3 + $0x10] sm:$0xff]  ;;  %s5594_s5 = sld [smem:[#allocation10_spill]] }
  0x13   :  { %v121_v5 = vpack.c.bf16 %v112_v3, %v111_v2  ;;  %3598 = vmatpush3.bf16.msra.mxu0 %v158_v4  ;;  %v91_v7 = vld [vmem:[%s5588_s1] sm:$0xff]  ;;  %v92_v9 = vld [vmem:[%s5588_s1 + $0x8] sm:$0xff]  ;;  %v114_v12 = vld [vmem:[%s5587_s3 + $0x18] sm:$0xff] }
  0x14   :  { %305 = vperm.xlu0 %3906, %v91_v7   ;;  %v101_v8 = vld [vmem:[%s5589_s6] sm:$0xff]  ;;  %3619 = vmatprep.subr.bf16.mxu0 %v4257_v0  ;;  %v102_v10 = vld [vmem:[%s5589_s6 + $0x8] sm:$0xff]  ;;  %v93_v13 = vld [vmem:[%s5588_s1 + $0x10] sm:$0xff]  ;;  %v122_v14 = vpack.c.bf16 %v114_v12, %v113_v11 }
  0x15   :  { %365 = vperm.xlu1 %3907, %v101_v8   ;;  %v94_v15 = vld [vmem:[%s5588_s1 + $0x18] sm:$0xff]  ;;  %v103_v16 = vld [vmem:[%s5589_s6 + $0x10] sm:$0xff]  ;;  %v115_v18 = vld [vmem:[%s5587_s3 + $0x20] sm:$0xff] }
  0x16   :  { %3600 = vmatmul.mubr.msk.bf16.vlgmr.msra.gmra.mxu0 %vm140_vm2, %v121_v5  ;;  %v104_v17 = vld [vmem:[%s5589_s6 + $0x18] sm:$0xff]  ;;  %v116_v19 = vld [vmem:[%s5587_s3 + $0x28] sm:$0xff]  ;;  %v95_v20 = vld [vmem:[%s5588_s1 + $0x20] sm:$0xff] }
  0x17   :  { %3603 = vmatprep.mubr.msk.bf16.mxu0 %vm4258_vm1, %v4257_v0  ;;  %v123_v21 = vpack.c.bf16 %v116_v19, %v115_v18  ;;  %v96_v22 = vld [vmem:[%s5588_s1 + $0x28] sm:$0xff]  ;;  %v105_v23 = vld [vmem:[%s5589_s6 + $0x20] sm:$0xff]  ;;  %v117_v25 = vld [vmem:[%s5587_s3 + $0x30] sm:$0xff] }
  0x18   :  { %310 = vperm.xlu0 %3906, %v92_v9   ;;  %v106_v24 = vld [vmem:[%s5589_s6 + $0x28] sm:$0xff]  ;;  %v118_v26 = vld [vmem:[%s5587_s3 + $0x38] sm:$0xff]  ;;  %v97_v27 = vld [vmem:[%s5588_s1 + $0x30] sm:$0xff] }
  0x19   :  { %370 = vperm.xlu1 %3907, %v102_v10   ;;  %v124_v28 = vpack.c.bf16 %v118_v26, %v117_v25  ;;  %v98_v29 = vld [vmem:[%s5588_s1 + $0x38] sm:$0xff]  ;;  %v107_v30 = vld [vmem:[%s5589_s6 + $0x30] sm:$0xff]  ;;  %v119_v32 = vld [vmem:[%s5587_s3 + $0x40] sm:$0xff] }
  0x1a   :  { %v108_v31 = vld [vmem:[%s5589_s6 + $0x38] sm:$0xff]  ;;  %v120_v33 = vld [vmem:[%s5587_s3 + $0x48] sm:$0xff]  ;;  %v99_v34 = vld [vmem:[%s5588_s1 + $0x40] sm:$0xff] }
  0x1b   :  { %v125_v35 = vpack.c.bf16 %v120_v33, %v119_v32  ;;  %v100_v36 = vld [vmem:[%s5588_s1 + $0x48] sm:$0xff]  ;;  %v109_v37 = vld [vmem:[%s5589_s6 + $0x40] sm:$0xff]  ;;  %s5590_s1 = sld [smem:[#allocation6_spill]]  ;;  %v4039_v43 = vld [vmem:[%s5591_s2 + $0x18] sm:$0xff]  }
  0x1c   :  { %315 = vperm.xlu0 %3906, %v93_v13   ;;  %v110_v38 = vld [vmem:[%s5589_s6 + $0x48] sm:$0xff]  ;;  %3620 = vmatpush3.bf16.msra.mxu0 %v4039_v43  ;;  %v4040_v44 = vld [vmem:[%s5591_s2 + $0x10] sm:$0xff]   ;;  %v4545_v50 = vld [vmem:[%s5592_s26] ss:$0 sm:$0xff]  ;;  %s4260_s6 = smov 32   ;;  %s5595_s26 = sld [smem:[#allocation11_spill]] }
  0x1d   :  { %320 = vperm.xlu1 %3907, %v94_v15   ;;  %3891 = vmatpush3.bf16.msra.mxu1 %v4039_v43  ;;  %v4041_v45 = vld [vmem:[%s5591_s2 + $0x8] sm:$0xff]   ;;  %v4042_v59 = vld [vmem:[%s5591_s2] sm:$0xff]   ;;  %s4262_s2 = smov 48  }
  0x1e   :  { %3604 = vmatmul.mubr.msk.bf16.gmra.mxu0 %vm140_vm2, %v122_v14  ;;  %3621 = vmatprep.subr.bf16.mxu0 %v4257_v0  ;;  %v743_v32 = vld [vmem:[%s5593_s30] sm:$0x3] }
  0x1f   :  { %3607 = vmatprep.mubr.msk.bf16.mxu0 %vm4258_vm1, %v4257_v0  ;;  %3888 = vmatprep.subr.bf16.mxu1 %v4257_v0 }
  0x20   :  { %375 = vperm.xlu0 %3906, %v103_v16   ;;  %3622 = vmatpush3.bf16.msra.mxu0 %v4040_v44 }
  0x21   :  { %380 = vperm.xlu1 %3907, %v104_v17   ;;  %v81_v39 = vld [vmem:[%s5590_s1] sm:$0xff]  ;;  %v82_v40 = vld [vmem:[%s5590_s1 + $0x8] sm:$0xff]  ;;  %v84_v41 = vld [vmem:[%s5590_s1 + $0x18] sm:$0xff]  ;;  %3892 = vmatpush3.bf16.msra.mxu1 %v4040_v44 }
  0x22   :  { %v83_v42 = vld [vmem:[%s5590_s1 + $0x10] sm:$0xff]  ;;  %3623 = vmatprep.subr.bf16.mxu0 %v4257_v0  ;;  %3889 = vmatprep.subr.bf16.mxu1 %v4257_v0  ;;  %v86_v17 = vld [vmem:[%s5590_s1 + $0x28] sm:$0xff]  ;;  %v85_v26 = vld [vmem:[%s5590_s1 + $0x20] sm:$0xff] }
  0x24   :  { %325 = vperm.xlu0 %3906, %v95_v20   ;;  %3624 = vmatpush3.bf16.msra.mxu0 %v4041_v45 }
  0x25   :  { %330 = vperm.xlu1 %3907, %v96_v22   ;;  %3893 = vmatpush3.bf16.msra.mxu1 %v4041_v45 }
  0x26   :  { %3608 = vmatmul.mubr.msk.bf16.gmra.mxu0 %vm140_vm2, %v123_v21  ;;  %3625 = vmatprep.subr.bf16.mxu0 %v4257_v0 }
  0x27   :  { %3611 = vmatprep.mubr.msk.bf16.mxu0 %vm4258_vm1, %v4257_v0  ;;  %3890 = vmatprep.subr.bf16.mxu1 %v4257_v0 }
  0x28   :  { %385 = vperm.xlu0 %3906, %v105_v23   ;;  %3626 = vmatpush3.bf16.msra.mxu0 %v4042_v59 }
  0x29   :  { %390 = vperm.xlu1 %3907, %v106_v24   ;;  %3894 = vmatpush3.bf16.msra.mxu1 %v4042_v59 }
  0x2c   :  { %335 = vperm.xlu0 %3906, %v97_v27  }
  0x2d   :  { %340 = vperm.xlu1 %3907, %v98_v29  }
  0x2e   :  { %3612 = vmatmul.mubr.msk.bf16.gmra.mxu0 %vm140_vm2, %v124_v28 }
  0x2f   :  { %3615 = vmatprep.mubr.msk.bf16.mxu0 %vm4258_vm1, %v4257_v0 }
  0x30   :  { %395 = vperm.xlu0 %3906, %v107_v30  }
  0x31   :  { %400 = vperm.xlu1 %3907, %v108_v31  }
  0x34   :  { %345 = vperm.xlu0 %3906, %v99_v34  }
  0x35   :  { %350 = vperm.xlu1 %3907, %v100_v36   ;;  %v4263_v36 = vmov 65535  }
  0x36   :  { %3616 = vmatmul.mubr.msk.bf16.gmra.mxu0 %vm140_vm2, %v125_v35 }
  0x37   :  { %3627 = vmatprep.mubr.msk.bf16.mxu0 %vm4258_vm1, %v4257_v0 }
  0x38   :  { %405 = vperm.xlu0 %3906, %v109_v37   ;;  %v778_v37 = vsel %vm776_vm3, 4294967295, %v4263_v36 }
  0x39   :  { %410 = vperm.xlu1 %3907, %v110_v38  }
  0x3c   :  { %245 = vperm.xlu0 %3906, %v81_v39   ;;  %v4591_v39 = vsel %vm777_vm4, %v778_v37, 0 }
  0x3d   :  { %250 = vperm.xlu1 %3907, %v82_v40  }
  0x40   :  { %260 = vperm.xlu0 %3906, %v84_v41  }
  0x41   :  { %255 = vperm.xlu1 %3907, %v83_v42   ;;  %v4596_v42 = vand.u32 %v4591_v39, %v743_v32 }
  0x43   :  { %3647 = vmatprep.subr.bf16.mxu0 %v4596_v42 }
  0x8f   :  { %v306_v47 = vpop.permute.xlu0 %305 }
  0x90   :  { %v366_v46 = vpop.permute.xlu1 %365 }
  0x93   :  { %v311_v49 = vpop.permute.xlu0 %310 }
  0x94   :  { %v371_v48 = vpop.permute.xlu1 %370 }
  0x97   :  { %v316_v54 = vpop.permute.xlu0 %315 }
  0x98   :  { %v321_v51 = vpop.permute.xlu1 %320 }
  0x9b   :  { %v376_v63 = vpop.permute.xlu0 %375 }
  0x9c   :  { %v381_v60 = vpop.permute.xlu1 %380 }
  0x9f   :  { %v326_v15 = vpop.permute.xlu0 %325 }
  0xa0   :  { %v331_v11 = vpop.permute.xlu1 %330 }
  0xa3   :  { %v386_v29 = vpop.permute.xlu0 %385 }
  0xa4   :  { %v391_v24 = vpop.permute.xlu1 %390 }
  0xa8   :  { %v341_v43 = vpop.permute.xlu1 %340 }
  0xac   :  { %v401_v59 = vpop.permute.xlu1 %400 }
  0xd6   :  { %v194_v52 = vpop.f32.mrf.mxu0 }
  0xd7   :  { %v195_v53 = vadd.f32 %v4545_v50, %v194_v52 }
  0xd8   :  { %v3601_v55 = vpop.f32.mrf.mxu0 }
  0xd9   :  { %v4548_v56 = vmax.f32 %v195_v53, 0.0 }
  0xda   :  { %v197_v57 = vpop.f32.mrf.mxu0 }
  0xdb   :  { %v198_v58 = vadd.f32 %v4545_v50, %v197_v57  ;;  %v413_v2 = vmul.f32 %v366_v46, %v4548_v56  ;;  %v353_v5 = vmul.f32 %v306_v47, %v4548_v56 }
  0xdc   :  { %v3602_v61 = vpop.f32.mrf.mxu0 }
  0xdd   :  { %v4554_v62 = vmax.f32 %v198_v58, 0.0  ;;  %v87_v61 = vld [vmem:[%s5590_s1 + $0x30] sm:$0xff] }
  0xde   :  { %v202_v1 = vpop.f32.mrf.mxu0 }
  0xdf   :  { %v203_v3 = vadd.f32 %v4545_v50, %v202_v1  ;;  %v414_v4 = vmul.f32 %v371_v48, %v4554_v62  ;;  %v354_v7 = vmul.f32 %v311_v49, %v4554_v62  ;;  %v3913_v19 = vpack.i.bf16 %v4554_v62, %v4548_v56  ;;  %v336_v49 = vpop.permute.xlu0 %335 }
  0xe0   :  { %v3605_v8 = vpop.f32.mrf.mxu0 }
  0xe1   :  { %v3918_v9 = vpack.i.bf16 %v414_v4, %v413_v2  ;;  %v3908_v10 = vpack.i.bf16 %v354_v7, %v353_v5  ;;  %v4561_v13 = vmax.f32 %v203_v3, 0.0  ;;  %v90_v5 = vld [vmem:[%s5590_s1 + $0x48] sm:$0xff]  ;;  %v88_v7 = vld [vmem:[%s5590_s1 + $0x38] sm:$0xff] }
  0xe2   :  { %v205_v12 = vpop.f32.mrf.mxu0 }
  0xe3   :  { %v206_v14 = vadd.f32 %v4545_v50, %v205_v12  ;;  %3919 = vrot.lane.b32.xlu1 %v3918_v9, %s4260_s6  ;;  %3909 = vrot.lane.b32.xlu0 %v3908_v10, %s4261_s27  ;;  %v355_v22 = vmul.f32 %v316_v54, %v4561_v13  ;;  %v415_v34 = vmul.f32 %v376_v63, %v4561_v13  ;;  %v396_v1 = vpop.permute.xlu0 %395  ;;  %v351_v9 = vpop.permute.xlu1 %350 }
  0xe4   :  { %v3606_v16 = vpop.f32.mrf.mxu0 }
  0xe5   :  { %v4569_v18 = vmax.f32 %v206_v14, 0.0  ;;  %v89_v16 = vld [vmem:[%s5590_s1 + $0x40] sm:$0xff] }
  0xe6   :  { %v210_v20 = vpop.f32.mrf.mxu0 }
  0xe7   :  { %v211_v21 = vadd.f32 %v4545_v50, %v210_v20  ;;  %270 = vperm.xlu1 %3907, %v86_v17   ;;  %3914 = vrot.lane.b32.xlu0 %v3913_v19, %s4262_s2  ;;  %v356_v23 = vmul.f32 %v321_v51, %v4569_v18  ;;  %v416_v28 = vmul.f32 %v381_v60, %v4569_v18 }
  0xe8   :  { %v3609_v25 = vpop.f32.mrf.mxu0  ;;  %v3933_v35 = vpack.i.bf16 %v4569_v18, %v4561_v13 }
  0xe9   :  { %v3923_v27 = vpack.i.bf16 %v356_v23, %v355_v22  ;;  %v4581_v30 = vmax.f32 %v211_v21, 0.0  ;;  %v3928_v41 = vpack.i.bf16 %v416_v28, %v415_v34 }
  0xea   :  { %v213_v31 = vpop.f32.mrf.mxu0 }
  0xeb   :  { %v214_v33 = vadd.f32 %v4545_v50, %v213_v31  ;;  %265 = vperm.xlu0 %3906, %v85_v26   ;;  %3924 = vrot.lane.b32.xlu1 %v3923_v27, %s4261_s27  ;;  %v417_v45 = vmul.f32 %v386_v29, %v4581_v30  ;;  %v357_v47 = vmul.f32 %v326_v15, %v4581_v30  ;;  %v346_v15 = vpop.permute.xlu0 %345 }
  0xec   :  { %v3610_v38 = vpop.f32.mrf.mxu0 }
  0xed   :  { %v4593_v40 = vmax.f32 %v214_v33, 0.0 }
  0xee   :  { %v218_v44 = vpop.f32.mrf.mxu0 }
  0xef   :  { %3929 = vrot.lane.b32.xlu0 %v3928_v41, %s4260_s6  ;;  %3934 = vrot.lane.b32.xlu1 %v3933_v35, %s4262_s2  ;;  %v418_v46 = vmul.f32 %v391_v24, %v4593_v40  ;;  %v358_v48 = vmul.f32 %v331_v11, %v4593_v40  ;;  %v219_v55 = vadd.f32 %v4545_v50, %v218_v44  ;;  %v411_v24 = vpop.permute.xlu1 %410  ;;  %v406_v28 = vpop.permute.xlu0 %405  ;;  %v880_v35 = vld [vmem:[%s5594_s5] sm:$0x3] }
  0xf0   :  { %v3613_v51 = vpop.f32.mrf.mxu0  ;;  %v3948_v58 = vpack.i.bf16 %v4593_v40, %v4581_v30  ;;  %v4656_v36 = vand.u32 %v880_v35, %v4591_v39 }
  0xf1   :  { %v3943_v52 = vpack.i.bf16 %v418_v46, %v417_v45  ;;  %v3938_v53 = vpack.i.bf16 %v358_v48, %v357_v47  ;;  %v4616_v3 = vmax.f32 %v219_v55, 0.0 }
  0xf2   :  { %v221_v54 = vpop.f32.mrf.mxu0  ;;  %3665 = vmatprep.subr.bf16.mxu1 %v4656_v36 }
  0xf3   :  { %v222_v57 = vadd.f32 %v4545_v50, %v221_v54  ;;  %3944 = vrot.lane.b32.xlu1 %v3943_v52, %s4260_s6  ;;  %3939 = vrot.lane.b32.xlu0 %v3938_v53, %s4261_s27  ;;  %v359_v14 = vmul.f32 %v336_v49, %v4616_v3  ;;  %v246_v37 = vpop.permute.xlu0 %245  ;;  %v251_v38 = vpop.permute.xlu1 %250 }
  0xf4   :  { %v3614_v60 = vpop.f32.mrf.mxu0  ;;  %v293_v46 = vmul.f32 %v246_v37, %v4548_v56  ;;  %v294_v47 = vmul.f32 %v251_v38, %v4554_v62  ;;  %v720_v37 = vld [vmem:[%s5595_s26 + $0x8] sm:$0xff] }
  0xf5   :  { %v4614_v63 = vmax.f32 %v222_v57, 0.0 }
  0xf6   :  { %v226_v2 = vpop.f32.mrf.mxu0 }
  0xf7   :  { %275 = vperm.xlu1 %3907, %v87_v61   ;;  %3949 = vrot.lane.b32.xlu0 %v3948_v58, %s4262_s2  ;;  %v360_v8 = vmul.f32 %v341_v43, %v4614_v63  ;;  %v227_v11 = vadd.f32 %v4545_v50, %v226_v2  ;;  %v420_v21 = vmul.f32 %v401_v59, %v4614_v63  ;;  %v261_v41 = vpop.permute.xlu0 %260  ;;  %v256_v43 = vpop.permute.xlu1 %255 }
  0xf8   :  { %v3617_v4 = vpop.f32.mrf.mxu0  ;;  %v3963_v23 = vpack.i.bf16 %v4614_v63, %v4616_v3 }
  0xf9   :  { %v3953_v20 = vpack.i.bf16 %v360_v8, %v359_v14  ;;  %v4635_v22 = vmax.f32 %v227_v11, 0.0  ;;  %v296_v8 = vmul.f32 %v261_v41, %v4569_v18 }
  0xfa   :  { %v229_v10 = vpop.f32.mrf.mxu0 }
  0xfb   :  { %v230_v12 = vadd.f32 %v4545_v50, %v229_v10  ;;  %290 = vperm.xlu1 %3907, %v90_v5   ;;  %280 = vperm.xlu0 %3906, %v88_v7   ;;  %v419_v50 = vmul.f32 %v396_v1, %v4616_v3  ;;  %v421_v29 = vmul.f32 %v406_v28, %v4635_v22 }
  0xfc   :  { %v3618_v17 = vpop.f32.mrf.mxu0  ;;  %v361_v31 = vmul.f32 %v346_v15, %v4635_v22  ;;  %v295_v7 = vmul.f32 %v256_v43, %v4561_v13 }
  0xfd   :  { %v4632_v19 = vmax.f32 %v230_v12, 0.0  ;;  %v3958_v25 = vpack.i.bf16 %v420_v21, %v419_v50 }
  0xff   :  { %285 = vperm.xlu0 %3906, %v89_v16   ;;  %3954 = vrot.lane.b32.xlu1 %v3953_v20, %s4261_s27  ;;  %v422_v26 = vmul.f32 %v411_v24, %v4632_v19  ;;  %v362_v27 = vmul.f32 %v351_v9, %v4632_v19  ;;  %v3978_v34 = vpack.i.bf16 %v4632_v19, %v4635_v22 }
 0x101   :  { %v3973_v32 = vpack.i.bf16 %v422_v26, %v421_v29  ;;  %v3968_v33 = vpack.i.bf16 %v362_v27, %v361_v31 }
 0x103   :  { %3959 = vrot.lane.b32.xlu0 %v3958_v25, %s4260_s6  ;;  %3964 = vrot.lane.b32.xlu1 %v3963_v23, %s4262_s2 }
 0x107   :  { %3974 = vrot.lane.b32.xlu1 %v3973_v32, %s4260_s6  ;;  %3969 = vrot.lane.b32.xlu0 %v3968_v33, %s4261_s27 }
 0x10b   :  { %3979 = vrot.lane.b32.xlu0 %v3978_v34, %s4262_s2 }
 0x155   :  { %v3920_v44 = vpop.permute.xlu1 %3919  ;;  %v3910_v45 = vpop.permute.xlu0 %3909 }
 0x156   :  { %v3912_v48 = vunpack.i.h.bf16 %v3910_v45  ;;  %v3911_v49 = vunpack.i.l.bf16 %v3910_v45  ;;  %v3922_v51 = vunpack.i.h.bf16 %v3920_v44  ;;  %v3921_v52 = vunpack.i.l.bf16 %v3920_v44 }
 0x158   :  { %v544_v39 = vsel %vm543_vm5, %v293_v46, %v3911_v49  ;;  %v545_v53 = vsel %vm543_vm5, %v294_v47, %v3912_v48 }
 0x159   :  { %v3915_v54 = vpop.permute.xlu0 %3914  ;;  %v555_v58 = vsel %vm554_vm6, %v544_v39, %v3921_v52  ;;  %v556_v59 = vsel %vm554_vm6, %v545_v53, %v3922_v51  ;;  %v721_v52 = vld [vmem:[%s5595_s26 + $0x10] sm:$0xff]  ;;  %v722_v39 = vld [vmem:[%s5595_s26 + $0x18] sm:$0xff] }
 0x15a   :  { %v3917_v55 = vunpack.i.h.bf16 %v3915_v54  ;;  %v3916_v57 = vunpack.i.l.bf16 %v3915_v54 }
 0x15c   :  { %v566_v56 = vsel %vm565_vm7, %v555_v58, %v3916_v57  ;;  %v567_v62 = vsel %vm565_vm7, %v556_v59, %v3917_v55  ;;  %v736_v55 = vpack.c.bf16 %v722_v39, %v721_v52 }
 0x15d   :  { %v576_v60 = vpack.c.bf16 %v567_v62, %v566_v56 }
 0x15f   :  { %3628 = vmatmul.mubr.msk.bf16.vlgmr.msra.gmra.mxu0 %vm620_vm8, %v576_v60 }
 0x160   :  { %3648 = vmatpush3.bf16.msra.mxu0 %v4596_v42  ;;  %3631 = vmatprep.mubr.msk.bf16.mxu0 %vm4258_vm1, %v4257_v0 }
 0x161   :  { %3683 = vmatprep.subr.bf16.mxu0 %v4257_v0 }
 0x162   :  { %v271_v61 = vpop.permute.xlu1 %270 }
 0x163   :  { %v298_v23 = vmul.f32 %v271_v61, %v4593_v40 }
 0x166   :  { %v266_v1 = vpop.permute.xlu0 %265  ;;  %v3925_v2 = vpop.permute.xlu1 %3924 }
 0x167   :  { %v3927_v4 = vunpack.i.h.bf16 %v3925_v2  ;;  %v3926_v5 = vunpack.i.l.bf16 %v3925_v2  ;;  %v297_v26 = vmul.f32 %v266_v1, %v4581_v30  ;;  %v719_v30 = vld [vmem:[%s5595_s26] sm:$0xff] }
 0x168   :  { %v735_v48 = vpack.c.bf16 %v720_v37, %v719_v30 }
 0x169   :  { %v546_v15 = vsel %vm543_vm5, %v295_v7, %v3926_v5  ;;  %v547_v16 = vsel %vm543_vm5, %v296_v8, %v3927_v4 }
 0x16a   :  { %v3930_v9 = vpop.permute.xlu0 %3929  ;;  %v3935_v10 = vpop.permute.xlu1 %3934 }
 0x16b   :  { %v3932_v11 = vunpack.i.h.bf16 %v3930_v9  ;;  %v3931_v12 = vunpack.i.l.bf16 %v3930_v9  ;;  %v3937_v14 = vunpack.i.h.bf16 %v3935_v10  ;;  %v3936_v42 = vunpack.i.l.bf16 %v3935_v10 }
 0x16d   :  { %v557_v17 = vsel %vm554_vm6, %v546_v15, %v3931_v12  ;;  %v558_v20 = vsel %vm554_vm6, %v547_v16, %v3932_v11 }
 0x16e   :  { %v568_v21 = vsel %vm565_vm7, %v557_v17, %v3936_v42  ;;  %v569_v13 = vsel %vm565_vm7, %v558_v20, %v3937_v14  ;;  %v3945_v50 = vpop.permute.xlu1 %3944  ;;  %v3940_v18 = vpop.permute.xlu0 %3939 }
 0x16f   :  { %v577_v24 = vpack.c.bf16 %v569_v13, %v568_v21  ;;  %v3942_v25 = vunpack.i.h.bf16 %v3940_v18  ;;  %v3947_v27 = vunpack.i.h.bf16 %v3945_v50  ;;  %v3946_v28 = vunpack.i.l.bf16 %v3945_v50 }
 0x170   :  { %v3941_v29 = vunpack.i.l.bf16 %v3940_v18 }
 0x171   :  { %v549_v31 = vsel %vm543_vm5, %v298_v23, %v3942_v25  ;;  %3632 = vmatmul.mubr.msk.bf16.gmra.mxu0 %vm620_vm8, %v577_v24 }
 0x172   :  { %v548_v32 = vsel %vm543_vm5, %v297_v26, %v3941_v29  ;;  %v276_v33 = vpop.permute.xlu1 %275  ;;  %v3950_v34 = vpop.permute.xlu0 %3949  ;;  %3635 = vmatprep.mubr.msk.bf16.mxu0 %vm4258_vm1, %v4257_v0  ;;  %v560_v41 = vsel %vm554_vm6, %v549_v31, %v3947_v27 }
 0x173   :  { %v3952_v35 = vunpack.i.h.bf16 %v3950_v34  ;;  %v3951_v40 = vunpack.i.l.bf16 %v3950_v34  ;;  %v559_v38 = vsel %vm554_vm6, %v548_v32, %v3946_v28  ;;  %v299_v57 = vmul.f32 %v276_v33, %v4616_v3 }
 0x175   :  { %v570_v43 = vsel %vm565_vm7, %v559_v38, %v3951_v40  ;;  %v571_v44 = vsel %vm565_vm7, %v560_v41, %v3952_v35 }
 0x176   :  { %v578_v45 = vpack.c.bf16 %v571_v44, %v570_v43  ;;  %v291_v46 = vpop.permute.xlu1 %290  ;;  %v281_v47 = vpop.permute.xlu0 %280 }
 0x177   :  { %v300_v58 = vmul.f32 %v281_v47, %v4614_v63  ;;  %v302_v10 = vmul.f32 %v291_v46, %v4632_v19 }
 0x179   :  { %3636 = vmatmul.mubr.msk.bf16.gmra.mxu0 %vm620_vm8, %v578_v45 }
 0x17a   :  { %v286_v49 = vpop.permute.xlu0 %285  ;;  %v3955_v51 = vpop.permute.xlu1 %3954  ;;  %3649 = vmatprep.mubr.msk.bf16.mxu0 %vm751_vm9, %v735_v48 }
 0x17b   :  { %v3957_v53 = vunpack.i.h.bf16 %v3955_v51  ;;  %v3956_v54 = vunpack.i.l.bf16 %v3955_v51  ;;  %v301_v14 = vmul.f32 %v286_v49, %v4635_v22 }
 0x17d   :  { %v550_v2 = vsel %vm543_vm5, %v299_v57, %v3956_v54  ;;  %v551_v4 = vsel %vm543_vm5, %v300_v58, %v3957_v53  ;;  %v4746_v53 = vld [vmem:[%s5555_s13] ss:$0 sm:$0xff] }
 0x17e   :  { %v3960_v59 = vpop.permute.xlu0 %3959  ;;  %v3965_v56 = vpop.permute.xlu1 %3964 }
 0x17f   :  { %v3962_v62 = vunpack.i.h.bf16 %v3960_v59  ;;  %v3961_v60 = vunpack.i.l.bf16 %v3960_v59  ;;  %v3967_v61 = vunpack.i.h.bf16 %v3965_v56  ;;  %v3966_v1 = vunpack.i.l.bf16 %v3965_v56 }
 0x181   :  { %v561_v5 = vsel %vm554_vm6, %v550_v2, %v3961_v60  ;;  %v562_v7 = vsel %vm554_vm6, %v551_v4, %v3962_v62  ;;  %3650 = vmatmul.mubr.msk.bf16.vlgmr.msra.gmra.mxu0 %vm751_vm9, %v736_v55 }
 0x182   :  { %v572_v3 = vsel %vm565_vm7, %v561_v5, %v3966_v1  ;;  %v573_v63 = vsel %vm565_vm7, %v562_v7, %v3967_v61  ;;  %v3975_v8 = vpop.permute.xlu1 %3974  ;;  %v3970_v9 = vpop.permute.xlu0 %3969 }
 0x183   :  { %v579_v11 = vpack.c.bf16 %v573_v63, %v572_v3  ;;  %v3972_v12 = vunpack.i.h.bf16 %v3970_v9  ;;  %v3977_v42 = vunpack.i.h.bf16 %v3975_v8  ;;  %v3976_v15 = vunpack.i.l.bf16 %v3975_v8 }
 0x184   :  { %v3971_v16 = vunpack.i.l.bf16 %v3970_v9 }
 0x185   :  { %v553_v17 = vsel %vm543_vm5, %v302_v10, %v3972_v12  ;;  %3640 = vmatmul.mubr.msk.bf16.vlgmr.msra.gmra.mxu1 %vm620_vm8, %v579_v11 }
 0x186   :  { %v552_v20 = vsel %vm543_vm5, %v301_v14, %v3971_v16  ;;  %v3980_v21 = vpop.permute.xlu0 %3979  ;;  %3643 = vmatprep.mubr.msk.bf16.mxu1 %vm4258_vm1, %v4257_v0  ;;  %3666 = vmatpush3.bf16.msra.mxu1 %v4656_v36  ;;  %v564_v50 = vsel %vm554_vm6, %v553_v17, %v3977_v42  ;;  %v3361_v36 = vld [vmem:[%s5554_s7] ss:$0 sm:$0xff] }
 0x187   :  { %v3982_v19 = vunpack.i.h.bf16 %v3980_v21  ;;  %v3981_v13 = vunpack.i.l.bf16 %v3980_v21  ;;  %3695 = vmatprep.subr.bf16.mxu1 %v4257_v0  ;;  %v563_v22 = vsel %vm554_vm6, %v552_v20, %v3976_v15 }
 0x189   :  { %v574_v18 = vsel %vm565_vm7, %v563_v22, %v3981_v13  ;;  %v575_v23 = vsel %vm565_vm7, %v564_v50, %v3982_v19  ;;  %v4761_v50 = vld [vmem:[%s5556_s14] ss:$0 sm:$0xff] }
 0x18a   :  { %v580_v24 = vpack.c.bf16 %v575_v23, %v574_v18  ;;  %v4766_v18 = vld [vmem:[%s5557_s15] ss:$0 sm:$0xff] }
 0x18d   :  { %3644 = vmatmul.mubr.msk.bf16.gmra.mxu1 %vm620_vm8, %v580_v24 }
 0x18e   :  { %3667 = vmatprep.mubr.msk.bf16.mxu1 %vm751_vm9, %v735_v48 }
 0x195   :  { %3668 = vmatmul.mubr.msk.bf16.vlgmr.msra.gmra.mxu1 %vm751_vm9, %v736_v55 }
 0x21f   :  { %v670_v25 = vpop.f32.mrf.mxu0 }
 0x220   :  { %v4733_v26 = vadd.f32 %v3361_v36, %v670_v25 }
 0x221   :  { %v3629_v27 = vpop.f32.mrf.mxu0 }
 0x223   :  { %v673_v28 = vpop.f32.mrf.mxu0 }
 0x224   :  { %v4735_v29 = vadd.f32 %v3361_v36, %v673_v28 }
 0x225   :  { %v3630_v31 = vpop.f32.mrf.mxu0 }
 0x231   :  { %v678_v32 = vpop.f32.mrf.mxu0 }
 0x232   :  { %v679_v34 = vadd.f32 %v3361_v36, %v678_v32 }
 0x233   :  { %v3633_v33 = vpop.f32.mrf.mxu0 }
 0x234   :  { %v711_v37 = vmax.f32 %v679_v34, 0.0 }
 0x235   :  { %v681_v35 = vpop.f32.mrf.mxu0 }
 0x236   :  { %v682_v40 = vadd.f32 %v3361_v36, %v681_v35  ;;  %v723_v35 = vld [vmem:[%s5595_s26 + $0x20] sm:$0xff] }
 0x237   :  { %v3634_v30 = vpop.f32.mrf.mxu0 }
 0x238   :  { %v712_v38 = vmax.f32 %v682_v40, 0.0  ;;  %v724_v40 = vld [vmem:[%s5595_s26 + $0x28] sm:$0xff]  ;;  %v725_v30 = vld [vmem:[%s5595_s26 + $0x30] sm:$0xff] }
 0x239   :  { %v686_v41 = vpop.f32.mrf.mxu0 }
 0x23a   :  { %v4737_v43 = vpack.i.bf16 %v712_v38, %v711_v37  ;;  %v687_v45 = vadd.f32 %v3361_v36, %v686_v41  ;;  %v4786_v37 = vld [vmem:[%s5558_s11] sm:$0xff]   ;;  %v737_v38 = vpack.c.bf16 %v724_v40, %v723_v35  ;;  %v726_v41 = vld [vmem:[%s5595_s26 + $0x38] sm:$0xff] }
 0x23b   :  { %v3637_v44 = vpop.f32.mrf.mxu0  ;;  %3684 = vmatpush3.bf16.msra.mxu0 %v4786_v37  ;;  %3696 = vmatpush3.bf16.msra.mxu1 %v4786_v37 }
 0x23c   :  { %v713_v49 = vmax.f32 %v687_v45, 0.0  ;;  %v727_v44 = vld [vmem:[%s5595_s26 + $0x40] sm:$0xff]  ;;  %v728_v45 = vld [vmem:[%s5595_s26 + $0x48] sm:$0xff]  ;;  %3653 = vmatprep.mubr.msk.bf16.mxu0 %vm751_vm9, %v737_v38  ;;  %3689 = vmatprep.subr.bf16.mxu0 %v4257_v0 }
 0x23d   :  { %v689_v46 = vpop.f32.mrf.mxu0  ;;  %3671 = vmatprep.mubr.msk.bf16.mxu1 %vm751_vm9, %v737_v38  ;;  %3707 = vmatprep.subr.bf16.mxu1 %v4257_v0 }
 0x23e   :  { %v690_v47 = vadd.f32 %v3361_v36, %v689_v46  ;;  %v738_v46 = vpack.c.bf16 %v726_v41, %v725_v30 }
 0x23f   :  { %v3638_v48 = vpop.f32.mrf.mxu0 }
 0x240   :  { %v714_v51 = vmax.f32 %v690_v47, 0.0  ;;  %v739_v47 = vpack.c.bf16 %v728_v45, %v727_v44  ;;  %3654 = vmatmul.mubr.msk.bf16.gmra.mxu0 %vm751_vm9, %v738_v46  ;;  %3672 = vmatmul.mubr.msk.bf16.gmra.mxu1 %vm751_vm9, %v738_v46 }
 0x241   :  { %v4739_v52 = vpop.f32.mrf.mxu0 }
 0x242   :  { %v4741_v39 = vpack.i.bf16 %v714_v51, %v713_v49  ;;  %3657 = vmatprep.mubr.msk.bf16.mxu0 %vm751_vm9, %v739_v47  ;;  %v729_v49 = vld [vmem:[%s5595_s26 + $0x50] sm:$0xff]  ;;  %v730_v51 = vld [vmem:[%s5595_s26 + $0x58] sm:$0xff]  ;;  %3675 = vmatprep.mubr.msk.bf16.mxu1 %vm751_vm9, %v739_v47 }
 0x243   :  { %v817_v54 = vpop.f32.mrf.mxu0 }
 0x244   :  { %v818_v55 = vadd.f32 %v4746_v53, %v817_v54  ;;  %v731_v54 = vld [vmem:[%s5595_s26 + $0x60] sm:$0xff] }
 0x245   :  { %v694_v57 = vpop.f32.mrf.mxu1  ;;  %v4749_v58 = vpop.f32.mrf.mxu0 }
 0x246   :  { %v3389_v59 = vmul.f32 -1.442695, %v818_v55  ;;  %v695_v60 = vadd.f32 %v3361_v36, %v694_v57  ;;  %v732_v55 = vld [vmem:[%s5595_s26 + $0x68] sm:$0xff] }
 0x247   :  { %v3641_v56 = vpop.f32.mrf.mxu1  ;;  %v820_v62 = vpop.f32.mrf.mxu0 }
 0x248   :  { %4062 = vpow2.f32 %v3389_v59  ;;  %v821_v61 = vadd.f32 %v4746_v53, %v820_v62  ;;  %v715_v7 = vmax.f32 %v695_v60, 0.0  ;;  %v740_v59 = vpack.c.bf16 %v730_v51, %v729_v49  ;;  %v733_v62 = vld [vmem:[%s5595_s26 + $0x70] sm:$0xff]  ;;  %v734_v60 = vld [vmem:[%s5595_s26 + $0x78] sm:$0xff]  ;;  %s4264_s26 = smov 112  }
 0x249   :  { %v697_v1 = vpop.f32.mrf.mxu1  ;;  %v741_v56 = vpack.c.bf16 %v732_v55, %v731_v54 }
 0x24a   :  { %v3390_v2 = vmul.f32 -1.442695, %v821_v61  ;;  %v698_v4 = vadd.f32 %v3361_v36, %v697_v1  ;;  %3658 = vmatmul.mubr.msk.bf16.gmra.mxu0 %vm751_vm9, %v740_v59  ;;  %3676 = vmatmul.mubr.msk.bf16.gmra.mxu1 %vm751_vm9, %v740_v59  ;;  %v742_v61 = vpack.c.bf16 %v734_v60, %v733_v62 }
 0x24b   :  { %v3642_v5 = vpop.f32.mrf.mxu1  ;;  %3661 = vmatprep.mubr.msk.bf16.mxu0 %vm751_vm9, %v741_v56  ;;  %3679 = vmatprep.mubr.msk.bf16.mxu1 %vm751_vm9, %v741_v56 }
 0x24c   :  { %4064 = vpow2.f32 %v3390_v2  ;;  %v716_v3 = vmax.f32 %v698_v4, 0.0 }
 0x24d   :  { %v702_v63 = vpop.f32.mrf.mxu1 }
 0x24e   :  { %v4752_v8 = vpack.i.bf16 %v716_v3, %v715_v7  ;;  %v703_v10 = vadd.f32 %v3361_v36, %v702_v63 }
 0x24f   :  { %v3645_v9 = vpop.f32.mrf.mxu1 }
 0x250   :  { %v717_v42 = vmax.f32 %v703_v10, 0.0  ;;  %v4847_v9 = vld [vmem:[%s5559_s12] sm:$0xff]  }
 0x251   :  { %v705_v11 = vpop.f32.mrf.mxu1 }
 0x252   :  { %v706_v12 = vadd.f32 %v3361_v36, %v705_v11  ;;  %3662 = vmatmul.mubr.msk.bf16.gmra.mxu0 %vm751_vm9, %v742_v61  ;;  %3680 = vmatmul.mubr.msk.bf16.gmra.mxu1 %vm751_vm9, %v742_v61 }
 0x253   :  { %v3646_v14 = vpop.f32.mrf.mxu1  ;;  %3685 = vmatprep.mubr.msk.bf16.mxu0 %vm4258_vm1, %v4257_v0  ;;  %3697 = vmatprep.mubr.msk.bf16.mxu1 %vm4258_vm1, %v4257_v0 }
 0x254   :  { %v718_v15 = vmax.f32 %v706_v12, 0.0 }
 0x255   :  { %v4063_v16 = vpop.eup %4062  ;;  %v4756_v13 = vpop.f32.mrf.mxu1 }
 0x256   :  { %v999_v17 = vadd.f32 1.0, %v4063_v16  ;;  %v4754_v20 = vpack.i.bf16 %v718_v15, %v717_v42  ;;  %v934_v51 = vadd.f32 %v4756_v13, %v4761_v50 }
 0x257   :  { %v925_v22 = vpop.f32.mrf.mxu1 }
 0x258   :  { %4066 = vrcp.f32 %v999_v17  ;;  %v926_v36 = vadd.f32 %v4761_v50, %v925_v22 }
 0x259   :  { %v4065_v21 = vpop.eup %4064  ;;  %v4768_v23 = vpop.f32.mrf.mxu1 }
 0x25a   :  { %v1000_v19 = vadd.f32 1.0, %v4065_v21  ;;  %v937_v56 = vadd.f32 %v4768_v23, %v4761_v50 }
 0x25b   :  { %v928_v27 = vpop.f32.mrf.mxu1 }
 0x25c   :  { %4068 = vrcp.f32 %v1000_v19  ;;  %v929_v32 = vadd.f32 %v4761_v50, %v928_v27 }
 0x265   :  { %v4067_v24 = vpop.eup %4066 }
 0x266   :  { %v1011_v25 = vmul.f32 %v4067_v24, %v4766_v18  ;;  %v1017_v2 = vsub.f32 1.0, %v4067_v24 }
 0x268   :  { %v1013_v28 = vadd.f32 %v1011_v25, %v926_v36  ;;  %v826_v25 = vadd.f32 %v4739_v52, %v4746_v53 }
 0x269   :  { %v4069_v31 = vpop.eup %4068 }
 0x26a   :  { %4070 = vtanh.f32 %v1013_v28  ;;  %v1012_v33 = vmul.f32 %v4069_v31, %v4766_v18  ;;  %v1018_v4 = vsub.f32 1.0, %v4069_v31 }
 0x26c   :  { %v1014_v34 = vadd.f32 %v1012_v33, %v929_v32  ;;  %v829_v32 = vadd.f32 %v4749_v58, %v4746_v53 }
 0x26e   :  { %4072 = vtanh.f32 %v1014_v34 }
 0x277   :  { %v4071_v48 = vpop.eup %4070 }
 0x278   :  { %1021 = vrot.lane.b32.xlu1 %v4071_v48, %s4261_s27 }
 0x27b   :  { %v4073_v57 = vpop.eup %4072 }
 0x27c   :  { %1023 = vrot.lane.b32.xlu0 %v4073_v57, %s4261_s27 }
 0x2ea   :  { %v1022_v1 = vpop.permute.xlu1 %1021 }
 0x2eb   :  { %v4837_v7 = vmul.f32 %v1022_v1, %v1017_v2 }
 0x2ee   :  { %v1024_v5 = vpop.permute.xlu0 %1023 }
 0x2ef   :  { %v4839_v3 = vmul.f32 %v1024_v5, %v1018_v4 }
 0x2f1   :  { %v1029_v63 = vpack.c.bf16 %v4839_v3, %v4837_v7 }
 0x2f3   :  { %1031 = vrot.lane.b32.xlu1 %v1029_v63, %s4264_s26 }
 0x300   :  { %v4863_v11 = vpop.f32.mrf.mxu0 }
 0x302   :  { %v4865_v12 = vpop.f32.mrf.mxu0 }
 0x304   :  { %v4867_v14 = vpop.f32.mrf.mxu0 }
 0x306   :  { %v4869_v42 = vpop.f32.mrf.mxu0 }
 0x30a   :  { %v4871_v15 = vpop.f32.mrf.mxu0 }
 0x30c   :  { %v4873_v16 = vpop.f32.mrf.mxu0 }
 0x30e   :  { %v4875_v17 = vpop.f32.mrf.mxu0 }
 0x310   :  { %v4877_v21 = vpop.f32.mrf.mxu0 }
 0x312   :  { %v4879_v19 = vpop.f32.mrf.mxu0 }
 0x314   :  { %v4881_v22 = vpop.f32.mrf.mxu0 }
 0x316   :  { %v4883_v24 = vpop.f32.mrf.mxu0 }
 0x318   :  { %v4885_v36 = vpop.f32.mrf.mxu0 }
 0x365   :  { %v4849_v10 = vpop.permute.xlu1 %1031 }
 0x366   :  { %3686 = vmatmul.mubr.msk.bf16.vlgmr.msra.gmra.mxu0 %vm543_vm5, %v4849_v10 }
 0x367   :  { %3690 = vmatpush3.bf16.msra.mxu0 %v4847_v9  ;;  %3691 = vmatprep.mubr.msk.bf16.mxu0 %vm4258_vm1, %v4257_v0 }
 0x368   :  { %3701 = vmatprep.subr.bf16.mxu0 %v4257_v0 }
 0x36e   :  { %3692 = vmatmul.mubr.msk.bf16.vlgmr.msra.gmra.mxu0 %vm543_vm5, %v4849_v10 }
 0x36f   :  { %3702 = vmatpush3.bf16.msra.mxu0 %v4847_v9  ;;  %3703 = vmatprep.mubr.msk.bf16.mxu0 %vm4258_vm1, %v4257_v0 }
 0x370   :  { %3713 = vmatprep.subr.bf16.mxu0 %v4257_v0 }
 0x426   :  { %v1076_v27 = vpop.f32.mrf.mxu0 }
 0x427   :  { %v1130_v28 = vadd.f32 %v1076_v27, %v826_v25 }
 0x428   :  { %v3687_v31 = vpop.f32.mrf.mxu0 }
 0x429   :  { %v3396_v33 = vmul.f32 -1.442695, %v1130_v28 }
 0x42a   :  { %v1079_v34 = vpop.f32.mrf.mxu0 }
 0x42b   :  { %4074 = vpow2.f32 %v3396_v33  ;;  %v1131_v35 = vadd.f32 %v1079_v34, %v829_v32 }
 0x42c   :  { %v3688_v40 = vpop.f32.mrf.mxu0 }
 0x42d   :  { %v3397_v30 = vmul.f32 -1.442695, %v1131_v35 }
 0x42e   :  { %v1123_v38 = vpop.f32.mrf.mxu0 }
 0x42f   :  { %4076 = vpow2.f32 %v3397_v30  ;;  %v1124_v49 = vadd.f32 %v4766_v18, %v1123_v38 }
 0x430   :  { %v3693_v41 = vpop.f32.mrf.mxu0 }
 0x432   :  { %v1126_v44 = vpop.f32.mrf.mxu0 }
 0x433   :  { %v1127_v57 = vadd.f32 %v4766_v18, %v1126_v44 }
 0x434   :  { %v3694_v45 = vpop.f32.mrf.mxu0 }
 0x438   :  { %v4075_v46 = vpop.eup %4074 }
 0x439   :  { %v1138_v47 = vadd.f32 1.0, %v4075_v46 }
 0x43b   :  { %4078 = vrcp.f32 %v1138_v47 }
 0x43c   :  { %v4077_v52 = vpop.eup %4076 }
 0x43d   :  { %v1139_v48 = vadd.f32 1.0, %v4077_v52  ;;  %v834_v52 = vadd.f32 %v4746_v53, %v4865_v12 }
 0x43f   :  { %4080 = vrcp.f32 %v1139_v48 }
 0x448   :  { %v4079_v58 = vpop.eup %4078 }
 0x449   :  { %v1144_v54 = vmul.f32 %v4079_v58, %v1124_v49  ;;  %v1150_v13 = vsub.f32 1.0, %v4079_v58  ;;  %v1162_v25 = vmul.f32 %v4079_v58, %v4837_v7  ;;  %v4922_v7 = vpop.f32.mrf.mxu1 }
 0x44b   :  { %v1146_v55 = vadd.f32 %v1144_v54, %v934_v51 }
 0x44c   :  { %v4081_v59 = vpop.eup %4080 }
 0x44d   :  { %4082 = vtanh.f32 %v1146_v55  ;;  %v1145_v62 = vmul.f32 %v4081_v59, %v1127_v57  ;;  %v1151_v5 = vsub.f32 1.0, %v4081_v59  ;;  %v1163_v27 = vmul.f32 %v4081_v59, %v4839_v3  ;;  %v941_v3 = vpop.f32.mrf.mxu1 }
 0x44e   :  { %v837_v55 = vadd.f32 %v4746_v53, %v4869_v42  ;;  %v942_v42 = vadd.f32 %v4761_v50, %v941_v3 }
 0x44f   :  { %v1147_v60 = vadd.f32 %v1145_v62, %v937_v56  ;;  %v4924_v34 = vpop.f32.mrf.mxu1 }
 0x451   :  { %4084 = vtanh.f32 %v1147_v60  ;;  %v944_v35 = vpop.f32.mrf.mxu1 }
 0x453   :  { %v4926_v40 = vpop.f32.mrf.mxu1 }
 0x455   :  { %v4928_v30 = vpop.f32.mrf.mxu1 }
 0x457   :  { %v4930_v38 = vpop.f32.mrf.mxu1 }
 0x459   :  { %v4932_v41 = vpop.f32.mrf.mxu1 }
 0x45a   :  { %v4083_v61 = vpop.eup %4082 }
 0x45b   :  { %1154 = vrot.lane.b32.xlu0 %v4083_v61, %s4261_s27  ;;  %v4934_v44 = vpop.f32.mrf.mxu1 }
 0x45d   :  { %v4936_v45 = vpop.f32.mrf.mxu1 }
 0x45e   :  { %v4085_v1 = vpop.eup %4084 }
 0x45f   :  { %1156 = vrot.lane.b32.xlu1 %v4085_v1, %s4261_s27  ;;  %v4938_v46 = vpop.f32.mrf.mxu1 }
 0x461   :  { %v4940_v47 = vpop.f32.mrf.mxu1 }
 0x4cd   :  { %v1155_v2 = vpop.permute.xlu0 %1154 }
 0x4ce   :  { %v1160_v4 = vmul.f32 %v1155_v2, %v1150_v13 }
 0x4d0   :  { %v4901_v28 = vadd.f32 %v1162_v25, %v1160_v4 }
 0x4d1   :  { %v1157_v63 = vpop.permute.xlu1 %1156 }
 0x4d2   :  { %v1161_v23 = vmul.f32 %v1157_v63, %v1151_v5 }
 0x4d4   :  { %v4903_v31 = vadd.f32 %v1163_v27, %v1161_v23 }
 0x4d6   :  { %v1166_v32 = vpack.c.bf16 %v4903_v31, %v4901_v28 }
 0x4d8   :  { %1168 = vrot.lane.b32.xlu0 %v1166_v32, %s4264_s26 }
 0x54a   :  { %v4908_v33 = vpop.permute.xlu0 %1168 }
 0x54b   :  { %3698 = vmatmul.mubr.msk.bf16.vlgmr.msra.gmra.mxu1 %vm543_vm5, %v4908_v33  ;;  %3704 = vmatmul.mubr.msk.bf16.vlgmr.msra.gmra.mxu0 %vm543_vm5, %v4908_v33 }
 0x54c   :  { %3708 = vmatpush3.bf16.msra.mxu1 %v4786_v37  ;;  %3714 = vmatpush3.bf16.msra.mxu0 %v4847_v9 }
 0x54d   :  { %3709 = vmatprep.mubr.msk.bf16.mxu1 %vm4258_vm1, %v4257_v0  ;;  %3715 = vmatprep.mubr.msk.bf16.mxu0 %vm4258_vm1, %v4257_v0 }
 0x54e   :  { %3719 = vmatprep.subr.bf16.mxu1 %v4257_v0  ;;  %3725 = vmatprep.subr.bf16.mxu0 %v4257_v0 }
 0x60b   :  { %v1207_v48 = vpop.f32.mrf.mxu1  ;;  %v1248_v49 = vpop.f32.mrf.mxu0 }
 0x60c   :  { %v1255_v58 = vadd.f32 %v1207_v48, %v834_v52  ;;  %v1249_v5 = vadd.f32 %v4766_v18, %v1248_v49  ;;  %v945_v52 = vadd.f32 %v4761_v50, %v944_v35 }
 0x60d   :  { %v3699_v51 = vpop.f32.mrf.mxu1  ;;  %v3705_v54 = vpop.f32.mrf.mxu0 }
 0x60e   :  { %v3400_v57 = vmul.f32 -1.442695, %v1255_v58 }
 0x60f   :  { %v1210_v59 = vpop.f32.mrf.mxu1  ;;  %v1251_v56 = vpop.f32.mrf.mxu0 }
 0x610   :  { %4086 = vpow2.f32 %v3400_v57  ;;  %v1256_v62 = vadd.f32 %v1210_v59, %v837_v55  ;;  %v1252_v23 = vadd.f32 %v4766_v18, %v1251_v56 }
 0x611   :  { %v3700_v60 = vpop.f32.mrf.mxu1  ;;  %v3706_v61 = vpop.f32.mrf.mxu0 }
 0x612   :  { %v3401_v1 = vmul.f32 -1.442695, %v1256_v62 }
 0x614   :  { %4088 = vpow2.f32 %v3401_v1 }
 0x61d   :  { %v4087_v2 = vpop.eup %4086 }
 0x61e   :  { %v1263_v13 = vadd.f32 1.0, %v4087_v2 }
 0x620   :  { %4090 = vrcp.f32 %v1263_v13 }
 0x621   :  { %v4089_v12 = vpop.eup %4088 }
 0x622   :  { %v1264_v4 = vadd.f32 1.0, %v4089_v12 }
 0x624   :  { %4092 = vrcp.f32 %v1264_v4 }
 0x62d   :  { %v4091_v63 = vpop.eup %4090 }
 0x62e   :  { %v1269_v25 = vmul.f32 %v4091_v63, %v1249_v5  ;;  %v1275_v55 = vsub.f32 1.0, %v4091_v63  ;;  %v1287_v56 = vmul.f32 %v4091_v63, %v4901_v28  ;;  %v842_v28 = vadd.f32 %v4863_v11, %v4746_v53 }
 0x62f   :  { %v845_v63 = vadd.f32 %v4867_v14, %v4746_v53  ;;  %v950_v14 = vadd.f32 %v4922_v7, %v4761_v50 }
 0x630   :  { %v1271_v27 = vadd.f32 %v1269_v25, %v942_v42 }
 0x631   :  { %v4093_v32 = vpop.eup %4092 }
 0x632   :  { %4094 = vtanh.f32 %v1271_v27  ;;  %v1270_v48 = vmul.f32 %v4093_v32, %v1252_v23  ;;  %v1276_v57 = vsub.f32 1.0, %v4093_v32  ;;  %v1288_v62 = vmul.f32 %v4093_v32, %v4903_v31 }
 0x634   :  { %v1272_v58 = vadd.f32 %v1270_v48, %v945_v52 }
 0x636   :  { %4096 = vtanh.f32 %v1272_v58 }
 0x63f   :  { %v4095_v51 = vpop.eup %4094 }
 0x640   :  { %1279 = vrot.lane.b32.xlu1 %v4095_v51, %s4261_s27 }
 0x643   :  { %v4097_v54 = vpop.eup %4096 }
 0x644   :  { %1281 = vrot.lane.b32.xlu0 %v4097_v54, %s4261_s27 }
 0x6b2   :  { %v1280_v49 = vpop.permute.xlu1 %1279 }
 0x6b3   :  { %v1285_v3 = vmul.f32 %v1280_v49, %v1275_v55 }
 0x6b5   :  { %v1289_v60 = vadd.f32 %v1287_v56, %v1285_v3 }
 0x6b6   :  { %v1282_v59 = vpop.permute.xlu0 %1281 }
 0x6b7   :  { %v1286_v35 = vmul.f32 %v1282_v59, %v1276_v57 }
 0x6b9   :  { %v1290_v61 = vadd.f32 %v1288_v62, %v1286_v35  ;;  %v953_v62 = vadd.f32 %v4924_v34, %v4761_v50 }
 0x6bb   :  { %v1291_v1 = vpack.c.bf16 %v1290_v61, %v1289_v60 }
 0x6bd   :  { %1293 = vrot.lane.b32.xlu1 %v1291_v1, %s4264_s26 }
 0x72f   :  { %v4955_v2 = vpop.permute.xlu1 %1293 }
 0x730   :  { %3710 = vmatmul.mubr.msk.bf16.vlgmr.msra.gmra.mxu1 %vm543_vm5, %v4955_v2  ;;  %3716 = vmatmul.mubr.msk.bf16.vlgmr.msra.gmra.mxu0 %vm543_vm5, %v4955_v2 }
 0x731   :  { %3720 = vmatpush3.bf16.msra.mxu1 %v4786_v37  ;;  %3726 = vmatpush3.bf16.msra.mxu0 %v4847_v9 }
 0x732   :  { %3721 = vmatprep.mubr.msk.bf16.mxu1 %vm4258_vm1, %v4257_v0  ;;  %3727 = vmatprep.mubr.msk.bf16.mxu0 %vm4258_vm1, %v4257_v0 }
 0x733   :  { %3731 = vmatprep.subr.bf16.mxu1 %v4257_v0  ;;  %3737 = vmatprep.subr.bf16.mxu0 %v4257_v0 }
 0x7f0   :  { %v1332_v31 = vpop.f32.mrf.mxu1  ;;  %v1373_v13 = vpop.f32.mrf.mxu0 }
 0x7f1   :  { %v1380_v12 = vadd.f32 %v1332_v31, %v842_v28  ;;  %v1374_v49 = vadd.f32 %v4766_v18, %v1373_v13 }
 0x7f2   :  { %v3711_v4 = vpop.f32.mrf.mxu1  ;;  %v3717_v5 = vpop.f32.mrf.mxu0 }
 0x7f3   :  { %v3404_v42 = vmul.f32 -1.442695, %v1380_v12 }
 0x7f4   :  { %v1335_v25 = vpop.f32.mrf.mxu1  ;;  %v1376_v27 = vpop.f32.mrf.mxu0 }
 0x7f5   :  { %4098 = vpow2.f32 %v3404_v42  ;;  %v1381_v23 = vadd.f32 %v1335_v25, %v845_v63  ;;  %v1377_v59 = vadd.f32 %v4766_v18, %v1376_v27 }
 0x7f6   :  { %v3712_v32 = vpop.f32.mrf.mxu1  ;;  %v3718_v52 = vpop.f32.mrf.mxu0 }
 0x7f7   :  { %v3405_v48 = vmul.f32 -1.442695, %v1381_v23 }
 0x7f9   :  { %4100 = vpow2.f32 %v3405_v48 }
 0x802   :  { %v4099_v58 = vpop.eup %4098 }
 0x803   :  { %v1388_v51 = vadd.f32 1.0, %v4099_v58 }
 0x805   :  { %4102 = vrcp.f32 %v1388_v51 }
 0x806   :  { %v4101_v11 = vpop.eup %4100 }
 0x807   :  { %v1389_v54 = vadd.f32 1.0, %v4101_v11  ;;  %v853_v11 = vadd.f32 %v4746_v53, %v4877_v21  ;;  %v958_v21 = vadd.f32 %v4761_v50, %v4928_v30 }
 0x809   :  { %4104 = vrcp.f32 %v1389_v54 }
 0x812   :  { %v4103_v55 = vpop.eup %4102 }
 0x813   :  { %v1394_v3 = vmul.f32 %v4103_v55, %v1374_v49  ;;  %v1400_v7 = vsub.f32 1.0, %v4103_v55  ;;  %v1412_v63 = vmul.f32 %v4103_v55, %v1289_v60  ;;  %v850_v60 = vadd.f32 %v4746_v53, %v4873_v16 }
 0x815   :  { %v1396_v57 = vadd.f32 %v1394_v3, %v950_v14 }
 0x816   :  { %v4105_v56 = vpop.eup %4104 }
 0x817   :  { %4106 = vtanh.f32 %v1396_v57  ;;  %v1395_v35 = vmul.f32 %v4105_v56, %v1377_v59  ;;  %v1401_v4 = vsub.f32 1.0, %v4105_v56  ;;  %v1413_v42 = vmul.f32 %v4105_v56, %v1290_v61 }
 0x819   :  { %v1397_v1 = vadd.f32 %v1395_v35, %v953_v62 }
 0x81b   :  { %4108 = vtanh.f32 %v1397_v1 }
 0x824   :  { %v4107_v28 = vpop.eup %4106 }
 0x825   :  { %1404 = vrot.lane.b32.xlu0 %v4107_v28, %s4261_s27 }
 0x828   :  { %v4109_v31 = vpop.eup %4108 }
 0x829   :  { %1406 = vrot.lane.b32.xlu1 %v4109_v31, %s4261_s27 }
 0x897   :  { %v1405_v13 = vpop.permute.xlu0 %1404 }
 0x898   :  { %v1410_v12 = vmul.f32 %v1405_v13, %v1400_v7 }
 0x89a   :  { %v1414_v27 = vadd.f32 %v1412_v63, %v1410_v12 }
 0x89b   :  { %v1407_v5 = vpop.permute.xlu1 %1406 }
 0x89c   :  { %v1411_v25 = vmul.f32 %v1407_v5, %v1401_v4  ;;  %v961_v4 = vadd.f32 %v4761_v50, %v4932_v41 }
 0x89e   :  { %v1415_v34 = vadd.f32 %v1413_v42, %v1411_v25 }
 0x8a0   :  { %v1416_v23 = vpack.c.bf16 %v1415_v34, %v1414_v27 }
 0x8a2   :  { %1418 = vrot.lane.b32.xlu0 %v1416_v23, %s4264_s26 }
 0x914   :  { %v4982_v32 = vpop.permute.xlu0 %1418 }
 0x915   :  { %3722 = vmatmul.mubr.msk.bf16.vlgmr.msra.gmra.mxu1 %vm543_vm5, %v4982_v32  ;;  %3728 = vmatmul.mubr.msk.bf16.vlgmr.msra.gmra.mxu0 %vm543_vm5, %v4982_v32 }
 0x916   :  { %3732 = vmatpush3.bf16.msra.mxu1 %v4786_v37  ;;  %3738 = vmatpush3.bf16.msra.mxu0 %v4847_v9 }
 0x917   :  { %3733 = vmatprep.mubr.msk.bf16.mxu1 %vm4258_vm1, %v4257_v0  ;;  %3739 = vmatprep.mubr.msk.bf16.mxu0 %vm4258_vm1, %v4257_v0 }
 0x918   :  { %3743 = vmatprep.subr.bf16.mxu1 %v4257_v0  ;;  %3749 = vmatprep.subr.bf16.mxu0 %v4257_v0 }
 0x9d5   :  { %v1457_v61 = vpop.f32.mrf.mxu1  ;;  %v1498_v52 = vpop.f32.mrf.mxu0 }
 0x9d6   :  { %v1505_v48 = vadd.f32 %v1457_v61, %v850_v60  ;;  %v1499_v1 = vadd.f32 %v4766_v18, %v1498_v52 }
 0x9d7   :  { %v3723_v58 = vpop.f32.mrf.mxu1  ;;  %v3729_v51 = vpop.f32.mrf.mxu0 }
 0x9d8   :  { %v3408_v54 = vmul.f32 -1.442695, %v1505_v48 }
 0x9d9   :  { %v1460_v49 = vpop.f32.mrf.mxu1  ;;  %v1501_v55 = vpop.f32.mrf.mxu0 }
 0x9da   :  { %4110 = vpow2.f32 %v3408_v54  ;;  %v1506_v14 = vadd.f32 %v1460_v49, %v853_v11  ;;  %v1502_v7 = vadd.f32 %v4766_v18, %v1501_v55 }
 0x9db   :  { %v3724_v3 = vpop.f32.mrf.mxu1  ;;  %v3730_v57 = vpop.f32.mrf.mxu0 }
 0x9dc   :  { %v3409_v59 = vmul.f32 -1.442695, %v1506_v14 }
 0x9de   :  { %4112 = vpow2.f32 %v3409_v59  ;;  %v861_v59 = vadd.f32 %v4875_v17, %v4746_v53  ;;  %v966_v17 = vadd.f32 %v4926_v40, %v4761_v50 }
 0x9e7   :  { %v4111_v56 = vpop.eup %4110 }
 0x9e8   :  { %v1513_v62 = vadd.f32 1.0, %v4111_v56 }
 0x9ea   :  { %4114 = vrcp.f32 %v1513_v62 }
 0x9eb   :  { %v4113_v16 = vpop.eup %4112 }
 0x9ec   :  { %v1514_v35 = vadd.f32 1.0, %v4113_v16 }
 0x9ee   :  { %4116 = vrcp.f32 %v1514_v35 }
 0x9f7   :  { %v4115_v28 = vpop.eup %4114 }
 0x9f8   :  { %v1519_v31 = vmul.f32 %v4115_v28, %v1499_v1  ;;  %v1525_v30 = vsub.f32 1.0, %v4115_v28  ;;  %v1537_v48 = vmul.f32 %v4115_v28, %v1414_v27  ;;  %v858_v27 = vadd.f32 %v4871_v15, %v4746_v53 }
 0x9fa   :  { %v1521_v13 = vadd.f32 %v1519_v31, %v958_v21 }
 0x9fb   :  { %v4117_v12 = vpop.eup %4116 }
 0x9fc   :  { %4118 = vtanh.f32 %v1521_v13  ;;  %v1520_v5 = vmul.f32 %v4117_v12, %v1502_v7  ;;  %v1526_v61 = vsub.f32 1.0, %v4117_v12  ;;  %v1538_v58 = vmul.f32 %v4117_v12, %v1415_v34 }
 0x9fe   :  { %v1522_v63 = vadd.f32 %v1520_v5, %v961_v4 }
 0xa00   :  { %4120 = vtanh.f32 %v1522_v63 }
 0xa09   :  { %v4119_v42 = vpop.eup %4118 }
 0xa0a   :  { %1529 = vrot.lane.b32.xlu1 %v4119_v42, %s4261_s27 }
 0xa0d   :  { %v4121_v25 = vpop.eup %4120 }
 0xa0e   :  { %1531 = vrot.lane.b32.xlu0 %v4121_v25, %s4261_s27 }
 0xa7c   :  { %v1530_v23 = vpop.permute.xlu1 %1529 }
 0xa7d   :  { %v1535_v60 = vmul.f32 %v1530_v23, %v1525_v30  ;;  %v969_v23 = vadd.f32 %v4930_v38, %v4761_v50 }
 0xa7f   :  { %v1539_v11 = vadd.f32 %v1537_v48, %v1535_v60 }
 0xa80   :  { %v1532_v52 = vpop.permute.xlu0 %1531 }
 0xa81   :  { %v1536_v51 = vmul.f32 %v1532_v52, %v1526_v61 }
 0xa83   :  { %v1540_v41 = vadd.f32 %v1538_v58, %v1536_v51 }
 0xa85   :  { %v1541_v54 = vpack.c.bf16 %v1540_v41, %v1539_v11 }
 0xa87   :  { %1543 = vrot.lane.b32.xlu1 %v1541_v54, %s4264_s26 }
 0xaf9   :  { %v5009_v49 = vpop.permute.xlu1 %1543 }
 0xafa   :  { %3734 = vmatmul.mubr.msk.bf16.vlgmr.msra.gmra.mxu1 %vm543_vm5, %v5009_v49  ;;  %3740 = vmatmul.mubr.msk.bf16.vlgmr.msra.gmra.mxu0 %vm543_vm5, %v5009_v49 }
 0xafb   :  { %3744 = vmatpush3.bf16.msra.mxu1 %v4786_v37  ;;  %3750 = vmatpush3.bf16.msra.mxu0 %v4847_v9 }
 0xafc   :  { %3745 = vmatprep.mubr.msk.bf16.mxu1 %vm4258_vm1, %v4257_v0  ;;  %3751 = vmatprep.mubr.msk.bf16.mxu0 %vm4258_vm1, %v4257_v0 }
 0xafd   :  { %3755 = vmatprep.subr.bf16.mxu1 %v4257_v0  ;;  %3761 = vmatprep.subr.bf16.mxu0 %v4257_v0 }
 0xbba   :  { %v1582_v34 = vpop.f32.mrf.mxu1  ;;  %v1623_v55 = vpop.f32.mrf.mxu0 }
 0xbbb   :  { %v1630_v14 = vadd.f32 %v1582_v34, %v858_v27  ;;  %v1624_v12 = vadd.f32 %v4766_v18, %v1623_v55 }
 0xbbc   :  { %v3735_v3 = vpop.f32.mrf.mxu1  ;;  %v3741_v57 = vpop.f32.mrf.mxu0 }
 0xbbd   :  { %v3412_v56 = vmul.f32 -1.442695, %v1630_v14 }
 0xbbe   :  { %v1585_v62 = vpop.f32.mrf.mxu1  ;;  %v1626_v16 = vpop.f32.mrf.mxu0 }
 0xbbf   :  { %4122 = vpow2.f32 %v3412_v56  ;;  %v1631_v35 = vadd.f32 %v1585_v62, %v861_v59  ;;  %v1627_v42 = vadd.f32 %v4766_v18, %v1626_v16 }
 0xbc0   :  { %v3736_v1 = vpop.f32.mrf.mxu1  ;;  %v3742_v28 = vpop.f32.mrf.mxu0 }
 0xbc1   :  { %v3413_v21 = vmul.f32 -1.442695, %v1631_v35  ;;  %v869_v35 = vadd.f32 %v4746_v53, %v4885_v36 }
 0xbc3   :  { %4124 = vpow2.f32 %v3413_v21 }
 0xbcc   :  { %v4123_v31 = vpop.eup %4122 }
 0xbcd   :  { %v1638_v13 = vadd.f32 1.0, %v4123_v31 }
 0xbcf   :  { %4126 = vrcp.f32 %v1638_v13 }
 0xbd0   :  { %v4125_v15 = vpop.eup %4124 }
 0xbd1   :  { %v1639_v7 = vadd.f32 1.0, %v4125_v15 }
 0xbd3   :  { %4128 = vrcp.f32 %v1639_v7 }
 0xbdc   :  { %v4127_v4 = vpop.eup %4126 }
 0xbdd   :  { %v1644_v5 = vmul.f32 %v4127_v4, %v1624_v12  ;;  %v1650_v40 = vsub.f32 1.0, %v4127_v4  ;;  %v1662_v27 = vmul.f32 %v4127_v4, %v1539_v11  ;;  %v866_v11 = vadd.f32 %v4746_v53, %v4881_v22 }
 0xbde   :  { %v974_v53 = vadd.f32 %v4761_v50, %v4936_v45 }
 0xbdf   :  { %v1646_v63 = vadd.f32 %v1644_v5, %v966_v17 }
 0xbe0   :  { %v4129_v25 = vpop.eup %4128 }
 0xbe1   :  { %4130 = vtanh.f32 %v1646_v63  ;;  %v1645_v30 = vmul.f32 %v4129_v25, %v1627_v42  ;;  %v1651_v51 = vsub.f32 1.0, %v4129_v25  ;;  %v1663_v34 = vmul.f32 %v4129_v25, %v1540_v41 }
 0xbe2   :  { %v977_v25 = vadd.f32 %v4761_v50, %v4940_v47  ;;  %v4046_v50 = vld [vmem:[%s5561_s17] sm:$0xff]  }
 0xbe3   :  { %v1647_v60 = vadd.f32 %v1645_v30, %v969_v23 }
 0xbe5   :  { %4132 = vtanh.f32 %v1647_v60  ;;  %v4045_v60 = vld [vmem:[%s5560_s16] sm:$0xff]  }
 0xbee   :  { %v4131_v61 = vpop.eup %4130 }
 0xbef   :  { %1654 = vrot.lane.b32.xlu0 %v4131_v61, %s4261_s27 }
 0xbf2   :  { %v4133_v52 = vpop.eup %4132 }
 0xbf3   :  { %1656 = vrot.lane.b32.xlu1 %v4133_v52, %s4261_s27 }
 0xc61   :  { %v1655_v48 = vpop.permute.xlu0 %1654 }
 0xc62   :  { %v1660_v58 = vmul.f32 %v1655_v48, %v1650_v40 }
 0xc64   :  { %v1664_v14 = vadd.f32 %v1662_v27, %v1660_v58 }
 0xc65   :  { %v1657_v54 = vpop.permute.xlu1 %1656 }
 0xc66   :  { %v1661_v55 = vmul.f32 %v1657_v54, %v1651_v51 }
 0xc68   :  { %v1665_v38 = vadd.f32 %v1663_v34, %v1661_v55 }
 0xc6a   :  { %v1666_v3 = vpack.c.bf16 %v1665_v38, %v1664_v14 }
 0xc6c   :  { %1668 = vrot.lane.b32.xlu0 %v1666_v3, %s4264_s26 }
 0xcde   :  { %v5036_v57 = vpop.permute.xlu0 %1668 }
 0xcdf   :  { %3746 = vmatmul.mubr.msk.bf16.vlgmr.msra.gmra.mxu1 %vm543_vm5, %v5036_v57  ;;  %3752 = vmatmul.mubr.msk.bf16.vlgmr.msra.gmra.mxu0 %vm543_vm5, %v5036_v57 }
 0xce0   :  { %3756 = vmatpush3.bf16.msra.mxu1 %v4786_v37  ;;  %3762 = vmatpush3.bf16.msra.mxu0 %v4847_v9 }
 0xce1   :  { %3757 = vmatprep.mubr.msk.bf16.mxu1 %vm4258_vm1, %v4257_v0  ;;  %3763 = vmatprep.mubr.msk.bf16.mxu0 %vm4258_vm1, %v4257_v0 }
 0xce2   :  { %3767 = vmatprep.subr.bf16.mxu1 %v4045_v60  ;;  %3785 = vmatprep.subr.bf16.mxu0 %v4046_v50 }
 0xd9f   :  { %v1707_v41 = vpop.f32.mrf.mxu1  ;;  %v1748_v59 = vpop.f32.mrf.mxu0 }
 0xda0   :  { %v1755_v56 = vadd.f32 %v1707_v41, %v866_v11  ;;  %v1749_v4 = vadd.f32 %v4766_v18, %v1748_v59 }
 0xda1   :  { %v3747_v62 = vpop.f32.mrf.mxu1  ;;  %v3753_v16 = vpop.f32.mrf.mxu0 }
 0xda2   :  { %v3416_v37 = vmul.f32 -1.442695, %v1755_v56 }
 0xda3   :  { %v1710_v1 = vpop.f32.mrf.mxu1  ;;  %v1751_v9 = vpop.f32.mrf.mxu0 }
 0xda4   :  { %4134 = vpow2.f32 %v3416_v37  ;;  %v1756_v28 = vadd.f32 %v1710_v1, %v869_v35  ;;  %v1752_v63 = vadd.f32 %v4766_v18, %v1751_v9 }
 0xda5   :  { %v3748_v21 = vpop.f32.mrf.mxu1  ;;  %v3754_v31 = vpop.f32.mrf.mxu0 }
 0xda6   :  { %v3417_v13 = vmul.f32 -1.442695, %v1756_v28 }
 0xda8   :  { %4136 = vpow2.f32 %v3417_v13 }
 0xdb1   :  { %v4135_v15 = vpop.eup %4134 }
 0xdb2   :  { %v1763_v7 = vadd.f32 1.0, %v4135_v15 }
 0xdb4   :  { %4138 = vrcp.f32 %v1763_v7 }
 0xdb5   :  { %v4137_v22 = vpop.eup %4136 }
 0xdb6   :  { %v1764_v12 = vadd.f32 1.0, %v4137_v22 }
 0xdb8   :  { %4140 = vrcp.f32 %v1764_v12 }
 0xdc1   :  { %v4139_v17 = vpop.eup %4138 }
 0xdc2   :  { %v1769_v36 = vmul.f32 %v4139_v17, %v1749_v4  ;;  %v1775_v52 = vsub.f32 1.0, %v4139_v17  ;;  %v1787_v58 = vmul.f32 %v4139_v17, %v1664_v14 }
 0xdc4   :  { %v1771_v5 = vadd.f32 %v1769_v36, %v974_v53  ;;  %v4255_v36 = vld [vmem:[%s5557_s15] ss:$0 sm:$0xff] }
 0xdc5   :  { %v4141_v42 = vpop.eup %4140 }
 0xdc6   :  { %4142 = vtanh.f32 %v1771_v5  ;;  %v1770_v23 = vmul.f32 %v4141_v42, %v1752_v63  ;;  %v1776_v48 = vsub.f32 1.0, %v4141_v42  ;;  %v1788_v51 = vmul.f32 %v4141_v42, %v1665_v38 }
 0xdc8   :  { %v1772_v30 = vadd.f32 %v1770_v23, %v977_v25  ;;  %v4256_v23 = vld [vmem:[%s5556_s14] ss:$0 sm:$0xff] }
 0xdca   :  { %4144 = vtanh.f32 %v1772_v30  ;;  %v982_v30 = vadd.f32 %v4256_v23, %v4934_v44 }
 0xdd3   :  { %v4143_v61 = vpop.eup %4142 }
 0xdd4   :  { %1779 = vrot.lane.b32.xlu1 %v4143_v61, %s4261_s27 }
 0xdd7   :  { %v4145_v45 = vpop.eup %4144 }
 0xdd8   :  { %1781 = vrot.lane.b32.xlu0 %v4145_v45, %s4261_s27 }
 0xe46   :  { %v1780_v18 = vpop.permute.xlu1 %1779 }
 0xe47   :  { %v1785_v47 = vmul.f32 %v1780_v18, %v1775_v52 }
 0xe49   :  { %v5066_v27 = vadd.f32 %v1787_v58, %v1785_v47 }
 0xe4a   :  { %v1782_v40 = vpop.permute.xlu0 %1781 }
 0xe4b   :  { %v1786_v54 = vmul.f32 %v1782_v40, %v1776_v48  ;;  %v5132_v40 = vld [vmem:[%s5563_s22] ss:$0 sm:$0xff] }
 0xe4d   :  { %v5068_v34 = vadd.f32 %v1788_v51, %v1786_v54  ;;  %v5139_v51 = vld [vmem:[%s5564_s21] ss:$0 sm:$0xff] }
 0xe4f   :  { %v1791_v55 = vpack.c.bf16 %v5068_v34, %v5066_v27 }
 0xe51   :  { %1793 = vrot.lane.b32.xlu1 %v1791_v55, %s4264_s26 }
 0xec3   :  { %v1794_v3 = vpop.permute.xlu1 %1793 }
 0xec4   :  { %3758 = vmatmul.mubr.msk.bf16.vlgmr.msra.gmra.mxu1 %vm543_vm5, %v1794_v3  ;;  %3764 = vmatmul.mubr.msk.bf16.vlgmr.msra.gmra.mxu0 %vm543_vm5, %v1794_v3 }
 0xec5   :  { %3768 = vmatpush3.bf16.msra.mxu1 %v4045_v60  ;;  %3769 = vmatprep.mubr.msk.bf16.mxu1 %vm543_vm5, %v4849_v10 }
 0xec6   :  { %3787 = vmatprep.mubr.msk.bf16.mxu0 %vm543_vm5, %v4849_v10  ;;  %3786 = vmatpush3.bf16.msra.mxu0 %v4046_v50  ;;  %v4254_v10 = vld [vmem:[%s5555_s13] ss:$0 sm:$0xff]  ;;  %v985_v50 = vadd.f32 %v4256_v23, %v4938_v46 }
 0xec7   :  { %3803 = vmatprep.subr.bf16.mxu1 %v4257_v0  ;;  %3809 = vmatprep.subr.bf16.mxu0 %v4257_v0  ;;  %v877_v11 = vadd.f32 %v4254_v10, %v4883_v24 }
 0xecc   :  { %3770 = vmatmul.mubr.msk.bf16.vlgmr.msra.gmra.mxu1 %vm543_vm5, %v4908_v33  ;;  %3788 = vmatmul.mubr.msk.bf16.vlgmr.msra.gmra.mxu0 %vm543_vm5, %v4908_v33  ;;  %v874_v33 = vadd.f32 %v4254_v10, %v4879_v19  ;;  %v5113_v19 = vld [vmem:[%s5562_s20] ss:$0 sm:$0xff] }
 0xecd   :  { %3773 = vmatprep.mubr.msk.bf16.mxu1 %vm543_vm5, %v4955_v2  ;;  %3791 = vmatprep.mubr.msk.bf16.mxu0 %vm543_vm5, %v4955_v2 }
 0xed4   :  { %3774 = vmatmul.mubr.msk.bf16.gmra.mxu1 %vm543_vm5, %v4982_v32  ;;  %3792 = vmatmul.mubr.msk.bf16.gmra.mxu0 %vm543_vm5, %v4982_v32 }
 0xed5   :  { %3777 = vmatprep.mubr.msk.bf16.mxu1 %vm543_vm5, %v5009_v49  ;;  %3795 = vmatprep.mubr.msk.bf16.mxu0 %vm543_vm5, %v5009_v49 }
 0xedc   :  { %3778 = vmatmul.mubr.msk.bf16.gmra.mxu1 %vm543_vm5, %v5036_v57  ;;  %3796 = vmatmul.mubr.msk.bf16.gmra.mxu0 %vm543_vm5, %v5036_v57 }
 0xedd   :  { %3781 = vmatprep.mubr.msk.bf16.mxu1 %vm543_vm5, %v1794_v3  ;;  %3799 = vmatprep.mubr.msk.bf16.mxu0 %vm543_vm5, %v1794_v3 }
 0xf84   :  { %v1832_v2 = vpop.f32.mrf.mxu1  ;;  %v1873_v32 = vpop.f32.mrf.mxu0 }
 0xf85   :  { %v1880_v14 = vadd.f32 %v1832_v2, %v874_v33  ;;  %v1874_v5 = vadd.f32 %v4255_v36, %v1873_v32 }
 0xf86   :  { %v3759_v49 = vpop.f32.mrf.mxu1  ;;  %v3765_v38 = vpop.f32.mrf.mxu0 }
 0xf87   :  { %v3420_v41 = vmul.f32 -1.442695, %v1880_v14  ;;  %v5150_v38 = vld [vmem:[%s5565_s18] sm:$0xff]   ;;  %s4265_s18 = smov 64  }
 0xf88   :  { %v1835_v59 = vpop.f32.mrf.mxu1  ;;  %v1876_v57 = vpop.f32.mrf.mxu0  ;;  %3804 = vmatpush3.bf16.msra.mxu1 %v5150_v38 }
 0xf89   :  { %4146 = vpow2.f32 %v3420_v41  ;;  %v1881_v56 = vadd.f32 %v1835_v59, %v877_v11  ;;  %v1877_v45 = vadd.f32 %v4255_v36, %v1876_v57  ;;  %3815 = vmatprep.subr.bf16.mxu1 %v4257_v0  ;;  %v5159_v59 = vld [vmem:[%s5566_s19] sm:$0xff]  }
 0xf8a   :  { %v3760_v62 = vpop.f32.mrf.mxu1  ;;  %v3766_v16 = vpop.f32.mrf.mxu0  ;;  %3810 = vmatpush3.bf16.msra.mxu0 %v5159_v59 }
 0xf8b   :  { %v3421_v35 = vmul.f32 -1.442695, %v1881_v56  ;;  %3821 = vmatprep.subr.bf16.mxu0 %v4257_v0 }
 0xf8c   :  { %v5108_v37 = vpop.f32.mrf.mxu1  ;;  %v5122_v25 = vpop.f32.mrf.mxu0 }
 0xf8d   :  { %4148 = vpow2.f32 %v3421_v35 }
 0xf8e   :  { %v1972_v1 = vpop.f32.mrf.mxu1  ;;  %v2084_v52 = vpop.f32.mrf.mxu0 }
 0xf8f   :  { %v1973_v9 = vadd.f32 %v5113_v19, %v1972_v1  ;;  %v2085_v54 = vadd.f32 %v5139_v51, %v2084_v52 }
 0xf90   :  { %v5116_v24 = vpop.f32.mrf.mxu1  ;;  %v5134_v58 = vpop.f32.mrf.mxu0 }
 0xf91   :  { %v3442_v28 = vmul.f32 -1.442695, %v1973_v9 }
 0xf92   :  { %v1975_v21 = vpop.f32.mrf.mxu1  ;;  %v2087_v55 = vpop.f32.mrf.mxu0 }
 0xf93   :  { %4150 = vpow2.f32 %v3442_v28  ;;  %v1976_v31 = vadd.f32 %v5113_v19, %v1975_v21  ;;  %v2088_v33 = vadd.f32 %v5139_v51, %v2087_v55 }
 0xf94   :  { %v5189_v36 = vpop.f32.mrf.mxu1 }
 0xf95   :  { %v3443_v13 = vmul.f32 -1.442695, %v1976_v31 }
 0xf96   :  { %v4147_v15 = vpop.eup %4146 }
 0xf97   :  { %v1888_v7 = vadd.f32 1.0, %v4147_v15  ;;  %4152 = vpow2.f32 %v3443_v13 }
 0xf99   :  { %4154 = vrcp.f32 %v1888_v7 }
 0xf9a   :  { %v4149_v22 = vpop.eup %4148 }
 0xf9b   :  { %v1889_v12 = vadd.f32 1.0, %v4149_v22 }
 0xf9d   :  { %4156 = vrcp.f32 %v1889_v12 }
 0xfa0   :  { %v4151_v4 = vpop.eup %4150 }
 0xfa1   :  { %v2158_v17 = vadd.f32 1.0, %v4151_v4 }
 0xfa3   :  { %4158 = vrcp.f32 %v2158_v17 }
 0xfa4   :  { %v4153_v53 = vpop.eup %4152 }
 0xfa5   :  { %v2159_v63 = vadd.f32 1.0, %v4153_v53 }
 0xfa6   :  { %v4155_v42 = vpop.eup %4154 }
 0xfa7   :  { %v1894_v60 = vmul.f32 %v4155_v42, %v1874_v5  ;;  %4160 = vrcp.f32 %v2159_v63  ;;  %v1900_v56 = vsub.f32 1.0, %v4155_v42  ;;  %v1912_v1 = vmul.f32 %v4155_v42, %v5066_v27  ;;  %v5191_v5 = vpop.f32.mrf.mxu0  ;;  %v5193_v63 = vpop.f32.mrf.mxu1 }
 0xfa9   :  { %v1896_v61 = vadd.f32 %v1894_v60, %v982_v30  ;;  %v5195_v42 = vpop.f32.mrf.mxu0  ;;  %v5197_v23 = vpop.f32.mrf.mxu1 }
 0xfaa   :  { %v4157_v18 = vpop.eup %4156 }
 0xfab   :  { %4162 = vtanh.f32 %v1896_v61  ;;  %v1895_v47 = vmul.f32 %v4157_v18, %v1877_v45  ;;  %v1901_v16 = vsub.f32 1.0, %v4157_v18  ;;  %v1913_v9 = vmul.f32 %v4157_v18, %v5068_v34  ;;  %v5199_v30 = vpop.f32.mrf.mxu0  ;;  %v5201_v60 = vpop.f32.mrf.mxu1 }
 0xfad   :  { %v1897_v48 = vadd.f32 %v1895_v47, %v985_v50  ;;  %v5203_v61 = vpop.f32.mrf.mxu0  ;;  %v5205_v45 = vpop.f32.mrf.mxu1 }
 0xfaf   :  { %4164 = vtanh.f32 %v1897_v48  ;;  %v5207_v18 = vpop.f32.mrf.mxu0  ;;  %v5209_v52 = vpop.f32.mrf.mxu1 }
 0xfb0   :  { %v4159_v44 = vpop.eup %4158 }
 0xfb1   :  { %v2170_v46 = vmul.f32 %v4159_v44, %v5132_v40  ;;  %v2176_v7 = vsub.f32 1.0, %v4159_v44  ;;  %v5211_v50 = vpop.f32.mrf.mxu0  ;;  %v5213_v47 = vpop.f32.mrf.mxu1 }
 0xfb3   :  { %v2172_v3 = vadd.f32 %v2170_v46, %v2085_v54  ;;  %v5215_v48 = vpop.f32.mrf.mxu0  ;;  %v5217_v44 = vpop.f32.mrf.mxu1 }
 0xfb4   :  { %v4161_v10 = vpop.eup %4160 }
 0xfb5   :  { %4166 = vtanh.f32 %v2172_v3  ;;  %v2171_v2 = vmul.f32 %v4161_v10, %v5132_v40  ;;  %v2177_v22 = vsub.f32 1.0, %v4161_v10  ;;  %v5219_v54 = vpop.f32.mrf.mxu0 }
 0xfb7   :  { %v2173_v32 = vadd.f32 %v2171_v2, %v2088_v33 }
 0xfb8   :  { %v4163_v14 = vpop.eup %4162 }
 0xfb9   :  { %4168 = vtanh.f32 %v2173_v32  ;;  %1904 = vrot.lane.b32.xlu0 %v4163_v14, %s4261_s27 }
 0xfbc   :  { %v4165_v49 = vpop.eup %4164 }
 0xfbd   :  { %1906 = vrot.lane.b32.xlu1 %v4165_v49, %s4261_s27  ;;  %v1981_v49 = vadd.f32 %v5108_v37, %v5113_v19 }
 0xfc2   :  { %v4167_v11 = vpop.eup %4166 }
 0xfc3   :  { %2180 = vrot.lane.b32.xlu0 %v4167_v11, %s4261_s27 }
 0xfc6   :  { %v4169_v41 = vpop.eup %4168 }
 0xfc7   :  { %2182 = vrot.lane.b32.xlu1 %v4169_v41, %s4261_s27 }
0x102b   :  { %v1905_v57 = vpop.permute.xlu0 %1904 }
0x102c   :  { %v1910_v62 = vmul.f32 %v1905_v57, %v1900_v56 }
0x102e   :  { %v1914_v21 = vadd.f32 %v1912_v1, %v1910_v62 }
0x102f   :  { %v1907_v35 = vpop.permute.xlu1 %1906 }
0x1030   :  { %v1911_v28 = vmul.f32 %v1907_v35, %v1901_v16  ;;  %v1984_v16 = vadd.f32 %v5116_v24, %v5113_v19  ;;  %v2093_v24 = vadd.f32 %v5122_v25, %v5139_v51 }
0x1032   :  { %v1915_v31 = vadd.f32 %v1913_v9, %v1911_v28 }
0x1034   :  { %v1916_v13 = vpack.c.bf16 %v1915_v31, %v1914_v21 }
0x1035   :  { %v2181_v15 = vpop.permute.xlu0 %2180 }
0x1036   :  { %1927 = vrot.lane.b32.xlu0 %v1916_v13, %s4264_s26  ;;  %v5166_v4 = vmul.f32 %v2181_v15, %v2176_v7 }
0x1039   :  { %v2183_v12 = vpop.permute.xlu1 %2182 }
0x103a   :  { %v5168_v17 = vmul.f32 %v2183_v12, %v2177_v22 }
0x103c   :  { %v2188_v53 = vpack.c.bf16 %v5168_v17, %v5166_v4 }
0x103e   :  { %2190 = vrot.lane.b32.xlu1 %v2188_v53, %s4264_s26 }
0x10a8   :  { %v1928_v27 = vpop.permute.xlu0 %1927 }
0x10a9   :  { %3782 = vmatmul.mubr.msk.bf16.gmra.mxu1 %vm543_vm5, %v1928_v27  ;;  %3800 = vmatmul.mubr.msk.bf16.gmra.mxu0 %vm543_vm5, %v1928_v27 }
0x10aa   :  { %3805 = vmatprep.mubr.msk.bf16.mxu1 %vm4258_vm1, %v4257_v0  ;;  %3811 = vmatprep.mubr.msk.bf16.mxu0 %vm4258_vm1, %v4257_v0 }
0x10b0   :  { %v2191_v34 = vpop.permute.xlu1 %2190 }
0x10b1   :  { %3806 = vmatmul.mubr.msk.bf16.vlgmr.msra.gmra.mxu1 %vm543_vm5, %v2191_v34  ;;  %3812 = vmatmul.mubr.msk.bf16.vlgmr.msra.gmra.mxu0 %vm543_vm5, %v2191_v34 }
0x10b2   :  { %3816 = vmatpush3.bf16.msra.mxu1 %v5150_v38  ;;  %3822 = vmatpush3.bf16.msra.mxu0 %v5159_v59 }
0x10b3   :  { %3817 = vmatprep.mubr.msk.bf16.mxu1 %vm4258_vm1, %v4257_v0  ;;  %3823 = vmatprep.mubr.msk.bf16.mxu0 %vm4258_vm1, %v4257_v0 }
0x10b4   :  { %3827 = vmatprep.subr.bf16.mxu1 %v4257_v0  ;;  %3833 = vmatprep.subr.bf16.mxu0 %v4257_v0 }
0x1169   :  { %v5221_v46 = vpop.f32.mrf.mxu1  ;;  %v5223_v55 = vpop.f32.mrf.mxu0 }
0x116b   :  { %v5225_v3 = vpop.f32.mrf.mxu1  ;;  %v5227_v10 = vpop.f32.mrf.mxu0 }
0x116d   :  { %v5229_v33 = vpop.f32.mrf.mxu1  ;;  %v5231_v2 = vpop.f32.mrf.mxu0 }
0x116f   :  { %v5233_v32 = vpop.f32.mrf.mxu1  ;;  %v5235_v14 = vpop.f32.mrf.mxu0 }
0x1171   :  { %v2235_v11 = vpop.f32.mrf.mxu1  ;;  %v2282_v41 = vpop.f32.mrf.mxu0 }
0x1172   :  { %v2289_v57 = vadd.f32 %v2235_v11, %v1981_v49  ;;  %v2283_v12 = vadd.f32 %v5132_v40, %v2282_v41 }
0x1173   :  { %v3807_v56 = vpop.f32.mrf.mxu1  ;;  %v3813_v62 = vpop.f32.mrf.mxu0 }
0x1174   :  { %v3449_v35 = vmul.f32 -1.442695, %v2289_v57  ;;  %v2096_v57 = vadd.f32 %v5134_v58, %v5139_v51 }
0x1175   :  { %v2238_v1 = vpop.f32.mrf.mxu1  ;;  %v2285_v9 = vpop.f32.mrf.mxu0 }
0x1176   :  { %4170 = vpow2.f32 %v3449_v35  ;;  %v2290_v28 = vadd.f32 %v2238_v1, %v1984_v16  ;;  %v2286_v49 = vadd.f32 %v5132_v40, %v2285_v9 }
0x1177   :  { %v3808_v21 = vpop.f32.mrf.mxu1  ;;  %v3814_v31 = vpop.f32.mrf.mxu0 }
0x1178   :  { %v3450_v13 = vmul.f32 -1.442695, %v2290_v28 }
0x117a   :  { %4172 = vpow2.f32 %v3450_v13 }
0x1183   :  { %v4171_v15 = vpop.eup %4170 }
0x1184   :  { %v2297_v7 = vadd.f32 1.0, %v4171_v15 }
0x1186   :  { %4174 = vrcp.f32 %v2297_v7 }
0x1187   :  { %v4173_v37 = vpop.eup %4172 }
0x1188   :  { %v2298_v22 = vadd.f32 1.0, %v4173_v37 }
0x118a   :  { %4176 = vrcp.f32 %v2298_v22  ;;  %v1989_v22 = vadd.f32 %v5113_v19, %v5193_v63 }
0x1193   :  { %v4175_v53 = vpop.eup %4174 }
0x1194   :  { %v2303_v27 = vmul.f32 %v4175_v53, %v2283_v12  ;;  %v2309_v25 = vsub.f32 1.0, %v4175_v53  ;;  %v2321_v9 = vmul.f32 %v4175_v53, %v5166_v4 }
0x1196   :  { %v2305_v34 = vadd.f32 %v2303_v27, %v2093_v24 }
0x1197   :  { %v4177_v11 = vpop.eup %4176 }
0x1198   :  { %4178 = vtanh.f32 %v2305_v34  ;;  %v2304_v56 = vmul.f32 %v4177_v11, %v2286_v49  ;;  %v2310_v28 = vsub.f32 1.0, %v4177_v11  ;;  %v2322_v31 = vmul.f32 %v4177_v11, %v5168_v17 }
0x1199   :  { %v1992_v49 = vadd.f32 %v5113_v19, %v5201_v60  ;;  %v2101_v60 = vadd.f32 %v5139_v51, %v5195_v42 }
0x119a   :  { %v2306_v62 = vadd.f32 %v2304_v56, %v2096_v57 }
0x119c   :  { %4180 = vtanh.f32 %v2306_v62 }
0x11a5   :  { %v4179_v16 = vpop.eup %4178 }
0x11a6   :  { %2313 = vrot.lane.b32.xlu0 %v4179_v16, %s4261_s27 }
0x11a9   :  { %v4181_v41 = vpop.eup %4180 }
0x11aa   :  { %2315 = vrot.lane.b32.xlu1 %v4181_v41, %s4261_s27 }
0x1218   :  { %v2314_v35 = vpop.permute.xlu0 %2313 }
0x1219   :  { %v2319_v1 = vmul.f32 %v2314_v35, %v2309_v25 }
0x121b   :  { %v5251_v13 = vadd.f32 %v2321_v9, %v2319_v1 }
0x121c   :  { %v2316_v21 = vpop.permute.xlu1 %2315 }
0x121d   :  { %v2320_v58 = vmul.f32 %v2316_v21, %v2310_v28 }
0x121f   :  { %v5253_v15 = vadd.f32 %v2322_v31, %v2320_v58 }
0x1221   :  { %v2325_v7 = vpack.c.bf16 %v5253_v15, %v5251_v13 }
0x1223   :  { %2327 = vrot.lane.b32.xlu0 %v2325_v7, %s4264_s26 }
0x1295   :  { %v2328_v37 = vpop.permute.xlu0 %2327 }
0x1296   :  { %3818 = vmatmul.mubr.msk.bf16.vlgmr.msra.gmra.mxu1 %vm543_vm5, %v2328_v37  ;;  %3824 = vmatmul.mubr.msk.bf16.vlgmr.msra.gmra.mxu0 %vm543_vm5, %v2328_v37 }
0x1297   :  { %3828 = vmatpush3.bf16.msra.mxu1 %v5150_v38  ;;  %3834 = vmatpush3.bf16.msra.mxu0 %v5159_v59 }
0x1298   :  { %3829 = vmatprep.mubr.msk.bf16.mxu1 %vm4258_vm1, %v4257_v0  ;;  %3835 = vmatprep.mubr.msk.bf16.mxu0 %vm4258_vm1, %v4257_v0 }
0x1299   :  { %3839 = vmatprep.subr.bf16.mxu1 %v4257_v0  ;;  %3845 = vmatprep.subr.bf16.mxu0 %v4257_v0 }
0x1356   :  { %v2366_v12 = vpop.f32.mrf.mxu1  ;;  %v2407_v53 = vpop.f32.mrf.mxu0 }
0x1357   :  { %v2414_v24 = vadd.f32 %v2366_v12, %v1989_v22  ;;  %v2408_v21 = vadd.f32 %v5132_v40, %v2407_v53  ;;  %v2104_v22 = vadd.f32 %v5139_v51, %v5203_v61 }
0x1358   :  { %v3819_v27 = vpop.f32.mrf.mxu1  ;;  %v3825_v34 = vpop.f32.mrf.mxu0 }
0x1359   :  { %v3453_v11 = vmul.f32 -1.442695, %v2414_v24 }
0x135a   :  { %v2369_v57 = vpop.f32.mrf.mxu1  ;;  %v2410_v56 = vpop.f32.mrf.mxu0 }
0x135b   :  { %4182 = vpow2.f32 %v3453_v11  ;;  %v2415_v62 = vadd.f32 %v2369_v57, %v1992_v49  ;;  %v2411_v7 = vadd.f32 %v5132_v40, %v2410_v56 }
0x135c   :  { %v3820_v16 = vpop.f32.mrf.mxu1  ;;  %v3826_v41 = vpop.f32.mrf.mxu0 }
0x135d   :  { %v3454_v35 = vmul.f32 -1.442695, %v2415_v62 }
0x135f   :  { %4184 = vpow2.f32 %v3454_v35 }
0x1368   :  { %v4183_v25 = vpop.eup %4182 }
0x1369   :  { %v2422_v1 = vadd.f32 1.0, %v4183_v25 }
0x136b   :  { %4186 = vrcp.f32 %v2422_v1  ;;  %v1997_v1 = vadd.f32 %v5189_v36, %v5113_v19 }
0x136c   :  { %v4185_v63 = vpop.eup %4184 }
0x136d   :  { %v2423_v28 = vadd.f32 1.0, %v4185_v63 }
0x136f   :  { %4188 = vrcp.f32 %v2423_v28 }
0x1378   :  { %v4187_v9 = vpop.eup %4186 }
0x1379   :  { %v2428_v31 = vmul.f32 %v4187_v9, %v2408_v21  ;;  %v2434_v42 = vsub.f32 1.0, %v4187_v9  ;;  %v2446_v56 = vmul.f32 %v4187_v9, %v5251_v13 }
0x137b   :  { %v2430_v58 = vadd.f32 %v2428_v31, %v2101_v60  ;;  %v2000_v31 = vadd.f32 %v5197_v23, %v5113_v19  ;;  %v2109_v23 = vadd.f32 %v5191_v5, %v5139_v51 }
0x137c   :  { %v4189_v37 = vpop.eup %4188 }
0x137d   :  { %4190 = vtanh.f32 %v2430_v58  ;;  %v2429_v12 = vmul.f32 %v4189_v37, %v2411_v7  ;;  %v2435_v11 = vsub.f32 1.0, %v4189_v37  ;;  %v2447_v62 = vmul.f32 %v4189_v37, %v5253_v15 }
0x137f   :  { %v2431_v24 = vadd.f32 %v2429_v12, %v2104_v22 }
0x1381   :  { %4192 = vtanh.f32 %v2431_v24 }
0x138a   :  { %v4191_v27 = vpop.eup %4190 }
0x138b   :  { %2438 = vrot.lane.b32.xlu1 %v4191_v27, %s4261_s27 }
0x138e   :  { %v4193_v53 = vpop.eup %4192 }
0x138f   :  { %2440 = vrot.lane.b32.xlu0 %v4193_v53, %s4261_s27 }
0x13fd   :  { %v2439_v34 = vpop.permute.xlu1 %2438 }
0x13fe   :  { %v2444_v49 = vmul.f32 %v2439_v34, %v2434_v42 }
0x1400   :  { %v5282_v16 = vadd.f32 %v2446_v56, %v2444_v49 }
0x1401   :  { %v2441_v57 = vpop.permute.xlu0 %2440 }
0x1402   :  { %v2445_v61 = vmul.f32 %v2441_v57, %v2435_v11 }
0x1404   :  { %v5284_v41 = vadd.f32 %v2447_v62, %v2445_v61 }
0x1406   :  { %v2450_v35 = vpack.c.bf16 %v5284_v41, %v5282_v16 }
0x1408   :  { %2452 = vrot.lane.b32.xlu1 %v2450_v35, %s4264_s26  ;;  %v2112_v35 = vadd.f32 %v5199_v30, %v5139_v51 }
0x147a   :  { %v2453_v25 = vpop.permute.xlu1 %2452 }
0x147b   :  { %3830 = vmatmul.mubr.msk.bf16.vlgmr.msra.gmra.mxu1 %vm543_vm5, %v2453_v25  ;;  %3836 = vmatmul.mubr.msk.bf16.vlgmr.msra.gmra.mxu0 %vm543_vm5, %v2453_v25 }
0x147c   :  { %3840 = vmatpush3.bf16.msra.mxu1 %v5150_v38  ;;  %3846 = vmatpush3.bf16.msra.mxu0 %v5159_v59 }
0x147d   :  { %3841 = vmatprep.mubr.msk.bf16.mxu1 %vm4258_vm1, %v4257_v0  ;;  %3847 = vmatprep.mubr.msk.bf16.mxu0 %vm4258_vm1, %v4257_v0 }
0x147e   :  { %3851 = vmatprep.subr.bf16.mxu1 %v4257_v0  ;;  %3857 = vmatprep.subr.bf16.mxu0 %v4257_v0 }
0x153b   :  { %v2491_v63 = vpop.f32.mrf.mxu1  ;;  %v2532_v28 = vpop.f32.mrf.mxu0 }
0x153c   :  { %v2539_v21 = vadd.f32 %v2491_v63, %v1997_v1  ;;  %v2533_v49 = vadd.f32 %v5132_v40, %v2532_v28 }
0x153d   :  { %v3831_v9 = vpop.f32.mrf.mxu1  ;;  %v3837_v60 = vpop.f32.mrf.mxu0 }
0x153e   :  { %v3457_v58 = vmul.f32 -1.442695, %v2539_v21 }
0x153f   :  { %v2494_v7 = vpop.f32.mrf.mxu1  ;;  %v2535_v37 = vpop.f32.mrf.mxu0 }
0x1540   :  { %4194 = vpow2.f32 %v3457_v58  ;;  %v2540_v22 = vadd.f32 %v2494_v7, %v2000_v31  ;;  %v2536_v62 = vadd.f32 %v5132_v40, %v2535_v37 }
0x1541   :  { %v3832_v12 = vpop.f32.mrf.mxu1  ;;  %v3838_v24 = vpop.f32.mrf.mxu0 }
0x1542   :  { %v3458_v27 = vmul.f32 -1.442695, %v2540_v22 }
0x1544   :  { %4196 = vpow2.f32 %v3458_v27  ;;  %v2005_v27 = vadd.f32 %v5113_v19, %v5209_v52 }
0x154d   :  { %v4195_v53 = vpop.eup %4194 }
0x154e   :  { %v2547_v34 = vadd.f32 1.0, %v4195_v53 }
0x1550   :  { %4198 = vrcp.f32 %v2547_v34 }
0x1551   :  { %v4197_v36 = vpop.eup %4196 }
0x1552   :  { %v2548_v42 = vadd.f32 1.0, %v4197_v36 }
0x1554   :  { %4200 = vrcp.f32 %v2548_v42 }
0x155d   :  { %v4199_v11 = vpop.eup %4198 }
0x155e   :  { %v2553_v57 = vmul.f32 %v4199_v11, %v2533_v49  ;;  %v2559_v5 = vsub.f32 1.0, %v4199_v11  ;;  %v2571_v58 = vmul.f32 %v4199_v11, %v5282_v16  ;;  %v2008_v11 = vadd.f32 %v5113_v19, %v5217_v44 }
0x155f   :  { %v2117_v44 = vadd.f32 %v5139_v51, %v5211_v50 }
0x1560   :  { %v2555_v56 = vadd.f32 %v2553_v57, %v2109_v23 }
0x1561   :  { %v4201_v61 = vpop.eup %4200 }
0x1562   :  { %4202 = vtanh.f32 %v2555_v56  ;;  %v2554_v25 = vmul.f32 %v4201_v61, %v2536_v62  ;;  %v2560_v60 = vsub.f32 1.0, %v4201_v61  ;;  %v2572_v7 = vmul.f32 %v4201_v61, %v5284_v41 }
0x1564   :  { %v2556_v1 = vadd.f32 %v2554_v25, %v2112_v35 }
0x1566   :  { %4204 = vtanh.f32 %v2556_v1 }
0x156f   :  { %v4203_v63 = vpop.eup %4202 }
0x1570   :  { %2563 = vrot.lane.b32.xlu0 %v4203_v63, %s4261_s27 }
0x1573   :  { %v4205_v28 = vpop.eup %4204 }
0x1574   :  { %2565 = vrot.lane.b32.xlu1 %v4205_v28, %s4261_s27 }
0x15e2   :  { %v2564_v21 = vpop.permute.xlu0 %2563 }
0x15e3   :  { %v2569_v9 = vmul.f32 %v2564_v21, %v2559_v5 }
0x15e5   :  { %v5313_v37 = vadd.f32 %v2571_v58, %v2569_v9 }
0x15e6   :  { %v2566_v31 = vpop.permute.xlu1 %2565 }
0x15e7   :  { %v2570_v30 = vmul.f32 %v2566_v31, %v2560_v60 }
0x15e9   :  { %v5315_v22 = vadd.f32 %v2572_v7, %v2570_v30  ;;  %v2120_v7 = vadd.f32 %v5139_v51, %v5219_v54 }
0x15eb   :  { %v2575_v12 = vpack.c.bf16 %v5315_v22, %v5313_v37 }
0x15ed   :  { %2577 = vrot.lane.b32.xlu0 %v2575_v12, %s4264_s26 }
0x165f   :  { %v2578_v24 = vpop.permute.xlu0 %2577 }
0x1660   :  { %3842 = vmatmul.mubr.msk.bf16.vlgmr.msra.gmra.mxu1 %vm543_vm5, %v2578_v24  ;;  %3848 = vmatmul.mubr.msk.bf16.vlgmr.msra.gmra.mxu0 %vm543_vm5, %v2578_v24 }
0x1661   :  { %3852 = vmatpush3.bf16.msra.mxu1 %v5150_v38  ;;  %3858 = vmatpush3.bf16.msra.mxu0 %v5159_v59 }
0x1662   :  { %3853 = vmatprep.mubr.msk.bf16.mxu1 %vm4258_vm1, %v4257_v0  ;;  %3859 = vmatprep.mubr.msk.bf16.mxu0 %vm4258_vm1, %v4257_v0 }
0x1663   :  { %3863 = vmatprep.subr.bf16.mxu1 %v4257_v0  ;;  %3869 = vmatprep.subr.bf16.mxu0 %v4257_v0 }
0x1720   :  { %v2616_v53 = vpop.f32.mrf.mxu1  ;;  %v2657_v34 = vpop.f32.mrf.mxu0 }
0x1721   :  { %v2664_v36 = vadd.f32 %v2616_v53, %v2005_v27  ;;  %v2658_v21 = vadd.f32 %v5132_v40, %v2657_v34 }
0x1722   :  { %v3843_v42 = vpop.f32.mrf.mxu1  ;;  %v3849_v49 = vpop.f32.mrf.mxu0 }
0x1723   :  { %v3461_v23 = vmul.f32 -1.442695, %v2664_v36 }
0x1724   :  { %v2619_v57 = vpop.f32.mrf.mxu1  ;;  %v2660_v56 = vpop.f32.mrf.mxu0 }
0x1725   :  { %4206 = vpow2.f32 %v3461_v23  ;;  %v2665_v62 = vadd.f32 %v2619_v57, %v2008_v11  ;;  %v2661_v31 = vadd.f32 %v5132_v40, %v2660_v56 }
0x1726   :  { %v3844_v61 = vpop.f32.mrf.mxu1  ;;  %v3850_v35 = vpop.f32.mrf.mxu0 }
0x1727   :  { %v3462_v25 = vmul.f32 -1.442695, %v2665_v62  ;;  %v2013_v61 = vadd.f32 %v5205_v45, %v5113_v19 }
0x1729   :  { %4208 = vpow2.f32 %v3462_v25 }
0x1732   :  { %v4207_v1 = vpop.eup %4206 }
0x1733   :  { %v2672_v63 = vadd.f32 1.0, %v4207_v1 }
0x1735   :  { %4210 = vrcp.f32 %v2672_v63 }
0x1736   :  { %v4209_v52 = vpop.eup %4208 }
0x1737   :  { %v2673_v28 = vadd.f32 1.0, %v4209_v52 }
0x1739   :  { %4212 = vrcp.f32 %v2673_v28  ;;  %v2016_v28 = vadd.f32 %v5213_v47, %v5113_v19  ;;  %v2125_v47 = vadd.f32 %v5207_v18, %v5139_v51 }
0x1742   :  { %v4211_v5 = vpop.eup %4210 }
0x1743   :  { %v2678_v9 = vmul.f32 %v4211_v5, %v2658_v21  ;;  %v2684_v50 = vsub.f32 1.0, %v4211_v5  ;;  %v2696_v49 = vmul.f32 %v4211_v5, %v5313_v37 }
0x1745   :  { %v2680_v60 = vadd.f32 %v2678_v9, %v2117_v44 }
0x1746   :  { %v4213_v58 = vpop.eup %4212 }
0x1747   :  { %4214 = vtanh.f32 %v2680_v60  ;;  %v2679_v30 = vmul.f32 %v4213_v58, %v2661_v31  ;;  %v2685_v36 = vsub.f32 1.0, %v4213_v58  ;;  %v2697_v11 = vmul.f32 %v4213_v58, %v5315_v22 }
0x1749   :  { %v2681_v12 = vadd.f32 %v2679_v30, %v2120_v7 }
0x174b   :  { %4216 = vtanh.f32 %v2681_v12 }
0x1754   :  { %v4215_v24 = vpop.eup %4214 }
0x1755   :  { %2688 = vrot.lane.b32.xlu1 %v4215_v24, %s4261_s27 }
0x1758   :  { %v4217_v27 = vpop.eup %4216 }
0x1759   :  { %2690 = vrot.lane.b32.xlu0 %v4217_v27, %s4261_s27 }
0x17c7   :  { %v2689_v53 = vpop.permute.xlu1 %2688 }
0x17c8   :  { %v2694_v34 = vmul.f32 %v2689_v53, %v2684_v50 }
0x17ca   :  { %v5344_v23 = vadd.f32 %v2696_v49, %v2694_v34 }
0x17cb   :  { %v2691_v42 = vpop.permute.xlu0 %2690 }
0x17cc   :  { %v2695_v54 = vmul.f32 %v2691_v42, %v2685_v36  ;;  %v2128_v42 = vadd.f32 %v5215_v48, %v5139_v51 }
0x17ce   :  { %v5346_v57 = vadd.f32 %v2697_v11, %v2695_v54 }
0x17d0   :  { %v2700_v56 = vpack.c.bf16 %v5346_v57, %v5344_v23 }
0x17d2   :  { %2702 = vrot.lane.b32.xlu1 %v2700_v56, %s4264_s26 }
0x1844   :  { %v2703_v62 = vpop.permute.xlu1 %2702 }
0x1845   :  { %3854 = vmatmul.mubr.msk.bf16.vlgmr.msra.gmra.mxu1 %vm543_vm5, %v2703_v62  ;;  %3860 = vmatmul.mubr.msk.bf16.vlgmr.msra.gmra.mxu0 %vm543_vm5, %v2703_v62 }
0x1846   :  { %3864 = vmatpush3.bf16.msra.mxu1 %v5150_v38  ;;  %3870 = vmatpush3.bf16.msra.mxu0 %v5159_v59 }
0x1847   :  { %3865 = vmatprep.mubr.msk.bf16.mxu1 %vm4258_vm1, %v4257_v0  ;;  %3871 = vmatprep.mubr.msk.bf16.mxu0 %vm4258_vm1, %v4257_v0 }
0x1848   :  { %3875 = vmatprep.subr.bf16.mxu1 %v4257_v0  ;;  %3881 = vmatprep.subr.bf16.mxu0 %v4257_v0 }
0x1905   :  { %v2741_v35 = vpop.f32.mrf.mxu1  ;;  %v2782_v25 = vpop.f32.mrf.mxu0 }
0x1906   :  { %v2789_v1 = vadd.f32 %v2741_v35, %v2013_v61  ;;  %v2783_v24 = vadd.f32 %v5132_v40, %v2782_v25 }
0x1907   :  { %v3855_v63 = vpop.f32.mrf.mxu1  ;;  %v3861_v52 = vpop.f32.mrf.mxu0 }
0x1908   :  { %v3465_v21 = vmul.f32 -1.442695, %v2789_v1 }
0x1909   :  { %v2744_v5 = vpop.f32.mrf.mxu1  ;;  %v2785_v44 = vpop.f32.mrf.mxu0 }
0x190a   :  { %4218 = vpow2.f32 %v3465_v21  ;;  %v2790_v9 = vadd.f32 %v2744_v5, %v2016_v28  ;;  %v2786_v34 = vadd.f32 %v5132_v40, %v2785_v44  ;;  %v2021_v44 = vadd.f32 %v5113_v19, %v5225_v3 }
0x190b   :  { %v3856_v60 = vpop.f32.mrf.mxu1  ;;  %v3862_v31 = vpop.f32.mrf.mxu0 }
0x190c   :  { %v3466_v58 = vmul.f32 -1.442695, %v2790_v9 }
0x190e   :  { %4220 = vpow2.f32 %v3466_v58 }
0x1917   :  { %v4219_v7 = vpop.eup %4218 }
0x1918   :  { %v2797_v30 = vadd.f32 1.0, %v4219_v7 }
0x191a   :  { %4222 = vrcp.f32 %v2797_v30 }
0x191b   :  { %v4221_v45 = vpop.eup %4220 }
0x191c   :  { %v2798_v12 = vadd.f32 1.0, %v4221_v45 }
0x191e   :  { %4224 = vrcp.f32 %v2798_v12 }
0x1927   :  { %v4223_v27 = vpop.eup %4222 }
0x1928   :  { %v2803_v53 = vmul.f32 %v4223_v27, %v2783_v24  ;;  %v2809_v18 = vsub.f32 1.0, %v4223_v27  ;;  %v2821_v1 = vmul.f32 %v4223_v27, %v5344_v23 }
0x192a   :  { %v2805_v50 = vadd.f32 %v2803_v53, %v2125_v47 }
0x192b   :  { %v4225_v36 = vpop.eup %4224 }
0x192c   :  { %4226 = vtanh.f32 %v2805_v50  ;;  %v2804_v49 = vmul.f32 %v4225_v36, %v2786_v34  ;;  %v2810_v35 = vsub.f32 1.0, %v4225_v36  ;;  %v2822_v63 = vmul.f32 %v4225_v36, %v5346_v57 }
0x192e   :  { %v2806_v11 = vadd.f32 %v2804_v49, %v2128_v42 }
0x1930   :  { %4228 = vtanh.f32 %v2806_v11 }
0x1939   :  { %v4227_v54 = vpop.eup %4226 }
0x193a   :  { %2813 = vrot.lane.b32.xlu0 %v4227_v54, %s4261_s27 }
0x193d   :  { %v4229_v56 = vpop.eup %4228 }
0x193e   :  { %2815 = vrot.lane.b32.xlu1 %v4229_v56, %s4261_s27  ;;  %v2136_v56 = vadd.f32 %v5139_v51, %v5235_v14 }
0x19ac   :  { %v2814_v62 = vpop.permute.xlu0 %2813 }
0x19ad   :  { %v2819_v61 = vmul.f32 %v2814_v62, %v2809_v18 }
0x19af   :  { %v5375_v52 = vadd.f32 %v2821_v1, %v2819_v61 }
0x19b0   :  { %v2816_v25 = vpop.permute.xlu1 %2815 }
0x19b1   :  { %v2820_v48 = vmul.f32 %v2816_v25, %v2810_v35 }
0x19b3   :  { %v5377_v28 = vadd.f32 %v2822_v63, %v2820_v48 }
0x19b5   :  { %v2825_v21 = vpack.c.bf16 %v5377_v28, %v5375_v52 }
0x19b7   :  { %2827 = vrot.lane.b32.xlu0 %v2825_v21, %s4264_s26 }
0x1a29   :  { %v2828_v5 = vpop.permute.xlu0 %2827 }
0x1a2a   :  { %3866 = vmatmul.mubr.msk.bf16.vlgmr.msra.gmra.mxu1 %vm543_vm5, %v2828_v5  ;;  %3872 = vmatmul.mubr.msk.bf16.vlgmr.msra.gmra.mxu0 %vm543_vm5, %v2828_v5 }
0x1a2b   :  { %3876 = vmatpush3.bf16.msra.mxu1 %v5150_v38  ;;  %3882 = vmatpush3.bf16.msra.mxu0 %v5159_v59  ;;  %v2024_v38 = vadd.f32 %v5113_v19, %v5233_v32  ;;  %v2133_v32 = vadd.f32 %v5139_v51, %v5227_v10 }
0x1a2c   :  { %3877 = vmatprep.mubr.msk.bf16.mxu1 %vm4258_vm1, %v4257_v0  ;;  %3883 = vmatprep.mubr.msk.bf16.mxu0 %vm4258_vm1, %v4257_v0 }
0x1a2d   :  { %3304 = vmatprep.subr.bf16.mxu1 %v4259_v6 }
0x1aea   :  { %v2866_v9 = vpop.f32.mrf.mxu1  ;;  %v2907_v60 = vpop.f32.mrf.mxu0 }
0x1aeb   :  { %v2914_v31 = vadd.f32 %v2866_v9, %v2021_v44  ;;  %v2908_v34 = vadd.f32 %v5132_v40, %v2907_v60 }
0x1aec   :  { %v3867_v58 = vpop.f32.mrf.mxu1  ;;  %v3873_v7 = vpop.f32.mrf.mxu0 }
0x1aed   :  { %v3469_v59 = vmul.f32 -1.442695, %v2914_v31  ;;  %v2029_v58 = vadd.f32 %v5221_v46, %v5113_v19 }
0x1aee   :  { %v2869_v30 = vpop.f32.mrf.mxu1  ;;  %v2910_v45 = vpop.f32.mrf.mxu0 }
0x1aef   :  { %4230 = vpow2.f32 %v3469_v59  ;;  %v2915_v12 = vadd.f32 %v2869_v30, %v2024_v38  ;;  %v2911_v11 = vadd.f32 %v5132_v40, %v2910_v45 }
0x1af0   :  { %v3868_v24 = vpop.f32.mrf.mxu1  ;;  %v3874_v0 = vpop.f32.mrf.mxu0 }
0x1af1   :  { %v3470_v27 = vmul.f32 -1.442695, %v2915_v12  ;;  %v2032_v12 = vadd.f32 %v5229_v33, %v5113_v19  ;;  %v2141_v19 = vadd.f32 %v5223_v55, %v5139_v51  ;;  %v3983_v55 = vpack.i.bf16 %v5168_v17, %v5166_v4  ;;  %v4049_v17 = vld [vmem:[%s5567_s23 + $0x38] sm:$0xff]  }
0x1af2   :  { %v4013_v4 = vpack.i.bf16 %v5377_v28, %v5375_v52 }
0x1af3   :  { %4232 = vpow2.f32 %v3470_v27 }
0x1afc   :  { %v4231_v47 = vpop.eup %4230 }
0x1afd   :  { %v2922_v53 = vadd.f32 1.0, %v4231_v47 }
0x1aff   :  { %4234 = vrcp.f32 %v2922_v53 }
0x1b00   :  { %v4233_v3 = vpop.eup %4232 }
0x1b01   :  { %v2923_v50 = vadd.f32 1.0, %v4233_v3 }
0x1b03   :  { %4236 = vrcp.f32 %v2923_v50 }
0x1b0c   :  { %v4235_v36 = vpop.eup %4234 }
0x1b0d   :  { %v2928_v42 = vmul.f32 %v4235_v36, %v2908_v34  ;;  %v2934_v10 = vsub.f32 1.0, %v4235_v36  ;;  %v2946_v21 = vmul.f32 %v4235_v36, %v5375_v52  ;;  %v4059_v52 = vld [vmem:[%s5567_s23 + $0x50] sm:$0xff]  }
0x1b0f   :  { %v2930_v49 = vadd.f32 %v2928_v42, %v2133_v32 }
0x1b10   :  { %v4237_v54 = vpop.eup %4236 }
0x1b11   :  { %4238 = vtanh.f32 %v2930_v49  ;;  %v2929_v62 = vmul.f32 %v4237_v54, %v2911_v11  ;;  %v2935_v63 = vsub.f32 1.0, %v4237_v54  ;;  %v2947_v5 = vmul.f32 %v4237_v54, %v5377_v28  ;;  %v4060_v28 = vld [vmem:[%s5567_s23 + $0x48] sm:$0xff]  }
0x1b13   :  { %v2931_v18 = vadd.f32 %v2929_v62, %v2136_v56  ;;  %v2144_v62 = vadd.f32 %v5231_v2, %v5139_v51  ;;  %v3988_v51 = vpack.i.bf16 %v5284_v41, %v5282_v16  ;;  %v4003_v2 = vpack.i.bf16 %v5346_v57, %v5344_v23  ;;  %v4052_v41 = vld [vmem:[%s5567_s23 + $0x20] sm:$0xff]   ;;  %v4058_v57 = vld [vmem:[%s5567_s23 + $0x58] sm:$0xff]  }
0x1b14   :  { %v4057_v23 = vld [vmem:[%s5567_s23 + $0x60] sm:$0xff]  }
0x1b15   :  { %4240 = vtanh.f32 %v2931_v18 }
0x1b1e   :  { %v4239_v61 = vpop.eup %4238 }
0x1b1f   :  { %2938 = vrot.lane.b32.xlu1 %v4239_v61, %s4261_s27 }
0x1b22   :  { %v4241_v35 = vpop.eup %4240 }
0x1b23   :  { %2940 = vrot.lane.b32.xlu0 %v4241_v35, %s4261_s27 }
0x1b91   :  { %v2939_v25 = vpop.permute.xlu1 %2938 }
0x1b92   :  { %v2944_v1 = vmul.f32 %v2939_v25, %v2934_v10  ;;  %v4061_v10 = vld [vmem:[%s5567_s23 + $0x40] sm:$0xff]  }
0x1b94   :  { %v5405_v44 = vadd.f32 %v2946_v21, %v2944_v1 }
0x1b95   :  { %v2941_v48 = vpop.permute.xlu0 %2940 }
0x1b96   :  { %v2945_v14 = vmul.f32 %v2941_v48, %v2935_v63 }
0x1b98   :  { %v5407_v9 = vadd.f32 %v2947_v5, %v2945_v14 }
0x1b9a   :  { %v2950_v60 = vpack.c.bf16 %v5407_v9, %v5405_v44  ;;  %v4023_v16 = vpack.i.bf16 %v5407_v9, %v5405_v44 }
0x1b9c   :  { %2952 = vrot.lane.b32.xlu1 %v2950_v60, %s4264_s26 }
0x1c0e   :  { %v2953_v31 = vpop.permute.xlu1 %2952 }
0x1c0f   :  { %3878 = vmatmul.mubr.msk.bf16.vlgmr.msra.gmra.mxu1 %vm543_vm5, %v2953_v31  ;;  %3884 = vmatmul.mubr.msk.bf16.vlgmr.msra.gmra.mxu0 %vm543_vm5, %v2953_v31 }
0x1c10   :  { %3305 = vmatpush1.bf16.msra.mxu1 %v4049_v17 }
0x1c11   :  { %3306 = vmatprep.subr.bf16.mxu1 %v4259_v6 }
0x1ccf   :  { %v2991_v7 = vpop.f32.mrf.mxu1  ;;  %v3032_v38 = vpop.f32.mrf.mxu0 }
0x1cd0   :  { %v3039_v59 = vadd.f32 %v2991_v7, %v2029_v58  ;;  %v3033_v42 = vadd.f32 %v5132_v40, %v3032_v38 }
0x1cd1   :  { %v3879_v30 = vpop.f32.mrf.mxu1  ;;  %v3885_v45 = vpop.f32.mrf.mxu0 }
0x1cd2   :  { %v3473_v24 = vmul.f32 -1.442695, %v3039_v59 }
0x1cd3   :  { %v2994_v0 = vpop.f32.mrf.mxu1  ;;  %v3035_v27 = vpop.f32.mrf.mxu0 }
0x1cd4   :  { %4242 = vpow2.f32 %v3473_v24  ;;  %v3040_v47 = vadd.f32 %v2994_v0, %v2032_v12  ;;  %v3036_v54 = vadd.f32 %v5132_v40, %v3035_v27  ;;  %v3993_v40 = vpack.i.bf16 %v5315_v22, %v5313_v37  ;;  %v4055_v37 = vld [vmem:[%s5567_s23 + $0x8] sm:$0xff]   ;;  %v4056_v22 = vld [vmem:[%s5567_s23] sm:$0xff]  }
0x1cd5   :  { %v3880_v53 = vpop.f32.mrf.mxu1  ;;  %v3886_v3 = vpop.f32.mrf.mxu0 }
0x1cd6   :  { %v3474_v50 = vmul.f32 -1.442695, %v3040_v47 }
0x1cd8   :  { %4244 = vpow2.f32 %v3474_v50 }
0x1ce1   :  { %v4243_v34 = vpop.eup %4242 }
0x1ce2   :  { %v3047_v36 = vadd.f32 1.0, %v4243_v34 }
0x1ce4   :  { %4246 = vrcp.f32 %v3047_v36 }
0x1ce5   :  { %v4245_v46 = vpop.eup %4244 }
0x1ce6   :  { %v3048_v32 = vadd.f32 1.0, %v4245_v46 }
0x1ce8   :  { %4248 = vrcp.f32 %v3048_v32 }
0x1cf1   :  { %v5419_v49 = vpop.eup %4246 }
0x1cf2   :  { %v3053_v33 = vmul.f32 %v5419_v49, %v3033_v42  ;;  %v3059_v63 = vsub.f32 1.0, %v5419_v49  ;;  %v3071_v60 = vmul.f32 %v5419_v49, %v5405_v44 }
0x1cf4   :  { %v3055_v11 = vadd.f32 %v3053_v33, %v2141_v19 }
0x1cf5   :  { %v5425_v56 = vpop.eup %4248 }
0x1cf6   :  { %4250 = vtanh.f32 %v3055_v11  ;;  %v3054_v18 = vmul.f32 %v5425_v56, %v3036_v54  ;;  %v3060_v21 = vsub.f32 1.0, %v5425_v56  ;;  %v3072_v31 = vmul.f32 %v5425_v56, %v5407_v9 }
0x1cf8   :  { %v3056_v61 = vadd.f32 %v3054_v18, %v2144_v62 }
0x1cfa   :  { %4252 = vtanh.f32 %v3056_v61 }
0x1d03   :  { %v4251_v35 = vpop.eup %4250 }
0x1d04   :  { %3063 = vrot.lane.b32.xlu0 %v4251_v35, %s4261_s27 }
0x1d07   :  { %v4253_v25 = vpop.eup %4252 }
0x1d08   :  { %3984 = vrot.lane.b32.xlu0 %v3983_v55, %s4264_s26  ;;  %3065 = vrot.lane.b32.xlu1 %v4253_v25, %s4261_s27  ;;  %v709_v25 = vmax.f32 %v4733_v26, 0.0 }
0x1d0c   :  { %3994 = vrot.lane.b32.xlu0 %v3993_v40, %s4260_s6  ;;  %3989 = vrot.lane.b32.xlu1 %v3988_v51, %s4261_s27  ;;  %v710_v40 = vmax.f32 %v4735_v29, 0.0 }
0x1d10   :  { %4004 = vrot.lane.b32.xlu0 %v4003_v2, %s4262_s2  ;;  %3999 = vrot.lane.b32.xlu1 %v4737_v43, %s4261_s27  ;;  %v4050_v43 = vld [vmem:[%s5567_s23 + $0x30] sm:$0xff]   ;;  %s4266_s27 = smov 80  }
0x1d11   :  { %3307 = vmatpush1.bf16.msra.mxu1 %v4050_v43 }
0x1d12   :  { %3308 = vmatprep.subr.bf16.mxu1 %v4259_v6 }
0x1d14   :  { %4014 = vrot.lane.b32.xlu0 %v4013_v4, %s4265_s18  ;;  %4009 = vrot.lane.b32.xlu1 %v4741_v39, %s4260_s6  ;;  %v4051_v39 = vld [vmem:[%s5567_s23 + $0x28] sm:$0xff]  }
0x1d15   :  { %3309 = vmatpush1.bf16.msra.mxu1 %v4051_v39 }
0x1d16   :  { %3310 = vmatprep.subr.bf16.mxu1 %v4259_v6 }
0x1d18   :  { %4024 = vrot.lane.b32.xlu0 %v4023_v16, %s4266_s27  ;;  %4019 = vrot.lane.b32.xlu1 %v4752_v8, %s4262_s2  ;;  %v4053_v8 = vld [vmem:[%s5567_s23 + $0x18] sm:$0xff]  }
0x1d19   :  { %3311 = vmatpush1.bf16.msra.mxu1 %v4052_v41 }
0x1d1a   :  { %3312 = vmatprep.subr.bf16.mxu1 %v4259_v6 }
0x1d1c   :  { %4029 = vrot.lane.b32.xlu1 %v4754_v20, %s4265_s18  ;;  %v4054_v20 = vld [vmem:[%s5567_s23 + $0x10] sm:$0xff]   ;;  %s4267_s23 = smov 96  }
0x1d1d   :  { %3313 = vmatpush1.bf16.msra.mxu1 %v4053_v8 }
0x1d1e   :  { %3314 = vmatprep.subr.bf16.mxu1 %v4259_v6 }
0x1d21   :  { %3315 = vmatpush1.bf16.msra.mxu1 %v4054_v20 }
0x1d22   :  { %3316 = vmatprep.subr.bf16.mxu1 %v4259_v6 }
0x1d25   :  { %3317 = vmatpush1.bf16.msra.mxu1 %v4055_v37 }
0x1d26   :  { %3318 = vmatprep.subr.bf16.mxu1 %v4259_v6 }
0x1d29   :  { %3319 = vmatpush1.bf16.msra.mxu1 %v4056_v22 }
0x1d2a   :  { %3326 = vmatprep.subr.bf16.mxu1 %v4259_v6 }
0x1d2d   :  { %3327 = vmatpush2.bf16.msra.mxu1 %v4057_v23 }
0x1d2e   :  { %3328 = vmatprep.subr.bf16.mxu1 %v4259_v6 }
0x1d31   :  { %3329 = vmatpush2.bf16.msra.mxu1 %v4058_v57 }
0x1d32   :  { %3330 = vmatprep.subr.bf16.mxu1 %v4259_v6 }
0x1d35   :  { %3331 = vmatpush2.bf16.msra.mxu1 %v4059_v52 }
0x1d36   :  { %3332 = vmatprep.subr.bf16.mxu1 %v4259_v6 }
0x1d39   :  { %3333 = vmatpush2.bf16.msra.mxu1 %v4060_v28 }
0x1d3a   :  { %3334 = vmatprep.subr.bf16.mxu1 %v4259_v6 }
0x1d3d   :  { %3335 = vmatpush2.bf16.msra.mxu1 %v4061_v10 }
0x1d76   :  { %v3064_v1 = vpop.permute.xlu0 %3063 }
0x1d77   :  { %v3069_v48 = vmul.f32 %v3064_v1, %v3059_v63 }
0x1d79   :  { %v3073_v58 = vadd.f32 %v3071_v60, %v3069_v48  ;;  %v3475_v60 = vld [vmem:[%s5568_s24] ss:$0 sm:$0xff] }
0x1d7a   :  { %v3985_v5 = vpop.permute.xlu0 %3984  ;;  %v3066_v14 = vpop.permute.xlu1 %3065 }
0x1d7b   :  { %v3070_v6 = vmul.f32 %v3066_v14, %v3060_v21  ;;  %v3987_v30 = vunpack.i.h.bf16 %v3985_v5  ;;  %v3986_v45 = vunpack.i.l.bf16 %v3985_v5 }
0x1d7d   :  { %v3074_v7 = vadd.f32 %v3072_v31, %v3070_v6  ;;  %v3164_v44 = vsel %vm543_vm5, %v3987_v30, %v5253_v15  ;;  %v3163_v9 = vsel %vm543_vm5, %v3986_v45, %v5251_v13 }
0x1d7e   :  { %v3995_v38 = vpop.permute.xlu0 %3994  ;;  %v3990_v59 = vpop.permute.xlu1 %3989 }
0x1d7f   :  { %v4033_v12 = vpack.i.bf16 %v3074_v7, %v3073_v58  ;;  %v3992_v24 = vunpack.i.h.bf16 %v3990_v59  ;;  %v3991_v0 = vunpack.i.l.bf16 %v3990_v59  ;;  %v3997_v53 = vunpack.i.h.bf16 %v3995_v38 }
0x1d80   :  { %v3996_v3 = vunpack.i.l.bf16 %v3995_v38 }
0x1d81   :  { %4034 = vrot.lane.b32.xlu0 %v4033_v12, %s4267_s23  ;;  %v3166_v50 = vsel %vm554_vm6, %v3164_v44, %v3992_v24  ;;  %v3165_v34 = vsel %vm554_vm6, %v3163_v9, %v3991_v0 }
0x1d82   :  { %v4005_v27 = vpop.permute.xlu0 %4004  ;;  %v4000_v47 = vpop.permute.xlu1 %3999  ;;  %v3167_v49 = vsel %vm565_vm7, %v3165_v34, %v3996_v3  ;;  %v3168_v19 = vsel %vm565_vm7, %v3166_v50, %v3997_v53 }
0x1d83   :  { %v4007_v36 = vunpack.i.h.bf16 %v4005_v27  ;;  %v4006_v46 = vunpack.i.l.bf16 %v4005_v27  ;;  %v4002_v62 = vunpack.i.h.bf16 %v4000_v47  ;;  %v4001_v18 = vunpack.i.l.bf16 %v4000_v47 }
0x1d85   :  { %v3169_v11 = vsel %vm620_vm8, %v3167_v49, %v4006_v46  ;;  %v3170_v13 = vsel %vm620_vm8, %v3168_v19, %v4007_v36  ;;  %v3181_v4 = vsel %vm543_vm5, %v710_v40, %v4002_v62  ;;  %v3180_v17 = vsel %vm543_vm5, %v709_v25, %v4001_v18 }
0x1d86   :  { %v4015_v32 = vpop.permute.xlu0 %4014  ;;  %v4010_v42 = vpop.permute.xlu1 %4009 }
0x1d87   :  { %v4017_v33 = vunpack.i.h.bf16 %v4015_v32  ;;  %v4016_v15 = vunpack.i.l.bf16 %v4015_v32  ;;  %v4012_v35 = vunpack.i.h.bf16 %v4010_v42  ;;  %v4011_v55 = vunpack.i.l.bf16 %v4010_v42 }
0x1d89   :  { %v3172_v54 = vsel %vm3171_vm10, %v3169_v11, %v4016_v15  ;;  %v3173_v56 = vsel %vm3171_vm10, %v3170_v13, %v4017_v33  ;;  %v3182_v43 = vsel %vm554_vm6, %v3180_v17, %v4011_v55  ;;  %v3183_v39 = vsel %vm554_vm6, %v3181_v4, %v4012_v35 }
0x1d8a   :  { %v4020_v61 = vpop.permute.xlu1 %4019  ;;  %v4025_v23 = vpop.permute.xlu0 %4024 }
0x1d8b   :  { %v4022_v51 = vunpack.i.h.bf16 %v4020_v61  ;;  %v4021_v2 = vunpack.i.l.bf16 %v4020_v61  ;;  %v4027_v57 = vunpack.i.h.bf16 %v4025_v23  ;;  %v4026_v52 = vunpack.i.l.bf16 %v4025_v23 }
0x1d8d   :  { %v3184_v20 = vsel %vm565_vm7, %v3182_v43, %v4021_v2  ;;  %v3185_v37 = vsel %vm565_vm7, %v3183_v39, %v4022_v51  ;;  %v3175_v63 = vsel %vm3174_vm11, %v3172_v54, %v4026_v52  ;;  %v3176_v48 = vsel %vm3174_vm11, %v3173_v56, %v4027_v57 }
0x1d8e   :  { %v4030_v16 = vpop.permute.xlu1 %4029 }
0x1d8f   :  { %v4032_v41 = vunpack.i.h.bf16 %v4030_v16  ;;  %v4031_v8 = vunpack.i.l.bf16 %v4030_v16 }
0x1d91   :  { %v3186_v26 = vsel %vm620_vm8, %v3184_v20, %v4031_v8  ;;  %v3187_v29 = vsel %vm620_vm8, %v3185_v37, %v4032_v41 }
0x1d92   :  { %v3189_v22 = vpack.c.bf16 %v3187_v29, %v3186_v26 }
0x1d94   :  { %3489 = vmatprep.mubr.msk.bf16.mxu1 %vm3171_vm10, %v3189_v22 }
0x1df3   :  { %v4035_v28 = vpop.permute.xlu0 %4034 }
0x1df4   :  { %v4037_v10 = vunpack.i.h.bf16 %v4035_v28  ;;  %v4036_v1 = vunpack.i.l.bf16 %v4035_v28 }
0x1df6   :  { %v3178_v21 = vsel %vm3177_vm12, %v3175_v63, %v4036_v1  ;;  %v3179_v5 = vsel %vm3177_vm12, %v3176_v48, %v4037_v10 }
0x1df7   :  { %v3188_v14 = vpack.c.bf16 %v3179_v5, %v3178_v21 }
0x1df9   :  { %3337 = vmatmul.mubr.bf16.vlgmr.msra.gmra.mxu1 %v3188_v14 }
0x1eb9   :  { %v3338_v31 = vpop.f32.mrf.mxu1 }
0x1eba   :  { %v3339_v6 = vadd.f32 %v3475_v60, %v3338_v31 }
0x1ebb   :  { %v3340_v58 = vpop.f32.mrf.mxu1 }
0x1ebc   :  { %v3345_v7 = vmax.f32 %v3339_v6, 0.0 }
0x1ebd   :  { %v3341_v38 = vpop.f32.mrf.mxu1 }
0x1ebe   :  { %3348 = vst.msk [vmem:[%s5569_s25] sm:$0xff] %vm3347_vm13, %v3345_v7  ;;  %v3342_v59 = vadd.f32 %v3475_v60, %v3341_v38 }
0x1ebf   :  { %v3343_v30 = vpop.f32.mrf.mxu1 }
0x1ec0   :  { %v3346_v45 = vmax.f32 %v3342_v59, 0.0 }
0x1ec2   :  { %3349 = vst.msk [vmem:[%s5569_s25 + $0x8] sm:$0xff] %vm3347_vm13, %v3346_v45 }

</bundles_post_ra>
